<compile_context>
chip_gen: v6e
topology: v6e:2x2x1
jax: 0.10.0
libtpu: 0.0.40
codegen_flags: <defaults>
</compile_context>

<pallas_src>
import functools

import jax
import jax.numpy as jnp
import numpy as np
from jax.experimental import pallas as pl
from jax.experimental.pallas import tpu as pltpu

EPS = 1e-6   # LayerNorm eps (matches the module)
PAD = 8      # top/bottom halo rows in scratch (>= 3 and sublane aligned)


def _erf(x):
    # Abramowitz & Stegun 7.1.26 rational approximation (|err| <= 1.5e-7); exact
    # lax.erf lowering on Mosaic is not guaranteed, this uses only VPU/EUP ops.
    a1, a2, a3, a4, a5 = 0.254829592, -0.284496736, 1.421413741, -1.453152027, 1.061405429
    p = 0.3275911
    ax = jnp.abs(x)
    t = 1.0 / (1.0 + p * ax)
    poly = ((((a5 * t + a4) * t + a3) * t + a2) * t + a1) * t
    y = 1.0 - poly * jnp.exp(-ax * ax)
    return jnp.where(x >= 0, y, -y)


def _gelu_exact(x):
    # torch.nn.GELU() default (approximate='none'): 0.5*x*(1+erf(x/sqrt(2)))
    return 0.5 * x * (1.0 + _erf(x * 0.7071067811865476))


def _rcnb_kernel(x_ref, dw_ref, seg_ref, nw_ref, nb_ref, b1_ref, b2_ref, g_ref,
                 o_ref, pad_ref, *, H, WC, C):
    # x_ref:   (1, H, W*C) input slab               dw_ref: (7, WC, WC) f32 banded
    # seg_ref: (WC, WC) channel-group-sum matrix    b1/b2:  (3, WC, WC) bf16 banded
    # nw/nb/g: (1, WC) per-channel vectors tiled over W
    # pad_ref: VMEM scratch (PAD + H + PAD, WC) f32 (H-halo slab)
    x_in = x_ref[0].astype(jnp.float32)                      # (H, WC)

    # Zero only the halo rows; the interior is overwritten by every conv pass.
    # Done every grid step (scratch is per-core on megacore parts, so a
    # program_id==0 guard would be unsafe); cost = 2 aligned 8-row stores.
    zeros_halo = jnp.zeros((PAD, WC), jnp.float32)
    pad_ref[0:PAD, :] = zeros_halo
    pad_ref[PAD + H:2 * PAD + H, :] = zeros_halo

    def conv_pass(v, w_ref, ks, to_bf16):
        # One conv application: out = sum_kh rowshift(v, kh-ks) @ w_ref[kh].
        # w_ref[kh] is block-banded over W (W zero-padding baked in); H padding
        # comes from the zero halo rows of the scratch slab.
        pad_ref[PAD:PAD + H, :] = v                          # aligned interior store
        acc = jnp.zeros((H, WC), jnp.float32)
        for kh in range(2 * ks + 1):
            lo = PAD + kh - ks
            vs = pad_ref[lo:lo + H, :]
            if to_bf16:
                vs = vs.astype(jnp.bfloat16)
            acc = acc + jnp.dot(vs, w_ref[kh], preferred_element_type=jnp.float32)
        return acc

    def recurrent(v, w_ref, ks, to_bf16):
        # RecurrentBlock(t=2): x1 = conv(v); x1 = conv(v+x1); x1 = conv(v+x1)
        x1 = conv_pass(v, w_ref, ks, to_bf16)
        x1 = conv_pass(v + x1, w_ref, ks, to_bf16)
        x1 = conv_pass(v + x1, w_ref, ks, to_bf16)
        return x1

    # ---- recurrent depthwise 7x7 conv (f32 MXU matmuls) ----
    x = recurrent(x_in, dw_ref, 3, False)

    # ---- LayerNorm over channels, in (H, W*C) layout ----
    # seg[li, lo] = (li // C == lo // C): one matmul gives the per-(h, w) channel
    # group sum broadcast back to all C lanes of the group.
    seg = seg_ref[...]
    inv_c = jnp.float32(1.0 / C)
    u = jnp.dot(x, seg, preferred_element_type=jnp.float32) * inv_c
    d = x - u
    var = jnp.dot(d * d, seg, preferred_element_type=jnp.float32) * inv_c
    x = d * jax.lax.rsqrt(var + EPS)
    x = x * nw_ref[...] + nb_ref[...]

    # ---- recurrent dense 3x3 conv #1 (bf16 operands, f32 accumulation) ----
    x = recurrent(x, b1_ref, 1, True)

    x = _gelu_exact(x)

    # ---- recurrent dense 3x3 conv #2 ----
    x = recurrent(x, b2_ref, 1, True)

    # ---- layer scale (gamma) + residual (drop_path = Identity) ----
    o_ref[0] = (x_in + x * g_ref[...]).astype(o_ref.dtype)


def _banded_weight(wk, W, C):
    """wk: (K, K, Cin, Cout) conv weights -> (K, W*Cin, W*Cout) block-banded
    matrices M with M[kh, wi*Cin+ci, wo*Cout+co] = wk[kh, wi-wo+K//2, ci, co]
    (zero outside the band == zero padding along W)."""
    K = wk.shape[0]
    ks = K // 2
    wi = np.arange(W)
    off = wi[:, None] - wi[None, :] + ks                      # (W, W) -> kw index
    valid = ((off >= 0) & (off < K)).astype(np.float32)
    offc = np.clip(off, 0, K - 1)
    blocks = wk[:, offc, :, :] * valid[None, :, :, None, None]   # (K, W, W, Cin, Cout)
    cin, cout = wk.shape[2], wk.shape[3]
    return jnp.transpose(blocks, (0, 1, 3, 2, 4)).reshape(K, W * cin, W * cout)


def recurrent_convnext_block(x_nchw, params):
    """x_nchw: (B, C, H, W) float32.  Returns (B, C, H, W)."""
    B, C, H, W = x_nchw.shape
    WC = W * C
    assert WC % 128 == 0 and H % 8 == 0, "toy layout assumes lane-dense W*C and 8-aligned H"

    f32, bf16 = jnp.float32, jnp.bfloat16

    # NCHW -> (B, H, W*C) with channels fastest inside the lane axis (boundary glue).
    x = jnp.transpose(x_nchw, (0, 2, 3, 1)).reshape(B, H, WC)

    # Depthwise 7x7 (groups=C): torch (C,1,7,7) -> (7,7,C) -> diagonal (7,7,C,C) blocks.
    wdw = jnp.transpose(params["w_dw"][:, 0, :, :], (1, 2, 0)).astype(f32)      # (7,7,C)
    wdw_blk = wdw[:, :, :, None] * jnp.eye(C, dtype=f32)[None, None]            # (7,7,C,C)
    dw_banded = _banded_weight(wdw_blk, W, C)                                   # (7,WC,WC) f32

    # Dense 3x3 convs: torch (Cout,Cin,3,3) -> (3,3,Cin,Cout) -> banded, bf16.
    w1 = jnp.transpose(params["w_pw1"], (2, 3, 1, 0)).astype(f32)
    w2 = jnp.transpose(params["w_pw2"], (2, 3, 1, 0)).astype(f32)
    b1_banded = _banded_weight(w1, W, C).astype(bf16)                           # (3,WC,WC)
    b2_banded = _banded_weight(w2, W, C).astype(bf16)

    # LayerNorm channel-group-sum matrix and W-tiled per-channel vectors.
    lane = np.arange(WC)
    seg = jnp.asarray((lane[:, None] // C) == (lane[None, :] // C), dtype=f32)  # (WC,WC)
    nw = jnp.tile(params["norm_w"].astype(f32), W).reshape(1, WC)
    nb = jnp.tile(params["norm_b"].astype(f32), W).reshape(1, WC)
    g = jnp.tile(params["gamma"].astype(f32), W).reshape(1, WC)

    kernel = functools.partial(_rcnb_kernel, H=H, WC=WC, C=C)

    out = pl.pallas_call(
        kernel,
        out_shape=jax.ShapeDtypeStruct((B, H, WC), x_nchw.dtype),
        grid_spec=pltpu.PrefetchScalarGridSpec(
            num_scalar_prefetch=0,
            grid=(B,),
            in_specs=[
                pl.BlockSpec((1, H, WC), lambda b: (b, 0, 0)),     # x slab
                pl.BlockSpec((7, WC, WC), lambda b: (0, 0, 0)),    # depthwise banded (f32)
                pl.BlockSpec((WC, WC), lambda b: (0, 0)),          # LayerNorm group-sum
                pl.BlockSpec((1, WC), lambda b: (0, 0)),           # norm weight (tiled)
                pl.BlockSpec((1, WC), lambda b: (0, 0)),           # norm bias (tiled)
                pl.BlockSpec((3, WC, WC), lambda b: (0, 0, 0)),    # pwconv1 banded (bf16)
                pl.BlockSpec((3, WC, WC), lambda b: (0, 0, 0)),    # pwconv2 banded (bf16)
                pl.BlockSpec((1, WC), lambda b: (0, 0)),           # gamma (tiled)
            ],
            out_specs=pl.BlockSpec((1, H, WC), lambda b: (b, 0, 0)),
            scratch_shapes=[
                pltpu.VMEM((2 * PAD + H, WC), jnp.float32),        # H-halo slab
            ],
        ),
        compiler_params=pltpu.CompilerParams(
            dimension_semantics=("parallel",),
            # footprint ~1.5 MiB (double-buffered weights + slabs); explicit limit
            # with headroom, safely below every generation's VMEM (incl. v7x 64 MiB).
            vmem_limit_bytes=16 * 1024 * 1024,
        ),
    )(x, dw_banded, seg, nw, nb, b1_banded, b2_banded, g)

    # (B, H, W*C) -> NCHW (boundary glue)
    return jnp.transpose(out.reshape(B, H, W, C), (0, 3, 1, 2))


# ----------------------------- pure-JAX reference -----------------------------
def _conv2d(x, w, pad, groups):
    return jax.lax.conv_general_dilated(
        x, w, window_strides=(1, 1), padding=[(pad, pad), (pad, pad)],
        dimension_numbers=("NCHW", "OIHW", "NCHW"),
        feature_group_count=groups)


def _recurrent_ref(x, conv):
    x1 = conv(x)
    x1 = conv(x + x1)
    x1 = conv(x + x1)
    return x1


def reference_forward(x, p):
    inp = x
    C = x.shape[1]
    x = _recurrent_ref(x, lambda v: _conv2d(v, p["w_dw"], 3, C))
    xl = jnp.transpose(x, (0, 2, 3, 1))
    u = xl.mean(-1, keepdims=True)
    var = ((xl - u) ** 2).mean(-1, keepdims=True)
    xl = (xl - u) / jnp.sqrt(var + EPS) * p["norm_w"] + p["norm_b"]
    x = jnp.transpose(xl, (0, 3, 1, 2))
    x = _recurrent_ref(x, lambda v: _conv2d(v, p["w_pw1"], 1, 1))
    x = jax.nn.gelu(x, approximate=False)
    x = _recurrent_ref(x, lambda v: _conv2d(v, p["w_pw2"], 1, 1))
    xl = jnp.transpose(x, (0, 2, 3, 1)) * p["gamma"]
    x = jnp.transpose(xl, (0, 3, 1, 2))
    return inp + x


if __name__ == "__main__":
    B, C, H, W = 2, 8, 16, 16      # dim = 8; W*C = 128 fills the lane axis
    key = jax.random.PRNGKey(0)
    k = jax.random.split(key, 4)
    x = jax.random.normal(k[0], (B, C, H, W), jnp.float32)

    # Deterministic synthetic parameters (shapes follow the module __init__).
    params = {
        "w_dw": 0.10 * jax.random.normal(k[1], (C, 1, 7, 7), jnp.float32),   # depthwise
        "norm_w": jnp.ones((C,), jnp.float32),
        "norm_b": jnp.zeros((C,), jnp.float32),
        "w_pw1": 0.05 * jax.random.normal(k[2], (C, C, 3, 3), jnp.float32),
        "w_pw2": 0.05 * jax.random.normal(k[3], (C, C, 3, 3), jnp.float32),
        "gamma": 1e-6 * jnp.ones((C,), jnp.float32),                          # layer scale init
    }

    # Check 1: module-faithful params (layer_scale_init = 1e-6), tight tolerance.
    out = jax.block_until_ready(recurrent_convnext_block(x, params))
    ref = reference_forward(x, params)
    assert out.shape == (B, C, H, W)
    assert jnp.allclose(out, ref, rtol=1e-3, atol=1e-4), \
        float(jnp.max(jnp.abs(out - ref)))

    # Check 2: gamma = 1 so the whole conv path is actually exercised by the
    # assertion (not damped away); looser tolerance accounts for bf16 matmul
    # operands with f32 accumulation in the 3x3 convs.
    params_g1 = dict(params, gamma=jnp.ones((C,), jnp.float32))
    out2 = jax.block_until_ready(recurrent_convnext_block(x, params_g1))
    ref2 = reference_forward(x, params_g1)
    assert jnp.allclose(out2, ref2, rtol=3e-2, atol=3e-2), \
        float(jnp.max(jnp.abs(out2 - ref2)))

    print("KERNEL_OK")
</pallas_src>

<mosaic_0001>
module attributes {stable_mosaic.version = 11 : i64} {
  func.func @_rcnb_kernel(%arg0: i32, %arg1: memref<1x16x128xf32, #tpu.memory_space<vmem>>, %arg2: memref<7x128x128xf32, #tpu.memory_space<vmem>>, %arg3: memref<128x128xf32, #tpu.memory_space<vmem>>, %arg4: memref<1x128xf32, #tpu.memory_space<vmem>>, %arg5: memref<1x128xf32, #tpu.memory_space<vmem>>, %arg6: memref<3x128x128xbf16, #tpu.memory_space<vmem>>, %arg7: memref<3x128x128xbf16, #tpu.memory_space<vmem>>, %arg8: memref<1x128xf32, #tpu.memory_space<vmem>>, %arg9: memref<1x16x128xf32, #tpu.memory_space<vmem>>, %arg10: memref<32x128xf32, #tpu.memory_space<vmem>>) attributes {dimension_semantics = [#tpu.dimension_semantics<parallel>], iteration_bounds = array<i64: 2>, scalar_prefetch = 0 : i64, scratch_operands = 1 : i64, tpu.core_type = #tpu.core_type<tc>, window_params = [{transform_indices = @transform_0, window_bounds = array<i64: 1, 16, 128>}, {pipeline_mode = #tpu.pipeline_mode<synchronous>, transform_indices = @transform_1, window_bounds = array<i64: 7, 128, 128>}, {pipeline_mode = #tpu.pipeline_mode<synchronous>, transform_indices = @transform_2, window_bounds = array<i64: 128, 128>}, {pipeline_mode = #tpu.pipeline_mode<synchronous>, transform_indices = @transform_3, window_bounds = array<i64: 1, 128>}, {pipeline_mode = #tpu.pipeline_mode<synchronous>, transform_indices = @transform_4, window_bounds = array<i64: 1, 128>}, {pipeline_mode = #tpu.pipeline_mode<synchronous>, transform_indices = @transform_5, window_bounds = array<i64: 3, 128, 128>}, {pipeline_mode = #tpu.pipeline_mode<synchronous>, transform_indices = @transform_6, window_bounds = array<i64: 3, 128, 128>}, {pipeline_mode = #tpu.pipeline_mode<synchronous>, transform_indices = @transform_7, window_bounds = array<i64: 1, 128>}, {transform_indices = @transform_8, window_bounds = array<i64: 1, 16, 128>}]} {
    %c0 = arith.constant 0 : index
    %c0_0 = arith.constant 0 : index
    %c0_1 = arith.constant 0 : index
    %0 = vector.load %arg1[%c0, %c0_0, %c0_1] : memref<1x16x128xf32, #tpu.memory_space<vmem>>, vector<1x16x128xf32>
    %1 = vector.shape_cast %0 : vector<1x16x128xf32> to vector<16x128xf32>
    %cst = arith.constant 0.000000e+00 : f32
    %2 = vector.broadcast %cst : f32 to vector<8x128xf32>
    %c0_2 = arith.constant 0 : index
    %c0_3 = arith.constant 0 : index
    %3 = vector.load %arg10[%c0_2, %c0_3] : memref<32x128xf32, #tpu.memory_space<vmem>>, vector<8x128xf32>
    tpu.vector_store %arg10[%c0_2, %c0_3], %2 {strides = array<i32>} : memref<32x128xf32, #tpu.memory_space<vmem>>, vector<8x128xf32>,
    %c24 = arith.constant 24 : index
    %c0_4 = arith.constant 0 : index
    %4 = vector.load %arg10[%c24, %c0_4] : memref<32x128xf32, #tpu.memory_space<vmem>>, vector<8x128xf32>
    tpu.vector_store %arg10[%c24, %c0_4], %2 {strides = array<i32>} : memref<32x128xf32, #tpu.memory_space<vmem>>, vector<8x128xf32>,
    %c8 = arith.constant 8 : index
    %c0_5 = arith.constant 0 : index
    %5 = vector.load %arg10[%c8, %c0_5] : memref<32x128xf32, #tpu.memory_space<vmem>>, vector<16x128xf32>
    tpu.vector_store %arg10[%c8, %c0_5], %1 {strides = array<i32>} : memref<32x128xf32, #tpu.memory_space<vmem>>, vector<16x128xf32>,
    %cst_6 = arith.constant 0.000000e+00 : f32
    %6 = vector.broadcast %cst_6 : f32 to vector<16x128xf32>
    %c5 = arith.constant 5 : index
    %c0_7 = arith.constant 0 : index
    %7 = vector.load %arg10[%c5, %c0_7] : memref<32x128xf32, #tpu.memory_space<vmem>>, vector<16x128xf32>
    %c0_8 = arith.constant 0 : index
    %c0_9 = arith.constant 0 : index
    %c0_10 = arith.constant 0 : index
    %8 = vector.load %arg2[%c0_8, %c0_9, %c0_10] : memref<7x128x128xf32, #tpu.memory_space<vmem>>, vector<1x128x128xf32>
    %9 = vector.shape_cast %8 : vector<1x128x128xf32> to vector<128x128xf32>
    %cst_11 = arith.constant dense<0.000000e+00> : vector<16x128xf32>
    %10 = tpu.matmul %7, %9, %cst_11 {dimension_numbers = #tpu.dot_dimension_numbers<[1], [0], [0], [1], [0, 0, 1, 1], [], []>} : vector<16x128xf32>, vector<128x128xf32>, vector<16x128xf32> -> vector<16x128xf32>
    %11 = arith.addf %6, %10 : vector<16x128xf32>
    %c6 = arith.constant 6 : index
    %c0_12 = arith.constant 0 : index
    %12 = vector.load %arg10[%c6, %c0_12] : memref<32x128xf32, #tpu.memory_space<vmem>>, vector<16x128xf32>
    %c1 = arith.constant 1 : index
    %c0_13 = arith.constant 0 : index
    %c0_14 = arith.constant 0 : index
    %13 = vector.load %arg2[%c1, %c0_13, %c0_14] : memref<7x128x128xf32, #tpu.memory_space<vmem>>, vector<1x128x128xf32>
    %14 = vector.shape_cast %13 : vector<1x128x128xf32> to vector<128x128xf32>
    %cst_15 = arith.constant dense<0.000000e+00> : vector<16x128xf32>
    %15 = tpu.matmul %12, %14, %cst_15 {dimension_numbers = #tpu.dot_dimension_numbers<[1], [0], [0], [1], [0, 0, 1, 1], [], []>} : vector<16x128xf32>, vector<128x128xf32>, vector<16x128xf32> -> vector<16x128xf32>
    %16 = arith.addf %11, %15 : vector<16x128xf32>
    %c7 = arith.constant 7 : index
    %c0_16 = arith.constant 0 : index
    %17 = vector.load %arg10[%c7, %c0_16] : memref<32x128xf32, #tpu.memory_space<vmem>>, vector<16x128xf32>
    %c2 = arith.constant 2 : index
    %c0_17 = arith.constant 0 : index
    %c0_18 = arith.constant 0 : index
    %18 = vector.load %arg2[%c2, %c0_17, %c0_18] : memref<7x128x128xf32, #tpu.memory_space<vmem>>, vector<1x128x128xf32>
    %19 = vector.shape_cast %18 : vector<1x128x128xf32> to vector<128x128xf32>
    %cst_19 = arith.constant dense<0.000000e+00> : vector<16x128xf32>
    %20 = tpu.matmul %17, %19, %cst_19 {dimension_numbers = #tpu.dot_dimension_numbers<[1], [0], [0], [1], [0, 0, 1, 1], [], []>} : vector<16x128xf32>, vector<128x128xf32>, vector<16x128xf32> -> vector<16x128xf32>
    %21 = arith.addf %16, %20 : vector<16x128xf32>
    %c8_20 = arith.constant 8 : index
    %c0_21 = arith.constant 0 : index
    %22 = vector.load %arg10[%c8_20, %c0_21] : memref<32x128xf32, #tpu.memory_space<vmem>>, vector<16x128xf32>
    %c3 = arith.constant 3 : index
    %c0_22 = arith.constant 0 : index
    %c0_23 = arith.constant 0 : index
    %23 = vector.load %arg2[%c3, %c0_22, %c0_23] : memref<7x128x128xf32, #tpu.memory_space<vmem>>, vector<1x128x128xf32>
    %24 = vector.shape_cast %23 : vector<1x128x128xf32> to vector<128x128xf32>
    %cst_24 = arith.constant dense<0.000000e+00> : vector<16x128xf32>
    %25 = tpu.matmul %22, %24, %cst_24 {dimension_numbers = #tpu.dot_dimension_numbers<[1], [0], [0], [1], [0, 0, 1, 1], [], []>} : vector<16x128xf32>, vector<128x128xf32>, vector<16x128xf32> -> vector<16x128xf32>
    %26 = arith.addf %21, %25 : vector<16x128xf32>
    %c9 = arith.constant 9 : index
    %c0_25 = arith.constant 0 : index
    %27 = vector.load %arg10[%c9, %c0_25] : memref<32x128xf32, #tpu.memory_space<vmem>>, vector<16x128xf32>
    %c4 = arith.constant 4 : index
    %c0_26 = arith.constant 0 : index
    %c0_27 = arith.constant 0 : index
    %28 = vector.load %arg2[%c4, %c0_26, %c0_27] : memref<7x128x128xf32, #tpu.memory_space<vmem>>, vector<1x128x128xf32>
    %29 = vector.shape_cast %28 : vector<1x128x128xf32> to vector<128x128xf32>
    %cst_28 = arith.constant dense<0.000000e+00> : vector<16x128xf32>
    %30 = tpu.matmul %27, %29, %cst_28 {dimension_numbers = #tpu.dot_dimension_numbers<[1], [0], [0], [1], [0, 0, 1, 1], [], []>} : vector<16x128xf32>, vector<128x128xf32>, vector<16x128xf32> -> vector<16x128xf32>
    %31 = arith.addf %26, %30 : vector<16x128xf32>
    %c10 = arith.constant 10 : index
    %c0_29 = arith.constant 0 : index
    %32 = vector.load %arg10[%c10, %c0_29] : memref<32x128xf32, #tpu.memory_space<vmem>>, vector<16x128xf32>
    %c5_30 = arith.constant 5 : index
    %c0_31 = arith.constant 0 : index
    %c0_32 = arith.constant 0 : index
    %33 = vector.load %arg2[%c5_30, %c0_31, %c0_32] : memref<7x128x128xf32, #tpu.memory_space<vmem>>, vector<1x128x128xf32>
    %34 = vector.shape_cast %33 : vector<1x128x128xf32> to vector<128x128xf32>
    %cst_33 = arith.constant dense<0.000000e+00> : vector<16x128xf32>
    %35 = tpu.matmul %32, %34, %cst_33 {dimension_numbers = #tpu.dot_dimension_numbers<[1], [0], [0], [1], [0, 0, 1, 1], [], []>} : vector<16x128xf32>, vector<128x128xf32>, vector<16x128xf32> -> vector<16x128xf32>
    %36 = arith.addf %31, %35 : vector<16x128xf32>
    %c11 = arith.constant 11 : index
    %c0_34 = arith.constant 0 : index
    %37 = vector.load %arg10[%c11, %c0_34] : memref<32x128xf32, #tpu.memory_space<vmem>>, vector<16x128xf32>
    %c6_35 = arith.constant 6 : index
    %c0_36 = arith.constant 0 : index
    %c0_37 = arith.constant 0 : index
    %38 = vector.load %arg2[%c6_35, %c0_36, %c0_37] : memref<7x128x128xf32, #tpu.memory_space<vmem>>, vector<1x128x128xf32>
    %39 = vector.shape_cast %38 : vector<1x128x128xf32> to vector<128x128xf32>
    %cst_38 = arith.constant dense<0.000000e+00> : vector<16x128xf32>
    %40 = tpu.matmul %37, %39, %cst_38 {dimension_numbers = #tpu.dot_dimension_numbers<[1], [0], [0], [1], [0, 0, 1, 1], [], []>} : vector<16x128xf32>, vector<128x128xf32>, vector<16x128xf32> -> vector<16x128xf32>
    %41 = arith.addf %36, %40 : vector<16x128xf32>
    %42 = arith.addf %1, %41 : vector<16x128xf32>
    %c8_39 = arith.constant 8 : index
    %c0_40 = arith.constant 0 : index
    %43 = vector.load %arg10[%c8_39, %c0_40] : memref<32x128xf32, #tpu.memory_space<vmem>>, vector<16x128xf32>
    tpu.vector_store %arg10[%c8_39, %c0_40], %42 {strides = array<i32>} : memref<32x128xf32, #tpu.memory_space<vmem>>, vector<16x128xf32>,
    %cst_41 = arith.constant 0.000000e+00 : f32
    %44 = vector.broadcast %cst_41 : f32 to vector<16x128xf32>
    %c5_42 = arith.constant 5 : index
    %c0_43 = arith.constant 0 : index
    %45 = vector.load %arg10[%c5_42, %c0_43] : memref<32x128xf32, #tpu.memory_space<vmem>>, vector<16x128xf32>
    %c0_44 = arith.constant 0 : index
    %c0_45 = arith.constant 0 : index
    %c0_46 = arith.constant 0 : index
    %46 = vector.load %arg2[%c0_44, %c0_45, %c0_46] : memref<7x128x128xf32, #tpu.memory_space<vmem>>, vector<1x128x128xf32>
    %47 = vector.shape_cast %46 : vector<1x128x128xf32> to vector<128x128xf32>
    %cst_47 = arith.constant dense<0.000000e+00> : vector<16x128xf32>
    %48 = tpu.matmul %45, %47, %cst_47 {dimension_numbers = #tpu.dot_dimension_numbers<[1], [0], [0], [1], [0, 0, 1, 1], [], []>} : vector<16x128xf32>, vector<128x128xf32>, vector<16x128xf32> -> vector<16x128xf32>
    %49 = arith.addf %44, %48 : vector<16x128xf32>
    %c6_48 = arith.constant 6 : index
    %c0_49 = arith.constant 0 : index
    %50 = vector.load %arg10[%c6_48, %c0_49] : memref<32x128xf32, #tpu.memory_space<vmem>>, vector<16x128xf32>
    %c1_50 = arith.constant 1 : index
    %c0_51 = arith.constant 0 : index
    %c0_52 = arith.constant 0 : index
    %51 = vector.load %arg2[%c1_50, %c0_51, %c0_52] : memref<7x128x128xf32, #tpu.memory_space<vmem>>, vector<1x128x128xf32>
    %52 = vector.shape_cast %51 : vector<1x128x128xf32> to vector<128x128xf32>
    %cst_53 = arith.constant dense<0.000000e+00> : vector<16x128xf32>
    %53 = tpu.matmul %50, %52, %cst_53 {dimension_numbers = #tpu.dot_dimension_numbers<[1], [0], [0], [1], [0, 0, 1, 1], [], []>} : vector<16x128xf32>, vector<128x128xf32>, vector<16x128xf32> -> vector<16x128xf32>
    %54 = arith.addf %49, %53 : vector<16x128xf32>
    %c7_54 = arith.constant 7 : index
    %c0_55 = arith.constant 0 : index
    %55 = vector.load %arg10[%c7_54, %c0_55] : memref<32x128xf32, #tpu.memory_space<vmem>>, vector<16x128xf32>
    %c2_56 = arith.constant 2 : index
    %c0_57 = arith.constant 0 : index
    %c0_58 = arith.constant 0 : index
    %56 = vector.load %arg2[%c2_56, %c0_57, %c0_58] : memref<7x128x128xf32, #tpu.memory_space<vmem>>, vector<1x128x128xf32>
    %57 = vector.shape_cast %56 : vector<1x128x128xf32> to vector<128x128xf32>
    %cst_59 = arith.constant dense<0.000000e+00> : vector<16x128xf32>
    %58 = tpu.matmul %55, %57, %cst_59 {dimension_numbers = #tpu.dot_dimension_numbers<[1], [0], [0], [1], [0, 0, 1, 1], [], []>} : vector<16x128xf32>, vector<128x128xf32>, vector<16x128xf32> -> vector<16x128xf32>
    %59 = arith.addf %54, %58 : vector<16x128xf32>
    %c8_60 = arith.constant 8 : index
    %c0_61 = arith.constant 0 : index
    %60 = vector.load %arg10[%c8_60, %c0_61] : memref<32x128xf32, #tpu.memory_space<vmem>>, vector<16x128xf32>
    %c3_62 = arith.constant 3 : index
    %c0_63 = arith.constant 0 : index
    %c0_64 = arith.constant 0 : index
    %61 = vector.load %arg2[%c3_62, %c0_63, %c0_64] : memref<7x128x128xf32, #tpu.memory_space<vmem>>, vector<1x128x128xf32>
    %62 = vector.shape_cast %61 : vector<1x128x128xf32> to vector<128x128xf32>
    %cst_65 = arith.constant dense<0.000000e+00> : vector<16x128xf32>
    %63 = tpu.matmul %60, %62, %cst_65 {dimension_numbers = #tpu.dot_dimension_numbers<[1], [0], [0], [1], [0, 0, 1, 1], [], []>} : vector<16x128xf32>, vector<128x128xf32>, vector<16x128xf32> -> vector<16x128xf32>
    %64 = arith.addf %59, %63 : vector<16x128xf32>
    %c9_66 = arith.constant 9 : index
    %c0_67 = arith.constant 0 : index
    %65 = vector.load %arg10[%c9_66, %c0_67] : memref<32x128xf32, #tpu.memory_space<vmem>>, vector<16x128xf32>
    %c4_68 = arith.constant 4 : index
    %c0_69 = arith.constant 0 : index
    %c0_70 = arith.constant 0 : index
    %66 = vector.load %arg2[%c4_68, %c0_69, %c0_70] : memref<7x128x128xf32, #tpu.memory_space<vmem>>, vector<1x128x128xf32>
    %67 = vector.shape_cast %66 : vector<1x128x128xf32> to vector<128x128xf32>
    %cst_71 = arith.constant dense<0.000000e+00> : vector<16x128xf32>
    %68 = tpu.matmul %65, %67, %cst_71 {dimension_numbers = #tpu.dot_dimension_numbers<[1], [0], [0], [1], [0, 0, 1, 1], [], []>} : vector<16x128xf32>, vector<128x128xf32>, vector<16x128xf32> -> vector<16x128xf32>
    %69 = arith.addf %64, %68 : vector<16x128xf32>
    %c10_72 = arith.constant 10 : index
    %c0_73 = arith.constant 0 : index
    %70 = vector.load %arg10[%c10_72, %c0_73] : memref<32x128xf32, #tpu.memory_space<vmem>>, vector<16x128xf32>
    %c5_74 = arith.constant 5 : index
    %c0_75 = arith.constant 0 : index
    %c0_76 = arith.constant 0 : index
    %71 = vector.load %arg2[%c5_74, %c0_75, %c0_76] : memref<7x128x128xf32, #tpu.memory_space<vmem>>, vector<1x128x128xf32>
    %72 = vector.shape_cast %71 : vector<1x128x128xf32> to vector<128x128xf32>
    %cst_77 = arith.constant dense<0.000000e+00> : vector<16x128xf32>
    %73 = tpu.matmul %70, %72, %cst_77 {dimension_numbers = #tpu.dot_dimension_numbers<[1], [0], [0], [1], [0, 0, 1, 1], [], []>} : vector<16x128xf32>, vector<128x128xf32>, vector<16x128xf32> -> vector<16x128xf32>
    %74 = arith.addf %69, %73 : vector<16x128xf32>
    %c11_78 = arith.constant 11 : index
    %c0_79 = arith.constant 0 : index
    %75 = vector.load %arg10[%c11_78, %c0_79] : memref<32x128xf32, #tpu.memory_space<vmem>>, vector<16x128xf32>
    %c6_80 = arith.constant 6 : index
    %c0_81 = arith.constant 0 : index
    %c0_82 = arith.constant 0 : index
    %76 = vector.load %arg2[%c6_80, %c0_81, %c0_82] : memref<7x128x128xf32, #tpu.memory_space<vmem>>, vector<1x128x128xf32>
    %77 = vector.shape_cast %76 : vector<1x128x128xf32> to vector<128x128xf32>
    %cst_83 = arith.constant dense<0.000000e+00> : vector<16x128xf32>
    %78 = tpu.matmul %75, %77, %cst_83 {dimension_numbers = #tpu.dot_dimension_numbers<[1], [0], [0], [1], [0, 0, 1, 1], [], []>} : vector<16x128xf32>, vector<128x128xf32>, vector<16x128xf32> -> vector<16x128xf32>
    %79 = arith.addf %74, %78 : vector<16x128xf32>
    %80 = arith.addf %1, %79 : vector<16x128xf32>
    %c8_84 = arith.constant 8 : index
    %c0_85 = arith.constant 0 : index
    %81 = vector.load %arg10[%c8_84, %c0_85] : memref<32x128xf32, #tpu.memory_space<vmem>>, vector<16x128xf32>
    tpu.vector_store %arg10[%c8_84, %c0_85], %80 {strides = array<i32>} : memref<32x128xf32, #tpu.memory_space<vmem>>, vector<16x128xf32>,
    %cst_86 = arith.constant 0.000000e+00 : f32
    %82 = vector.broadcast %cst_86 : f32 to vector<16x128xf32>
    %c5_87 = arith.constant 5 : index
    %c0_88 = arith.constant 0 : index
    %83 = vector.load %arg10[%c5_87, %c0_88] : memref<32x128xf32, #tpu.memory_space<vmem>>, vector<16x128xf32>
    %c0_89 = arith.constant 0 : index
    %c0_90 = arith.constant 0 : index
    %c0_91 = arith.constant 0 : index
    %84 = vector.load %arg2[%c0_89, %c0_90, %c0_91] : memref<7x128x128xf32, #tpu.memory_space<vmem>>, vector<1x128x128xf32>
    %85 = vector.shape_cast %84 : vector<1x128x128xf32> to vector<128x128xf32>
    %cst_92 = arith.constant dense<0.000000e+00> : vector<16x128xf32>
    %86 = tpu.matmul %83, %85, %cst_92 {dimension_numbers = #tpu.dot_dimension_numbers<[1], [0], [0], [1], [0, 0, 1, 1], [], []>} : vector<16x128xf32>, vector<128x128xf32>, vector<16x128xf32> -> vector<16x128xf32>
    %87 = arith.addf %82, %86 : vector<16x128xf32>
    %c6_93 = arith.constant 6 : index
    %c0_94 = arith.constant 0 : index
    %88 = vector.load %arg10[%c6_93, %c0_94] : memref<32x128xf32, #tpu.memory_space<vmem>>, vector<16x128xf32>
    %c1_95 = arith.constant 1 : index
    %c0_96 = arith.constant 0 : index
    %c0_97 = arith.constant 0 : index
    %89 = vector.load %arg2[%c1_95, %c0_96, %c0_97] : memref<7x128x128xf32, #tpu.memory_space<vmem>>, vector<1x128x128xf32>
    %90 = vector.shape_cast %89 : vector<1x128x128xf32> to vector<128x128xf32>
    %cst_98 = arith.constant dense<0.000000e+00> : vector<16x128xf32>
    %91 = tpu.matmul %88, %90, %cst_98 {dimension_numbers = #tpu.dot_dimension_numbers<[1], [0], [0], [1], [0, 0, 1, 1], [], []>} : vector<16x128xf32>, vector<128x128xf32>, vector<16x128xf32> -> vector<16x128xf32>
    %92 = arith.addf %87, %91 : vector<16x128xf32>
    %c7_99 = arith.constant 7 : index
    %c0_100 = arith.constant 0 : index
    %93 = vector.load %arg10[%c7_99, %c0_100] : memref<32x128xf32, #tpu.memory_space<vmem>>, vector<16x128xf32>
    %c2_101 = arith.constant 2 : index
    %c0_102 = arith.constant 0 : index
    %c0_103 = arith.constant 0 : index
    %94 = vector.load %arg2[%c2_101, %c0_102, %c0_103] : memref<7x128x128xf32, #tpu.memory_space<vmem>>, vector<1x128x128xf32>
    %95 = vector.shape_cast %94 : vector<1x128x128xf32> to vector<128x128xf32>
    %cst_104 = arith.constant dense<0.000000e+00> : vector<16x128xf32>
    %96 = tpu.matmul %93, %95, %cst_104 {dimension_numbers = #tpu.dot_dimension_numbers<[1], [0], [0], [1], [0, 0, 1, 1], [], []>} : vector<16x128xf32>, vector<128x128xf32>, vector<16x128xf32> -> vector<16x128xf32>
    %97 = arith.addf %92, %96 : vector<16x128xf32>
    %c8_105 = arith.constant 8 : index
    %c0_106 = arith.constant 0 : index
    %98 = vector.load %arg10[%c8_105, %c0_106] : memref<32x128xf32, #tpu.memory_space<vmem>>, vector<16x128xf32>
    %c3_107 = arith.constant 3 : index
    %c0_108 = arith.constant 0 : index
    %c0_109 = arith.constant 0 : index
    %99 = vector.load %arg2[%c3_107, %c0_108, %c0_109] : memref<7x128x128xf32, #tpu.memory_space<vmem>>, vector<1x128x128xf32>
    %100 = vector.shape_cast %99 : vector<1x128x128xf32> to vector<128x128xf32>
    %cst_110 = arith.constant dense<0.000000e+00> : vector<16x128xf32>
    %101 = tpu.matmul %98, %100, %cst_110 {dimension_numbers = #tpu.dot_dimension_numbers<[1], [0], [0], [1], [0, 0, 1, 1], [], []>} : vector<16x128xf32>, vector<128x128xf32>, vector<16x128xf32> -> vector<16x128xf32>
    %102 = arith.addf %97, %101 : vector<16x128xf32>
    %c9_111 = arith.constant 9 : index
    %c0_112 = arith.constant 0 : index
    %103 = vector.load %arg10[%c9_111, %c0_112] : memref<32x128xf32, #tpu.memory_space<vmem>>, vector<16x128xf32>
    %c4_113 = arith.constant 4 : index
    %c0_114 = arith.constant 0 : index
    %c0_115 = arith.constant 0 : index
    %104 = vector.load %arg2[%c4_113, %c0_114, %c0_115] : memref<7x128x128xf32, #tpu.memory_space<vmem>>, vector<1x128x128xf32>
    %105 = vector.shape_cast %104 : vector<1x128x128xf32> to vector<128x128xf32>
    %cst_116 = arith.constant dense<0.000000e+00> : vector<16x128xf32>
    %106 = tpu.matmul %103, %105, %cst_116 {dimension_numbers = #tpu.dot_dimension_numbers<[1], [0], [0], [1], [0, 0, 1, 1], [], []>} : vector<16x128xf32>, vector<128x128xf32>, vector<16x128xf32> -> vector<16x128xf32>
    %107 = arith.addf %102, %106 : vector<16x128xf32>
    %c10_117 = arith.constant 10 : index
    %c0_118 = arith.constant 0 : index
    %108 = vector.load %arg10[%c10_117, %c0_118] : memref<32x128xf32, #tpu.memory_space<vmem>>, vector<16x128xf32>
    %c5_119 = arith.constant 5 : index
    %c0_120 = arith.constant 0 : index
    %c0_121 = arith.constant 0 : index
    %109 = vector.load %arg2[%c5_119, %c0_120, %c0_121] : memref<7x128x128xf32, #tpu.memory_space<vmem>>, vector<1x128x128xf32>
    %110 = vector.shape_cast %109 : vector<1x128x128xf32> to vector<128x128xf32>
    %cst_122 = arith.constant dense<0.000000e+00> : vector<16x128xf32>
    %111 = tpu.matmul %108, %110, %cst_122 {dimension_numbers = #tpu.dot_dimension_numbers<[1], [0], [0], [1], [0, 0, 1, 1], [], []>} : vector<16x128xf32>, vector<128x128xf32>, vector<16x128xf32> -> vector<16x128xf32>
    %112 = arith.addf %107, %111 : vector<16x128xf32>
    %c11_123 = arith.constant 11 : index
    %c0_124 = arith.constant 0 : index
    %113 = vector.load %arg10[%c11_123, %c0_124] : memref<32x128xf32, #tpu.memory_space<vmem>>, vector<16x128xf32>
    %c6_125 = arith.constant 6 : index
    %c0_126 = arith.constant 0 : index
    %c0_127 = arith.constant 0 : index
    %114 = vector.load %arg2[%c6_125, %c0_126, %c0_127] : memref<7x128x128xf32, #tpu.memory_space<vmem>>, vector<1x128x128xf32>
    %115 = vector.shape_cast %114 : vector<1x128x128xf32> to vector<128x128xf32>
    %cst_128 = arith.constant dense<0.000000e+00> : vector<16x128xf32>
    %116 = tpu.matmul %113, %115, %cst_128 {dimension_numbers = #tpu.dot_dimension_numbers<[1], [0], [0], [1], [0, 0, 1, 1], [], []>} : vector<16x128xf32>, vector<128x128xf32>, vector<16x128xf32> -> vector<16x128xf32>
    %117 = arith.addf %112, %116 : vector<16x128xf32>
    %c0_129 = arith.constant 0 : index
    %c0_130 = arith.constant 0 : index
    %118 = vector.load %arg3[%c0_129, %c0_130] : memref<128x128xf32, #tpu.memory_space<vmem>>, vector<128x128xf32>
    %cst_131 = arith.constant dense<0.000000e+00> : vector<16x128xf32>
    %119 = tpu.matmul %117, %118, %cst_131 {dimension_numbers = #tpu.dot_dimension_numbers<[1], [0], [0], [1], [0, 0, 1, 1], [], []>} : vector<16x128xf32>, vector<128x128xf32>, vector<16x128xf32> -> vector<16x128xf32>
    %cst_132 = arith.constant 1.250000e-01 : f32
    %120 = vector.broadcast %cst_132 : f32 to vector<16x128xf32>
    %121 = arith.mulf %119, %120 : vector<16x128xf32>
    %122 = arith.subf %117, %121 : vector<16x128xf32>
    %123 = arith.mulf %122, %122 : vector<16x128xf32>
    %cst_133 = arith.constant dense<0.000000e+00> : vector<16x128xf32>
    %124 = tpu.matmul %123, %118, %cst_133 {dimension_numbers = #tpu.dot_dimension_numbers<[1], [0], [0], [1], [0, 0, 1, 1], [], []>} : vector<16x128xf32>, vector<128x128xf32>, vector<16x128xf32> -> vector<16x128xf32>
    %cst_134 = arith.constant 1.250000e-01 : f32
    %125 = vector.broadcast %cst_134 : f32 to vector<16x128xf32>
    %126 = arith.mulf %124, %125 : vector<16x128xf32>
    %cst_135 = arith.constant 9.99999997E-7 : f32
    %127 = vector.broadcast %cst_135 : f32 to vector<16x128xf32>
    %128 = arith.addf %126, %127 : vector<16x128xf32>
    %129 = math.rsqrt %128 : vector<16x128xf32>
    %130 = arith.mulf %122, %129 : vector<16x128xf32>
    %c0_136 = arith.constant 0 : index
    %c0_137 = arith.constant 0 : index
    %131 = vector.load %arg4[%c0_136, %c0_137] : memref<1x128xf32, #tpu.memory_space<vmem>>, vector<1x128xf32>
    %132 = vector.broadcast %131 : vector<1x128xf32> to vector<16x128xf32>
    %133 = arith.mulf %130, %132 : vector<16x128xf32>
    %c0_138 = arith.constant 0 : index
    %c0_139 = arith.constant 0 : index
    %134 = vector.load %arg5[%c0_138, %c0_139] : memref<1x128xf32, #tpu.memory_space<vmem>>, vector<1x128xf32>
    %135 = vector.broadcast %134 : vector<1x128xf32> to vector<16x128xf32>
    %136 = arith.addf %133, %135 : vector<16x128xf32>
    %c8_140 = arith.constant 8 : index
    %c0_141 = arith.constant 0 : index
    %137 = vector.load %arg10[%c8_140, %c0_141] : memref<32x128xf32, #tpu.memory_space<vmem>>, vector<16x128xf32>
    tpu.vector_store %arg10[%c8_140, %c0_141], %136 {strides = array<i32>} : memref<32x128xf32, #tpu.memory_space<vmem>>, vector<16x128xf32>,
    %cst_142 = arith.constant 0.000000e+00 : f32
    %138 = vector.broadcast %cst_142 : f32 to vector<16x128xf32>
    %c7_143 = arith.constant 7 : index
    %c0_144 = arith.constant 0 : index
    %139 = vector.load %arg10[%c7_143, %c0_144] : memref<32x128xf32, #tpu.memory_space<vmem>>, vector<16x128xf32>
    %140 = arith.truncf %139 : vector<16x128xf32> to vector<16x128xbf16>
    %c0_145 = arith.constant 0 : index
    %c0_146 = arith.constant 0 : index
    %c0_147 = arith.constant 0 : index
    %141 = vector.load %arg6[%c0_145, %c0_146, %c0_147] : memref<3x128x128xbf16, #tpu.memory_space<vmem>>, vector<1x128x128xbf16>
    %142 = vector.shape_cast %141 : vector<1x128x128xbf16> to vector<128x128xbf16>
    %cst_148 = arith.constant dense<0.000000e+00> : vector<16x128xf32>
    %143 = tpu.matmul %140, %142, %cst_148 {dimension_numbers = #tpu.dot_dimension_numbers<[1], [0], [0], [1], [0, 0, 1, 1], [], []>} : vector<16x128xbf16>, vector<128x128xbf16>, vector<16x128xf32> -> vector<16x128xf32>
    %144 = arith.addf %138, %143 : vector<16x128xf32>
    %c8_149 = arith.constant 8 : index
    %c0_150 = arith.constant 0 : index
    %145 = vector.load %arg10[%c8_149, %c0_150] : memref<32x128xf32, #tpu.memory_space<vmem>>, vector<16x128xf32>
    %146 = arith.truncf %145 : vector<16x128xf32> to vector<16x128xbf16>
    %c1_151 = arith.constant 1 : index
    %c0_152 = arith.constant 0 : index
    %c0_153 = arith.constant 0 : index
    %147 = vector.load %arg6[%c1_151, %c0_152, %c0_153] : memref<3x128x128xbf16, #tpu.memory_space<vmem>>, vector<1x128x128xbf16>
    %148 = vector.shape_cast %147 : vector<1x128x128xbf16> to vector<128x128xbf16>
    %cst_154 = arith.constant dense<0.000000e+00> : vector<16x128xf32>
    %149 = tpu.matmul %146, %148, %cst_154 {dimension_numbers = #tpu.dot_dimension_numbers<[1], [0], [0], [1], [0, 0, 1, 1], [], []>} : vector<16x128xbf16>, vector<128x128xbf16>, vector<16x128xf32> -> vector<16x128xf32>
    %150 = arith.addf %144, %149 : vector<16x128xf32>
    %c9_155 = arith.constant 9 : index
    %c0_156 = arith.constant 0 : index
    %151 = vector.load %arg10[%c9_155, %c0_156] : memref<32x128xf32, #tpu.memory_space<vmem>>, vector<16x128xf32>
    %152 = arith.truncf %151 : vector<16x128xf32> to vector<16x128xbf16>
    %c2_157 = arith.constant 2 : index
    %c0_158 = arith.constant 0 : index
    %c0_159 = arith.constant 0 : index
    %153 = vector.load %arg6[%c2_157, %c0_158, %c0_159] : memref<3x128x128xbf16, #tpu.memory_space<vmem>>, vector<1x128x128xbf16>
    %154 = vector.shape_cast %153 : vector<1x128x128xbf16> to vector<128x128xbf16>
    %cst_160 = arith.constant dense<0.000000e+00> : vector<16x128xf32>
    %155 = tpu.matmul %152, %154, %cst_160 {dimension_numbers = #tpu.dot_dimension_numbers<[1], [0], [0], [1], [0, 0, 1, 1], [], []>} : vector<16x128xbf16>, vector<128x128xbf16>, vector<16x128xf32> -> vector<16x128xf32>
    %156 = arith.addf %150, %155 : vector<16x128xf32>
    %157 = arith.addf %136, %156 : vector<16x128xf32>
    %c8_161 = arith.constant 8 : index
    %c0_162 = arith.constant 0 : index
    %158 = vector.load %arg10[%c8_161, %c0_162] : memref<32x128xf32, #tpu.memory_space<vmem>>, vector<16x128xf32>
    tpu.vector_store %arg10[%c8_161, %c0_162], %157 {strides = array<i32>} : memref<32x128xf32, #tpu.memory_space<vmem>>, vector<16x128xf32>,
    %cst_163 = arith.constant 0.000000e+00 : f32
    %159 = vector.broadcast %cst_163 : f32 to vector<16x128xf32>
    %c7_164 = arith.constant 7 : index
    %c0_165 = arith.constant 0 : index
    %160 = vector.load %arg10[%c7_164, %c0_165] : memref<32x128xf32, #tpu.memory_space<vmem>>, vector<16x128xf32>
    %161 = arith.truncf %160 : vector<16x128xf32> to vector<16x128xbf16>
    %c0_166 = arith.constant 0 : index
    %c0_167 = arith.constant 0 : index
    %c0_168 = arith.constant 0 : index
    %162 = vector.load %arg6[%c0_166, %c0_167, %c0_168] : memref<3x128x128xbf16, #tpu.memory_space<vmem>>, vector<1x128x128xbf16>
    %163 = vector.shape_cast %162 : vector<1x128x128xbf16> to vector<128x128xbf16>
    %cst_169 = arith.constant dense<0.000000e+00> : vector<16x128xf32>
    %164 = tpu.matmul %161, %163, %cst_169 {dimension_numbers = #tpu.dot_dimension_numbers<[1], [0], [0], [1], [0, 0, 1, 1], [], []>} : vector<16x128xbf16>, vector<128x128xbf16>, vector<16x128xf32> -> vector<16x128xf32>
    %165 = arith.addf %159, %164 : vector<16x128xf32>
    %c8_170 = arith.constant 8 : index
    %c0_171 = arith.constant 0 : index
    %166 = vector.load %arg10[%c8_170, %c0_171] : memref<32x128xf32, #tpu.memory_space<vmem>>, vector<16x128xf32>
    %167 = arith.truncf %166 : vector<16x128xf32> to vector<16x128xbf16>
    %c1_172 = arith.constant 1 : index
    %c0_173 = arith.constant 0 : index
    %c0_174 = arith.constant 0 : index
    %168 = vector.load %arg6[%c1_172, %c0_173, %c0_174] : memref<3x128x128xbf16, #tpu.memory_space<vmem>>, vector<1x128x128xbf16>
    %169 = vector.shape_cast %168 : vector<1x128x128xbf16> to vector<128x128xbf16>
    %cst_175 = arith.constant dense<0.000000e+00> : vector<16x128xf32>
    %170 = tpu.matmul %167, %169, %cst_175 {dimension_numbers = #tpu.dot_dimension_numbers<[1], [0], [0], [1], [0, 0, 1, 1], [], []>} : vector<16x128xbf16>, vector<128x128xbf16>, vector<16x128xf32> -> vector<16x128xf32>
    %171 = arith.addf %165, %170 : vector<16x128xf32>
    %c9_176 = arith.constant 9 : index
    %c0_177 = arith.constant 0 : index
    %172 = vector.load %arg10[%c9_176, %c0_177] : memref<32x128xf32, #tpu.memory_space<vmem>>, vector<16x128xf32>
    %173 = arith.truncf %172 : vector<16x128xf32> to vector<16x128xbf16>
    %c2_178 = arith.constant 2 : index
    %c0_179 = arith.constant 0 : index
    %c0_180 = arith.constant 0 : index
    %174 = vector.load %arg6[%c2_178, %c0_179, %c0_180] : memref<3x128x128xbf16, #tpu.memory_space<vmem>>, vector<1x128x128xbf16>
    %175 = vector.shape_cast %174 : vector<1x128x128xbf16> to vector<128x128xbf16>
    %cst_181 = arith.constant dense<0.000000e+00> : vector<16x128xf32>
    %176 = tpu.matmul %173, %175, %cst_181 {dimension_numbers = #tpu.dot_dimension_numbers<[1], [0], [0], [1], [0, 0, 1, 1], [], []>} : vector<16x128xbf16>, vector<128x128xbf16>, vector<16x128xf32> -> vector<16x128xf32>
    %177 = arith.addf %171, %176 : vector<16x128xf32>
    %178 = arith.addf %136, %177 : vector<16x128xf32>
    %c8_182 = arith.constant 8 : index
    %c0_183 = arith.constant 0 : index
    %179 = vector.load %arg10[%c8_182, %c0_183] : memref<32x128xf32, #tpu.memory_space<vmem>>, vector<16x128xf32>
    tpu.vector_store %arg10[%c8_182, %c0_183], %178 {strides = array<i32>} : memref<32x128xf32, #tpu.memory_space<vmem>>, vector<16x128xf32>,
    %cst_184 = arith.constant 0.000000e+00 : f32
    %180 = vector.broadcast %cst_184 : f32 to vector<16x128xf32>
    %c7_185 = arith.constant 7 : index
    %c0_186 = arith.constant 0 : index
    %181 = vector.load %arg10[%c7_185, %c0_186] : memref<32x128xf32, #tpu.memory_space<vmem>>, vector<16x128xf32>
    %182 = arith.truncf %181 : vector<16x128xf32> to vector<16x128xbf16>
    %c0_187 = arith.constant 0 : index
    %c0_188 = arith.constant 0 : index
    %c0_189 = arith.constant 0 : index
    %183 = vector.load %arg6[%c0_187, %c0_188, %c0_189] : memref<3x128x128xbf16, #tpu.memory_space<vmem>>, vector<1x128x128xbf16>
    %184 = vector.shape_cast %183 : vector<1x128x128xbf16> to vector<128x128xbf16>
    %cst_190 = arith.constant dense<0.000000e+00> : vector<16x128xf32>
    %185 = tpu.matmul %182, %184, %cst_190 {dimension_numbers = #tpu.dot_dimension_numbers<[1], [0], [0], [1], [0, 0, 1, 1], [], []>} : vector<16x128xbf16>, vector<128x128xbf16>, vector<16x128xf32> -> vector<16x128xf32>
    %186 = arith.addf %180, %185 : vector<16x128xf32>
    %c8_191 = arith.constant 8 : index
    %c0_192 = arith.constant 0 : index
    %187 = vector.load %arg10[%c8_191, %c0_192] : memref<32x128xf32, #tpu.memory_space<vmem>>, vector<16x128xf32>
    %188 = arith.truncf %187 : vector<16x128xf32> to vector<16x128xbf16>
    %c1_193 = arith.constant 1 : index
    %c0_194 = arith.constant 0 : index
    %c0_195 = arith.constant 0 : index
    %189 = vector.load %arg6[%c1_193, %c0_194, %c0_195] : memref<3x128x128xbf16, #tpu.memory_space<vmem>>, vector<1x128x128xbf16>
    %190 = vector.shape_cast %189 : vector<1x128x128xbf16> to vector<128x128xbf16>
    %cst_196 = arith.constant dense<0.000000e+00> : vector<16x128xf32>
    %191 = tpu.matmul %188, %190, %cst_196 {dimension_numbers = #tpu.dot_dimension_numbers<[1], [0], [0], [1], [0, 0, 1, 1], [], []>} : vector<16x128xbf16>, vector<128x128xbf16>, vector<16x128xf32> -> vector<16x128xf32>
    %192 = arith.addf %186, %191 : vector<16x128xf32>
    %c9_197 = arith.constant 9 : index
    %c0_198 = arith.constant 0 : index
    %193 = vector.load %arg10[%c9_197, %c0_198] : memref<32x128xf32, #tpu.memory_space<vmem>>, vector<16x128xf32>
    %194 = arith.truncf %193 : vector<16x128xf32> to vector<16x128xbf16>
    %c2_199 = arith.constant 2 : index
    %c0_200 = arith.constant 0 : index
    %c0_201 = arith.constant 0 : index
    %195 = vector.load %arg6[%c2_199, %c0_200, %c0_201] : memref<3x128x128xbf16, #tpu.memory_space<vmem>>, vector<1x128x128xbf16>
    %196 = vector.shape_cast %195 : vector<1x128x128xbf16> to vector<128x128xbf16>
    %cst_202 = arith.constant dense<0.000000e+00> : vector<16x128xf32>
    %197 = tpu.matmul %194, %196, %cst_202 {dimension_numbers = #tpu.dot_dimension_numbers<[1], [0], [0], [1], [0, 0, 1, 1], [], []>} : vector<16x128xbf16>, vector<128x128xbf16>, vector<16x128xf32> -> vector<16x128xf32>
    %198 = arith.addf %192, %197 : vector<16x128xf32>
    %cst_203 = arith.constant 5.000000e-01 : f32
    %199 = vector.broadcast %cst_203 : f32 to vector<16x128xf32>
    %200 = arith.mulf %199, %198 : vector<16x128xf32>
    %cst_204 = arith.constant 0.707106769 : f32
    %201 = vector.broadcast %cst_204 : f32 to vector<16x128xf32>
    %202 = arith.mulf %198, %201 : vector<16x128xf32>
    %203 = math.absf %202 : vector<16x128xf32>
    %cst_205 = arith.constant 0.327591091 : f32
    %204 = vector.broadcast %cst_205 : f32 to vector<16x128xf32>
    %205 = arith.mulf %204, %203 : vector<16x128xf32>
    %cst_206 = arith.constant 1.000000e+00 : f32
    %206 = vector.broadcast %cst_206 : f32 to vector<16x128xf32>
    %207 = arith.addf %206, %205 : vector<16x128xf32>
    %cst_207 = arith.constant 1.000000e+00 : f32
    %208 = vector.broadcast %cst_207 : f32 to vector<16x128xf32>
    %209 = arith.divf %208, %207 : vector<16x128xf32>
    %cst_208 = arith.constant 1.06140542 : f32
    %210 = vector.broadcast %cst_208 : f32 to vector<16x128xf32>
    %211 = arith.mulf %210, %209 : vector<16x128xf32>
    %cst_209 = arith.constant -1.45315206 : f32
    %212 = vector.broadcast %cst_209 : f32 to vector<16x128xf32>
    %213 = arith.addf %211, %212 : vector<16x128xf32>
    %214 = arith.mulf %213, %209 : vector<16x128xf32>
    %cst_210 = arith.constant 1.42141378 : f32
    %215 = vector.broadcast %cst_210 : f32 to vector<16x128xf32>
    %216 = arith.addf %214, %215 : vector<16x128xf32>
    %217 = arith.mulf %216, %209 : vector<16x128xf32>
    %cst_211 = arith.constant -0.284496725 : f32
    %218 = vector.broadcast %cst_211 : f32 to vector<16x128xf32>
    %219 = arith.addf %217, %218 : vector<16x128xf32>
    %220 = arith.mulf %219, %209 : vector<16x128xf32>
    %cst_212 = arith.constant 0.254829586 : f32
    %221 = vector.broadcast %cst_212 : f32 to vector<16x128xf32>
    %222 = arith.addf %220, %221 : vector<16x128xf32>
    %223 = arith.mulf %222, %209 : vector<16x128xf32>
    %cst_213 = arith.constant 0.000000e+00 : f32
    %224 = vector.broadcast %cst_213 : f32 to vector<16x128xf32>
    %225 = arith.subf %224, %203 : vector<16x128xf32>
    %226 = arith.mulf %225, %203 : vector<16x128xf32>
    %227 = math.exp %226 : vector<16x128xf32>
    %228 = arith.mulf %223, %227 : vector<16x128xf32>
    %cst_214 = arith.constant 1.000000e+00 : f32
    %229 = vector.broadcast %cst_214 : f32 to vector<16x128xf32>
    %230 = arith.subf %229, %228 : vector<16x128xf32>
    %cst_215 = arith.constant 0.000000e+00 : f32
    %231 = vector.broadcast %cst_215 : f32 to vector<16x128xf32>
    %232 = arith.cmpf oge, %202, %231 : vector<16x128xf32>
    %cst_216 = arith.constant 0.000000e+00 : f32
    %233 = vector.broadcast %cst_216 : f32 to vector<16x128xf32>
    %234 = arith.subf %233, %230 : vector<16x128xf32>
    %235 = arith.select %232, %230, %234 : vector<16x128xi1>, vector<16x128xf32>
    %cst_217 = arith.constant 1.000000e+00 : f32
    %236 = vector.broadcast %cst_217 : f32 to vector<16x128xf32>
    %237 = arith.addf %236, %235 : vector<16x128xf32>
    %238 = arith.mulf %200, %237 : vector<16x128xf32>
    %c8_218 = arith.constant 8 : index
    %c0_219 = arith.constant 0 : index
    %239 = vector.load %arg10[%c8_218, %c0_219] : memref<32x128xf32, #tpu.memory_space<vmem>>, vector<16x128xf32>
    tpu.vector_store %arg10[%c8_218, %c0_219], %238 {strides = array<i32>} : memref<32x128xf32, #tpu.memory_space<vmem>>, vector<16x128xf32>,
    %cst_220 = arith.constant 0.000000e+00 : f32
    %240 = vector.broadcast %cst_220 : f32 to vector<16x128xf32>
    %c7_221 = arith.constant 7 : index
    %c0_222 = arith.constant 0 : index
    %241 = vector.load %arg10[%c7_221, %c0_222] : memref<32x128xf32, #tpu.memory_space<vmem>>, vector<16x128xf32>
    %242 = arith.truncf %241 : vector<16x128xf32> to vector<16x128xbf16>
    %c0_223 = arith.constant 0 : index
    %c0_224 = arith.constant 0 : index
    %c0_225 = arith.constant 0 : index
    %243 = vector.load %arg7[%c0_223, %c0_224, %c0_225] : memref<3x128x128xbf16, #tpu.memory_space<vmem>>, vector<1x128x128xbf16>
    %244 = vector.shape_cast %243 : vector<1x128x128xbf16> to vector<128x128xbf16>
    %cst_226 = arith.constant dense<0.000000e+00> : vector<16x128xf32>
    %245 = tpu.matmul %242, %244, %cst_226 {dimension_numbers = #tpu.dot_dimension_numbers<[1], [0], [0], [1], [0, 0, 1, 1], [], []>} : vector<16x128xbf16>, vector<128x128xbf16>, vector<16x128xf32> -> vector<16x128xf32>
    %246 = arith.addf %240, %245 : vector<16x128xf32>
    %c8_227 = arith.constant 8 : index
    %c0_228 = arith.constant 0 : index
    %247 = vector.load %arg10[%c8_227, %c0_228] : memref<32x128xf32, #tpu.memory_space<vmem>>, vector<16x128xf32>
    %248 = arith.truncf %247 : vector<16x128xf32> to vector<16x128xbf16>
    %c1_229 = arith.constant 1 : index
    %c0_230 = arith.constant 0 : index
    %c0_231 = arith.constant 0 : index
    %249 = vector.load %arg7[%c1_229, %c0_230, %c0_231] : memref<3x128x128xbf16, #tpu.memory_space<vmem>>, vector<1x128x128xbf16>
    %250 = vector.shape_cast %249 : vector<1x128x128xbf16> to vector<128x128xbf16>
    %cst_232 = arith.constant dense<0.000000e+00> : vector<16x128xf32>
    %251 = tpu.matmul %248, %250, %cst_232 {dimension_numbers = #tpu.dot_dimension_numbers<[1], [0], [0], [1], [0, 0, 1, 1], [], []>} : vector<16x128xbf16>, vector<128x128xbf16>, vector<16x128xf32> -> vector<16x128xf32>
    %252 = arith.addf %246, %251 : vector<16x128xf32>
    %c9_233 = arith.constant 9 : index
    %c0_234 = arith.constant 0 : index
    %253 = vector.load %arg10[%c9_233, %c0_234] : memref<32x128xf32, #tpu.memory_space<vmem>>, vector<16x128xf32>
    %254 = arith.truncf %253 : vector<16x128xf32> to vector<16x128xbf16>
    %c2_235 = arith.constant 2 : index
    %c0_236 = arith.constant 0 : index
    %c0_237 = arith.constant 0 : index
    %255 = vector.load %arg7[%c2_235, %c0_236, %c0_237] : memref<3x128x128xbf16, #tpu.memory_space<vmem>>, vector<1x128x128xbf16>
    %256 = vector.shape_cast %255 : vector<1x128x128xbf16> to vector<128x128xbf16>
    %cst_238 = arith.constant dense<0.000000e+00> : vector<16x128xf32>
    %257 = tpu.matmul %254, %256, %cst_238 {dimension_numbers = #tpu.dot_dimension_numbers<[1], [0], [0], [1], [0, 0, 1, 1], [], []>} : vector<16x128xbf16>, vector<128x128xbf16>, vector<16x128xf32> -> vector<16x128xf32>
    %258 = arith.addf %252, %257 : vector<16x128xf32>
    %259 = arith.addf %238, %258 : vector<16x128xf32>
    %c8_239 = arith.constant 8 : index
    %c0_240 = arith.constant 0 : index
    %260 = vector.load %arg10[%c8_239, %c0_240] : memref<32x128xf32, #tpu.memory_space<vmem>>, vector<16x128xf32>
    tpu.vector_store %arg10[%c8_239, %c0_240], %259 {strides = array<i32>} : memref<32x128xf32, #tpu.memory_space<vmem>>, vector<16x128xf32>,
    %cst_241 = arith.constant 0.000000e+00 : f32
    %261 = vector.broadcast %cst_241 : f32 to vector<16x128xf32>
    %c7_242 = arith.constant 7 : index
    %c0_243 = arith.constant 0 : index
    %262 = vector.load %arg10[%c7_242, %c0_243] : memref<32x128xf32, #tpu.memory_space<vmem>>, vector<16x128xf32>
    %263 = arith.truncf %262 : vector<16x128xf32> to vector<16x128xbf16>
    %c0_244 = arith.constant 0 : index
    %c0_245 = arith.constant 0 : index
    %c0_246 = arith.constant 0 : index
    %264 = vector.load %arg7[%c0_244, %c0_245, %c0_246] : memref<3x128x128xbf16, #tpu.memory_space<vmem>>, vector<1x128x128xbf16>
    %265 = vector.shape_cast %264 : vector<1x128x128xbf16> to vector<128x128xbf16>
    %cst_247 = arith.constant dense<0.000000e+00> : vector<16x128xf32>
    %266 = tpu.matmul %263, %265, %cst_247 {dimension_numbers = #tpu.dot_dimension_numbers<[1], [0], [0], [1], [0, 0, 1, 1], [], []>} : vector<16x128xbf16>, vector<128x128xbf16>, vector<16x128xf32> -> vector<16x128xf32>
    %267 = arith.addf %261, %266 : vector<16x128xf32>
    %c8_248 = arith.constant 8 : index
    %c0_249 = arith.constant 0 : index
    %268 = vector.load %arg10[%c8_248, %c0_249] : memref<32x128xf32, #tpu.memory_space<vmem>>, vector<16x128xf32>
    %269 = arith.truncf %268 : vector<16x128xf32> to vector<16x128xbf16>
    %c1_250 = arith.constant 1 : index
    %c0_251 = arith.constant 0 : index
    %c0_252 = arith.constant 0 : index
    %270 = vector.load %arg7[%c1_250, %c0_251, %c0_252] : memref<3x128x128xbf16, #tpu.memory_space<vmem>>, vector<1x128x128xbf16>
    %271 = vector.shape_cast %270 : vector<1x128x128xbf16> to vector<128x128xbf16>
    %cst_253 = arith.constant dense<0.000000e+00> : vector<16x128xf32>
    %272 = tpu.matmul %269, %271, %cst_253 {dimension_numbers = #tpu.dot_dimension_numbers<[1], [0], [0], [1], [0, 0, 1, 1], [], []>} : vector<16x128xbf16>, vector<128x128xbf16>, vector<16x128xf32> -> vector<16x128xf32>
    %273 = arith.addf %267, %272 : vector<16x128xf32>
    %c9_254 = arith.constant 9 : index
    %c0_255 = arith.constant 0 : index
    %274 = vector.load %arg10[%c9_254, %c0_255] : memref<32x128xf32, #tpu.memory_space<vmem>>, vector<16x128xf32>
    %275 = arith.truncf %274 : vector<16x128xf32> to vector<16x128xbf16>
    %c2_256 = arith.constant 2 : index
    %c0_257 = arith.constant 0 : index
    %c0_258 = arith.constant 0 : index
    %276 = vector.load %arg7[%c2_256, %c0_257, %c0_258] : memref<3x128x128xbf16, #tpu.memory_space<vmem>>, vector<1x128x128xbf16>
    %277 = vector.shape_cast %276 : vector<1x128x128xbf16> to vector<128x128xbf16>
    %cst_259 = arith.constant dense<0.000000e+00> : vector<16x128xf32>
    %278 = tpu.matmul %275, %277, %cst_259 {dimension_numbers = #tpu.dot_dimension_numbers<[1], [0], [0], [1], [0, 0, 1, 1], [], []>} : vector<16x128xbf16>, vector<128x128xbf16>, vector<16x128xf32> -> vector<16x128xf32>
    %279 = arith.addf %273, %278 : vector<16x128xf32>
    %280 = arith.addf %238, %279 : vector<16x128xf32>
    %c8_260 = arith.constant 8 : index
    %c0_261 = arith.constant 0 : index
    %281 = vector.load %arg10[%c8_260, %c0_261] : memref<32x128xf32, #tpu.memory_space<vmem>>, vector<16x128xf32>
    tpu.vector_store %arg10[%c8_260, %c0_261], %280 {strides = array<i32>} : memref<32x128xf32, #tpu.memory_space<vmem>>, vector<16x128xf32>,
    %cst_262 = arith.constant 0.000000e+00 : f32
    %282 = vector.broadcast %cst_262 : f32 to vector<16x128xf32>
    %c7_263 = arith.constant 7 : index
    %c0_264 = arith.constant 0 : index
    %283 = vector.load %arg10[%c7_263, %c0_264] : memref<32x128xf32, #tpu.memory_space<vmem>>, vector<16x128xf32>
    %284 = arith.truncf %283 : vector<16x128xf32> to vector<16x128xbf16>
    %c0_265 = arith.constant 0 : index
    %c0_266 = arith.constant 0 : index
    %c0_267 = arith.constant 0 : index
    %285 = vector.load %arg7[%c0_265, %c0_266, %c0_267] : memref<3x128x128xbf16, #tpu.memory_space<vmem>>, vector<1x128x128xbf16>
    %286 = vector.shape_cast %285 : vector<1x128x128xbf16> to vector<128x128xbf16>
    %cst_268 = arith.constant dense<0.000000e+00> : vector<16x128xf32>
    %287 = tpu.matmul %284, %286, %cst_268 {dimension_numbers = #tpu.dot_dimension_numbers<[1], [0], [0], [1], [0, 0, 1, 1], [], []>} : vector<16x128xbf16>, vector<128x128xbf16>, vector<16x128xf32> -> vector<16x128xf32>
    %288 = arith.addf %282, %287 : vector<16x128xf32>
    %c8_269 = arith.constant 8 : index
    %c0_270 = arith.constant 0 : index
    %289 = vector.load %arg10[%c8_269, %c0_270] : memref<32x128xf32, #tpu.memory_space<vmem>>, vector<16x128xf32>
    %290 = arith.truncf %289 : vector<16x128xf32> to vector<16x128xbf16>
    %c1_271 = arith.constant 1 : index
    %c0_272 = arith.constant 0 : index
    %c0_273 = arith.constant 0 : index
    %291 = vector.load %arg7[%c1_271, %c0_272, %c0_273] : memref<3x128x128xbf16, #tpu.memory_space<vmem>>, vector<1x128x128xbf16>
    %292 = vector.shape_cast %291 : vector<1x128x128xbf16> to vector<128x128xbf16>
    %cst_274 = arith.constant dense<0.000000e+00> : vector<16x128xf32>
    %293 = tpu.matmul %290, %292, %cst_274 {dimension_numbers = #tpu.dot_dimension_numbers<[1], [0], [0], [1], [0, 0, 1, 1], [], []>} : vector<16x128xbf16>, vector<128x128xbf16>, vector<16x128xf32> -> vector<16x128xf32>
    %294 = arith.addf %288, %293 : vector<16x128xf32>
    %c9_275 = arith.constant 9 : index
    %c0_276 = arith.constant 0 : index
    %295 = vector.load %arg10[%c9_275, %c0_276] : memref<32x128xf32, #tpu.memory_space<vmem>>, vector<16x128xf32>
    %296 = arith.truncf %295 : vector<16x128xf32> to vector<16x128xbf16>
    %c2_277 = arith.constant 2 : index
    %c0_278 = arith.constant 0 : index
    %c0_279 = arith.constant 0 : index
    %297 = vector.load %arg7[%c2_277, %c0_278, %c0_279] : memref<3x128x128xbf16, #tpu.memory_space<vmem>>, vector<1x128x128xbf16>
    %298 = vector.shape_cast %297 : vector<1x128x128xbf16> to vector<128x128xbf16>
    %cst_280 = arith.constant dense<0.000000e+00> : vector<16x128xf32>
    %299 = tpu.matmul %296, %298, %cst_280 {dimension_numbers = #tpu.dot_dimension_numbers<[1], [0], [0], [1], [0, 0, 1, 1], [], []>} : vector<16x128xbf16>, vector<128x128xbf16>, vector<16x128xf32> -> vector<16x128xf32>
    %300 = arith.addf %294, %299 : vector<16x128xf32>
    %c0_281 = arith.constant 0 : index
    %c0_282 = arith.constant 0 : index
    %301 = vector.load %arg8[%c0_281, %c0_282] : memref<1x128xf32, #tpu.memory_space<vmem>>, vector<1x128xf32>
    %302 = vector.broadcast %301 : vector<1x128xf32> to vector<16x128xf32>
    %303 = arith.mulf %300, %302 : vector<16x128xf32>
    %304 = arith.addf %1, %303 : vector<16x128xf32>
    %c0_283 = arith.constant 0 : index
    %c0_284 = arith.constant 0 : index
    %c0_285 = arith.constant 0 : index
    %305 = vector.load %arg9[%c0_283, %c0_284, %c0_285] : memref<1x16x128xf32, #tpu.memory_space<vmem>>, vector<1x16x128xf32>
    %306 = vector.shape_cast %305 : vector<1x16x128xf32> to vector<16x128xf32>
    %307 = vector.shape_cast %304 : vector<16x128xf32> to vector<1x16x128xf32>
    tpu.vector_store %arg9[%c0_283, %c0_284, %c0_285], %307 {strides = array<i32>} : memref<1x16x128xf32, #tpu.memory_space<vmem>>, vector<1x16x128xf32>,
    return
  }
  func.func @transform_0(%arg0: i32) -> (i32, i32, i32) {
    %c0_i32 = arith.constant 0 : i32
    %c0_i32_0 = arith.constant 0 : i32
    %c0_i32_1 = arith.constant 0 : i32
    return %arg0, %c0_i32, %c0_i32_0 : i32, i32, i32
  }
  func.func @transform_1(%arg0: i32) -> (i32, i32, i32) {
    %c0_i32 = arith.constant 0 : i32
    %c0_i32_0 = arith.constant 0 : i32
    %c0_i32_1 = arith.constant 0 : i32
    %c0_i32_2 = arith.constant 0 : i32
    return %c0_i32, %c0_i32_0, %c0_i32_1 : i32, i32, i32
  }
  func.func @transform_2(%arg0: i32) -> (i32, i32) {
    %c0_i32 = arith.constant 0 : i32
    %c0_i32_0 = arith.constant 0 : i32
    %c0_i32_1 = arith.constant 0 : i32
    return %c0_i32, %c0_i32_0 : i32, i32
  }
  func.func @transform_3(%arg0: i32) -> (i32, i32) {
    %c0_i32 = arith.constant 0 : i32
    %c0_i32_0 = arith.constant 0 : i32
    %c0_i32_1 = arith.constant 0 : i32
    return %c0_i32, %c0_i32_0 : i32, i32
  }
  func.func @transform_4(%arg0: i32) -> (i32, i32) {
    %c0_i32 = arith.constant 0 : i32
    %c0_i32_0 = arith.constant 0 : i32
    %c0_i32_1 = arith.constant 0 : i32
    return %c0_i32, %c0_i32_0 : i32, i32
  }
  func.func @transform_5(%arg0: i32) -> (i32, i32, i32) {
    %c0_i32 = arith.constant 0 : i32
    %c0_i32_0 = arith.constant 0 : i32
    %c0_i32_1 = arith.constant 0 : i32
    %c0_i32_2 = arith.constant 0 : i32
    return %c0_i32, %c0_i32_0, %c0_i32_1 : i32, i32, i32
  }
  func.func @transform_6(%arg0: i32) -> (i32, i32, i32) {
    %c0_i32 = arith.constant 0 : i32
    %c0_i32_0 = arith.constant 0 : i32
    %c0_i32_1 = arith.constant 0 : i32
    %c0_i32_2 = arith.constant 0 : i32
    return %c0_i32, %c0_i32_0, %c0_i32_1 : i32, i32, i32
  }
  func.func @transform_7(%arg0: i32) -> (i32, i32) {
    %c0_i32 = arith.constant 0 : i32
    %c0_i32_0 = arith.constant 0 : i32
    %c0_i32_1 = arith.constant 0 : i32
    return %c0_i32, %c0_i32_0 : i32, i32
  }
  func.func @transform_8(%arg0: i32) -> (i32, i32, i32) {
    %c0_i32 = arith.constant 0 : i32
    %c0_i32_0 = arith.constant 0 : i32
    %c0_i32_1 = arith.constant 0 : i32
    return %arg0, %c0_i32, %c0_i32_0 : i32, i32, i32
  }
}

</mosaic_0001>

<bundles_post_ra>
// kernel: tpu_custom_call.1
= control target key start
LH: loop header
LB: loop body
LE: loop exit
PB: predicated region body
PF: predicated region fallthrough
CT: control target
= control target key end

     0   :  { %s7958_s0 = inlined_call_operand.hbm [shape: f32[2,16,128], index: 0, kind: input, shape index: {}]   ;;  %s7959_s1 = inlined_call_operand.hbm [shape: f32[7,128,128], index: 1, kind: input, shape index: {}]   ;;  %s7960_s2 = inlined_call_operand.hbm [shape: f32[128,128], index: 2, kind: input, shape index: {}]   ;;  %s7961_s3 = inlined_call_operand.vmem [shape: f32[1,128], index: 3, kind: input, shape index: {}]   ;;  %s7962_s4 = inlined_call_operand.vmem [shape: f32[1,128], index: 4, kind: input, shape index: {}]   ;;  %s7963_s5 = inlined_call_operand.hbm [shape: bf16[3,128,128], index: 5, kind: input, shape index: {}]   ;;  %s7964_s6 = inlined_call_operand.hbm [shape: bf16[3,128,128], index: 6, kind: input, shape index: {}]   ;;  %s7965_s7 = inlined_call_operand.vmem [shape: f32[1,128], index: 7, kind: input, shape index: {}]   ;;  %s7966_s8 = inlined_call_operand.hbm [shape: f32[2,16,128], index: 8, kind: output, shape index: {}]  }
   0x1   :  { %7973 = sst [smem:[#allocation17_spill]] %s7959_s1 }
   0x2   :  { %7974 = sst [smem:[#allocation18_spill]] %s7960_s2 }
   0x3   :  { %13 = vsyncpa [#allocation4], 0 }
   0x4   :  { %15 = vsyncpa [#allocation4 + $0x1], 0 }
   0x5   :  { %16 = vsyncpa [#allocation7], 0 }
   0x6   :  { %17 = vsyncpa [#allocation10], 0 }
   0x7   :  { %18 = vsyncpa [#allocation5], 0 }
   0x8   :  { %20 = vsyncpa [#allocation5 + $0x1], 0  ;;  %s7266_s27 = smov 0   ;;  %s7268_s28 = smov 0  }
   0x9   :  { %s7270_s29 = smov 0   ;;  %s7272_s30 = smov 0  }
   0xa LB: > { %s7287_s9 = sadd.s32 4294967295, %s7205_s30   ;;  %s4756_s10 = sadd.s32 4294967294, %s7205_s30   ;;  %s7205_s30 = sphi %s7272_s30, %s7998_s30   ;;  %s7201_s29 = sphi %s7270_s29, %s7997_s29   ;;  %s7197_s28 = sphi %s7268_s28, %s7996_s28   ;;  %s7193_s27 = sphi %s7266_s27, %s7995_s27  }
   0xb   : > { %p46_p0 = scmp.ne.s32.totalorder %s7197_s28, %s7193_s27  ;;  %p7967_p1 = scmp.eq.s32.totalorder %s7287_s9, 0 }
   0xc   : > { %p223_p3 = scmp.eq.s32.totalorder %s4756_s10, 1  ;;  %p4757_p5 = scmp.ge.s32.totalorder %s7205_s30, 1 }
   0xd   : > { %p7296_p4 = por %p7967_p1, %p46_p0  ;;  %p230_p7 = scmp.lt.s32.totalorder %s7205_s30, 3 }
   0xe   : > { %p7301_p6 = por %p223_p3, %p46_p0  ;;  %s7207_s14 = smov [#allocation6]  }
   0xf   : > { %s7975_s11 = scalar_select %p7296_p4, 1, 0 }
  0x10   : > { %s7976_s12 = scalar_select %p7301_p6, 1, 0 }
  0x11   : > { %p7306_p8 = pnand %p4757_p5, %p230_p7  ;;  %s242_s15 = sshll.u32 %s7207_s14, 4  ;;  %s243_s15 = int_to_ptr.vmem [resolvable:$true] %s242_s15 }
  0x12   : > { %s7208_s17 = smov [#allocation9]   ;;  %s7012_s19 = scalar_lea.vmem %s243_s15, 14336 }
  0x13   : > { %s7977_s13 = scalar_select %p7306_p8, 1, 0 }
  0x14   : > { %p6688_p9 = pneg %p7306_p8  ;;  %s274_s18 = sshll.u32 %s7208_s17, 4  ;;  %s275_s18 = int_to_ptr.vmem [resolvable:$true] %s274_s18 }
  0x15   : > { %p7013_p13 = scmp.ne.s32.totalorder %s243_s15, %s7012_s19  ;;  %p7020_p5 = scmp.lt.s32.totalorder %s243_s15, %s243_s15 }
  0x16   : > { %p7315_p11 = pnand %p6688_p9, %p7967_p1  ;;  %p7021_p7 = scmp.lt.s32.totalorder %s7012_s19, %s7012_s19 }
  0x18   : > { %p7003_p12 = pneg %p7315_p11  ;;  %p7022_p10 = por %p7021_p7, %p7020_p5 }
  0x1a   : > { %p7015_p0 = pnand %p7013_p13, %p7003_p12 }
  0x1c   : > { %p7016_p3 = pneg %p7015_p0 }
  0x1e   : > { %p7023_p9 = pnand %p7022_p10, %p7016_p3 }
  0x20   : > { %7026 = shalt.err (!%p7023_p9)
}
  0x21   : > { %s7968_s20 = smov 128   ;;  %s7969_s21 = smov 8  }
  0x22   : > { %s7979_s1 = sld [smem:[#allocation17_spill]]  ;;  %s7038_s24 = scalar_lea.vmem %s275_s18, 3072 }
  0x23   : > { %p7039_p13 = scmp.ne.s32.totalorder %s275_s18, %s7038_s24  ;;  %p7046_p10 = scmp.lt.s32.totalorder %s275_s18, %s275_s18 }
  0x24   : > { %p7047_p3 = scmp.lt.s32.totalorder %s7038_s24, %s7038_s24 }
  0x25   : > { %p7041_p0 = pnand %p7039_p13, %p7003_p12 }
  0x26   : > { %p7048_p7 = por %p7047_p3, %p7046_p10 }
  0x27   : > { %p7042_p5 = pneg %p7041_p0 }
  0x28   : > { %6691 = dma.hbm_to_vmem [thread:$0]  (!%p7315_p11), %s7979_s1, 14336, %s243_s15, [#allocation7], %s7968_s20, %s7968_s20, %s7969_s21  }
  0x29   : > { %p7049_p9 = pnand %p7048_p7, %p7042_p5 }
  0x2b   : > { %7052 = shalt.err (!%p7049_p9)
}
  0x2c   : > { %s7211_s25 = smov 64   ;;  %s7212_s26 = smov 4  }
  0x2d   : > { %6697 = dma.hbm_to_vmem [thread:$0]  (!%p7315_p11), %s7963_s5, 3072, %s275_s18, [#allocation10], %s7211_s25, %s7211_s25, %s7212_s26  }
  0x2e   : > { %s7213_s15 = smov [#allocation8]   ;;  %s7214_s19 = smov [#allocation11]  }
  0x2f   : > { %s255_s17 = sshll.u32 %s7213_s15, 4  ;;  %s287_s22 = sshll.u32 %s7214_s19, 4  ;;  %s256_s17 = int_to_ptr.vmem [resolvable:$true] %s255_s17  ;;  %s288_s22 = int_to_ptr.vmem [resolvable:$true] %s287_s22 }
  0x30   : > { %s7064_s23 = scalar_lea.vmem %s256_s17, 2048  ;;  %p7072_p10 = scmp.lt.s32.totalorder %s256_s17, %s256_s17 }
  0x31   : > { %p7065_p13 = scmp.ne.s32.totalorder %s256_s17, %s7064_s23  ;;  %p7073_p3 = scmp.lt.s32.totalorder %s7064_s23, %s7064_s23 }
  0x33   : > { %p7067_p0 = pnand %p7065_p13, %p7003_p12  ;;  %p7074_p7 = por %p7073_p3, %p7072_p10 }
  0x35   : > { %p7068_p5 = pneg %p7067_p0 }
  0x37   : > { %p7075_p9 = pnand %p7074_p7, %p7068_p5 }
  0x39   : > { %7078 = shalt.err (!%p7075_p9)
}
  0x3a   : > { %s7980_s2 = sld [smem:[#allocation18_spill]]  ;;  %s7090_s10 = scalar_lea.vmem %s288_s22, 3072 }
  0x3b   : > { %p7091_p1 = scmp.ne.s32.totalorder %s288_s22, %s7090_s10  ;;  %p7098_p2 = scmp.lt.s32.totalorder %s288_s22, %s288_s22 }
  0x3c   : > { %p7099_p10 = scmp.lt.s32.totalorder %s7090_s10, %s7090_s10 }
  0x3d   : > { %p7093_p13 = pnand %p7091_p1, %p7003_p12 }
  0x3e   : > { %p7100_p5 = por %p7099_p10, %p7098_p2 }
  0x3f   : > { %p7094_p0 = pneg %p7093_p13 }
  0x40   : > { %6694 = dma.hbm_to_vmem [thread:$0]  (!%p7315_p11), %s7980_s2, 2048, %s256_s17, [#allocation7], %s7968_s20, %s7968_s20, %s7969_s21  }
  0x41   : > { %p7101_p3 = pnand %p7100_p5, %p7094_p0 }
  0x43   : > { %7104 = shalt.err (!%p7101_p3)
}
  0x44   : > { %6700 = dma.hbm_to_vmem [thread:$0]  (!%p7315_p11), %s7964_s6, 3072, %s288_s22, [#allocation10], %s7211_s25, %s7211_s25, %s7212_s26  }
  0x45   : > { %s7366_s17 = sadd.s32 1, %s7205_s30   ;;  %s33_s19 = sadd.s32 1, %s7201_s29 }
  0x46   : > { %s30_s16 = ssub.s32 %s7205_s30, %s7366_s17  ;;  %p40_p2 = scmp.ne.s32.totalorder %s7201_s29, %s7197_s28 }
  0x47   : > { %p31_p1 = scmp.eq.s32.totalorder %s30_s16, 0  ;;  %p41_p12 = scmp.eq.s32.totalorder %s7205_s30, 0 }
  0x48   : > { %p7981_p9 = scmp.eq.s32.totalorder %s7287_s9, 1  ;;  %p6713_p0 = scmp.lt.s32.totalorder %s7205_s30, 2 }
  0x49   : > { %s7375_s23 = scalar_select %p31_p1, %s7201_s29, %s33_s19  }
  0x4a   : > { %p42_p7 = por %p41_p12, %p40_p2  ;;  %p7379_p13 = por %p7981_p9, %p40_p2 }
  0x4b   : > { %s304_s24 = sand.u32 1, %s7201_s29   ;;  %s4925_s25 = sshll.u32 %s7205_s30, 8 }
  0x4c   : > { %s7982_s18 = scalar_select %p7379_p13, 1, 0 }
  0x4d   : > { %s4763_s10 = sshll.u32 %s304_s24, 4  ;;  %s7389_s14 = scalar_lea.hbm %s7958_s0, %s4925_s25 }
  0x4e   : > { %s308_s15 = scalar_lea.vmem [#allocation3], %s4763_s10  ;;  %p7393_p11 = pnand %p6713_p0, %p42_p7 }
  0x4f   : > { %s315_s16 = sshll.u32 %s308_s15, 4  ;;  %s7397_s20 = scalar_lea.sflag [#allocation4], %s304_s24  ;;  %s7391_s16 = int_to_ptr.vmem [resolvable:$true] %s315_s16 }
  0x50   : > { %s7105_s21 = scalar_lea.hbm %s7389_s14, 256  ;;  %p7107_p5 = pneg %p7393_p11 }
  0x51   : > { %p7106_p10 = scmp.ne.s32.totalorder %s7389_s14, %s7105_s21  ;;  %s7110_s10 = scalar_lea.hbm %s7958_s0, 512 }
  0x52   : > { %p7111_p2 = scmp.lt.s32.totalorder %s7389_s14, %s7958_s0  ;;  %p7112_p12 = scmp.lt.s32.totalorder %s7110_s10, %s7105_s21 }
  0x53   : > { %p7108_p3 = pnand %p7107_p5, %p7106_p10 }
  0x54   : > { %p7113_p7 = por %p7112_p12, %p7111_p2 }
  0x55   : > { %p7109_p1 = pneg %p7108_p3 }
  0x57   : > { %p7114_p9 = pnand %p7113_p7, %p7109_p1 }
  0x59   : > { %7117 = shalt.err (!%p7114_p9)
}
  0x5a   : > { %s7118_s24 = scalar_lea.vmem %s7391_s16, 256  ;;  %s7215_s1 = smov [#allocation3]  }
  0x5b   : > { %p7119_p0 = scmp.ne.s32.totalorder %s7391_s16, %s7118_s24  ;;  %s7123_s2 = sshll.u32 %s7215_s1, 4  ;;  %s7124_s2 = int_to_ptr.vmem [resolvable:$false] %s7123_s2 }
  0x5c   : > { %s7125_s25 = scalar_lea.vmem %s7124_s2, 512  ;;  %p7126_p3 = scmp.lt.s32.totalorder %s7391_s16, %s7124_s2 }
  0x5d   : > { %p7121_p6 = pnand %p7119_p0, %p7107_p5  ;;  %p7127_p13 = scmp.lt.s32.totalorder %s7125_s25, %s7118_s24 }
  0x5f   : > { %p7122_p10 = pneg %p7121_p6  ;;  %p7128_p4 = por %p7127_p13, %p7126_p3 }
  0x61   : > { %p7129_p8 = pnand %p7128_p4, %p7122_p10 }
  0x63   : > { %7132 = shalt.err (!%p7129_p8)
}
  0x64   : > { %s7984_s21 = smov 8   ;;  %s7985_s26 = smov 128  }
  0x65   : > { %6704 = dma.hbm_to_vmem [thread:$0]  (!%p7393_p11), %s7389_s14, 256, %s7391_s16, %s7397_s20, %s7985_s26, %s7985_s26, %s7984_s21  }
  0x66   : > { %p7986_p6 = scmp.ne.s32.totalorder %s7977_s13, 0 }
  0x67   : > { %s7424_s1 = sand.u32 (!%p7986_p6), 1, %s7197_s28   ;;  %p7987_p4 = scmp.ne.s32.totalorder (!%p7986_p6), %s7975_s11, 0 }
  0x68   : > { %327 = sbr.rel (%p7986_p6) target bundleno = 2960 (0xb90), region = 52  ;;  %s4767_s2 = sshll.u32 (!%p7986_p6), %s7424_s1, 4 }
  0x69   : > { %s330_s10 = scalar_lea.sflag (!%p7986_p6), [#allocation4], %s7424_s1  ;;  %s7430_s19 = scalar_lea.vmem (!%p7986_p6), [#allocation3], %s4767_s2 }
  0x6d   : > { %7176 = dma.done.wait (%p7987_p4), %s330_s10, 256  }
  0x6e   : > { %7178 = vsyncadd (%p7987_p4), %s330_s10, 4294967040  ;;  %p7988_p8 = scmp.eq.s32.totalorder %s7287_s9, 0 }
  0x70   : > { %7180 = dma.done.wait (%p7988_p8), [#allocation7], 16384   ;;  %p7989_p13 = pmov %p7988_p8 }
  0x71   : > { %p7990_p11 = pmov %p7988_p8 }
  0x72   : > { %7182 = vsyncadd (%p7989_p13), [#allocation7], 4294950912 }
  0x73   : > { %7184 = dma.done.wait (%p7990_p11), [#allocation10], 6144   ;;  %p7991_p5 = pmov %p7988_p8 }
  0x74   : > { %v7216_v0 = vmov 0.0   ;;  %v425_v1 = vld [vmem:[#allocation6 + $0xf8] sm:$0xff]  ;;  %v424_v3 = vld [vmem:[#allocation6 + $0xf0] sm:$0xff]  ;;  %v423_v5 = vld [vmem:[#allocation6 + $0xe8] sm:$0xff]  ;;  %vm7217_vm0 = vmmov 0   ;;  %s381_s15 = scalar_lea.vmem [#allocation12], %s4767_s2 }
  0x75   : > { %7186 = vsyncadd (%p7991_p5), [#allocation10], 4294961152  ;;  %385 = vst [vmem:[#allocation2] sm:$0xff] %v7216_v0  ;;  %v406_v2 = vld [vmem:[#allocation6 + $0x78] sm:$0xff]  ;;  %5503 = vmatprep.subr.mxu0 %v425_v1  ;;  %v405_v4 = vld [vmem:[#allocation6 + $0x70] sm:$0xff]  ;;  %s4645_s24 = sshll.u32 %s381_s15, 4  ;;  %s7909_s24 = int_to_ptr.vmem [resolvable:$true] %s4645_s24 }
  0x76   : > { %386 = vst [vmem:[#allocation2 + $0x18] sm:$0xff] %v7216_v0  ;;  %5538 = vmatprep.subr.mxu1 %v406_v2  ;;  %5504 = vmatpush3.msra.mxu0 %v425_v1  ;;  %v404_v6 = vld [vmem:[#allocation6 + $0x68] sm:$0xff]  ;;  %v422_v7 = vld [vmem:[#allocation6 + $0xe0] sm:$0xff]  ;;  %v421_v9 = vld [vmem:[#allocation6 + $0xd8] sm:$0xff]  ;;  %s4926_s25 = sshll.u32 %s7287_s9, 8  ;;  %s4632_s2 = scalar_lea.sflag [#allocation5], %s7424_s1 }
  0x77   : > { %5539 = vmatpush3.msra.mxu1 %v406_v2  ;;  %5505 = vmatprep.subr.mxu0 %v424_v3  ;;  %v403_v8 = vld [vmem:[#allocation6 + $0x60] sm:$0xff]  ;;  %v402_v10 = vld [vmem:[#allocation6 + $0x58] sm:$0xff]  ;;  %v420_v11 = vld [vmem:[#allocation6 + $0xd0] sm:$0xff]  ;;  %s7914_s10 = scalar_lea.hbm %s7966_s8, %s4926_s25  ;;  %p7992_p2 = scmp.ne.s32.totalorder %s7982_s18, 0 }
  0x78   : > { %5540 = vmatprep.subr.mxu1 %v405_v4  ;;  %5506 = vmatpush3.msra.mxu0 %v424_v3  ;;  %v401_v12 = vld [vmem:[#allocation6 + $0x50] sm:$0xff]  ;;  %v419_v13 = vld [vmem:[#allocation6 + $0xc8] sm:$0xff]  ;;  %v418_v17 = vld [vmem:[#allocation6 + $0xc0] sm:$0xff]  ;;  %s7218_s9 = smov [#allocation12]  }
  0x79   : > { %5541 = vmatpush3.msra.mxu1 %v405_v4  ;;  %5507 = vmatprep.subr.mxu0 %v423_v5  ;;  %v400_v14 = vld [vmem:[#allocation6 + $0x48] sm:$0xff]  ;;  %v7445_v15 = vld [vmem:[%s7430_s19] sm:$0xff]  ;;  %v417_v19 = vld [vmem:[#allocation6 + $0xb8] sm:$0xff]  ;;  %s7137_s11 = sshll.u32 %s7218_s9, 4  ;;  %s7138_s11 = int_to_ptr.vmem [resolvable:$false] %s7137_s11 }
  0x7a   : > { %5542 = vmatprep.subr.mxu1 %v404_v6  ;;  %5508 = vmatpush3.msra.mxu0 %v423_v5  ;;  %387 = vst [vmem:[#allocation2 + $0x8] sm:$0xff] %v7445_v15  ;;  %v7449_v16 = vld [vmem:[%s7430_s19 + $0x8] sm:$0xff]  ;;  %v399_v18 = vld [vmem:[#allocation6 + $0x40] sm:$0xff]  ;;  %v416_v21 = vld [vmem:[#allocation6 + $0xb0] sm:$0xff]  ;;  %s7133_s19 = scalar_lea.vmem %s7909_s24, 256  ;;  %s7139_s13 = scalar_lea.vmem %s7138_s11, 512 }
  0x7b   : > { %5543 = vmatpush3.msra.mxu1 %v404_v6  ;;  %5509 = vmatprep.subr.mxu0 %v422_v7  ;;  %388 = vst [vmem:[#allocation2 + $0x10] sm:$0xff] %v7449_v16  ;;  %v398_v20 = vld [vmem:[#allocation6 + $0x38] sm:$0xff]  ;;  %v397_v22 = vld [vmem:[#allocation6 + $0x30] sm:$0xff]  ;;  %v415_v23 = vld [vmem:[#allocation6 + $0xa8] sm:$0xff]  ;;  %p7134_p1 = scmp.ne.s32.totalorder %s7909_s24, %s7133_s19  ;;  %p7140_p9 = scmp.lt.s32.totalorder %s7909_s24, %s7138_s11 }
  0x7c   : > { %5544 = vmatprep.subr.mxu1 %v403_v8  ;;  %5510 = vmatpush3.msra.mxu0 %v422_v7  ;;  %v396_v24 = vld [vmem:[#allocation6 + $0x28] sm:$0xff]  ;;  %v414_v25 = vld [vmem:[#allocation6 + $0xa0] sm:$0xff]  ;;  %v413_v27 = vld [vmem:[#allocation6 + $0x98] sm:$0xff]  ;;  %p7141_p0 = scmp.lt.s32.totalorder %s7139_s13, %s7133_s19 }
  0x7d   : > { %5545 = vmatpush3.msra.mxu1 %v403_v8  ;;  %5511 = vmatprep.subr.mxu0 %v421_v9  ;;  %v395_v26 = vld [vmem:[#allocation6 + $0x20] sm:$0xff]  ;;  %v394_v28 = vld [vmem:[#allocation6 + $0x18] sm:$0xff]  ;;  %v412_v29 = vld [vmem:[#allocation6 + $0x90] sm:$0xff]  ;;  %p7135_p12 = pnand %p7134_p1, %p7992_p2 }
  0x7e   : > { %5546 = vmatprep.subr.mxu1 %v402_v10  ;;  %5512 = vmatpush3.msra.mxu0 %v421_v9  ;;  %v393_v30 = vld [vmem:[#allocation6 + $0x10] sm:$0xff]  ;;  %v411_v31 = vld [vmem:[#allocation6 + $0x88] sm:$0xff]  ;;  %v410_v33 = vld [vmem:[#allocation6 + $0x80] sm:$0xff]  ;;  %p7142_p10 = por %p7141_p0, %p7140_p9 }
  0x7f   : > { %5547 = vmatpush3.msra.mxu1 %v402_v10  ;;  %5513 = vmatprep.subr.mxu0 %v420_v11  ;;  %v392_v32 = vld [vmem:[#allocation6 + $0x8] sm:$0xff]  ;;  %v391_v34 = vld [vmem:[#allocation6] sm:$0xff]  ;;  %v594_v39 = vld [vmem:[#allocation6 + $0x178] sm:$0xff]  ;;  %p7136_p7 = pneg %p7135_p12 }
  0x80   : > { %5548 = vmatprep.subr.mxu1 %v401_v12  ;;  %5514 = vmatpush3.msra.mxu0 %v420_v11  ;;  %v690_v40 = vld [vmem:[#allocation6 + $0x1f8] sm:$0xff]  ;;  %v593_v41 = vld [vmem:[#allocation6 + $0x170] sm:$0xff]  ;;  %v592_v43 = vld [vmem:[#allocation6 + $0x168] sm:$0xff] }
  0x81   : > { %5549 = vmatpush3.msra.mxu1 %v401_v12  ;;  %5515 = vmatprep.subr.mxu0 %v419_v13  ;;  %v407_v35 = vld [vmem:[#allocation2 + $0x6] sm:$0xff]  ;;  %v689_v42 = vld [vmem:[#allocation6 + $0x1f0] sm:$0xff]  ;;  %v590_v47 = vld [vmem:[#allocation6 + $0x158] sm:$0xff]  ;;  %p7143_p3 = pnand %p7142_p10, %p7136_p7 }
  0x82   : > { %5550 = vmatprep.subr.mxu1 %v400_v14  ;;  %5516 = vmatpush3.msra.mxu0 %v419_v13  ;;  %v389_v36 = vld [vmem:[#allocation2 + $0x5] sm:$0xff]  ;;  %v408_v37 = vld [vmem:[#allocation2 + $0xe] sm:$0xff]  ;;  %v686_v48 = vld [vmem:[#allocation6 + $0x1d8] sm:$0xff] }
  0x83   : > { %5551 = vmatpush3.msra.mxu1 %v400_v14  ;;  %5517 = vmatprep.subr.mxu0 %v418_v17  ;;  %v390_v38 = vld [vmem:[#allocation2 + $0xd] sm:$0xff]  ;;  %v591_v45 = vld [vmem:[#allocation6 + $0x160] sm:$0xff]  ;;  %v586_v55 = vld [vmem:[#allocation6 + $0x138] sm:$0xff] }
  0x84   : > { %5552 = vmatprep.subr.mxu1 %v399_v18  ;;  %5518 = vmatpush3.msra.mxu0 %v418_v17  ;;  %v688_v44 = vld [vmem:[#allocation6 + $0x1e8] sm:$0xff]  ;;  %v687_v46 = vld [vmem:[#allocation6 + $0x1e0] sm:$0xff]  ;;  %v589_v49 = vld [vmem:[#allocation6 + $0x150] sm:$0xff] }
  0x85   : > { %5553 = vmatpush3.msra.mxu1 %v399_v18  ;;  %5519 = vmatprep.subr.mxu0 %v417_v19  ;;  %v685_v50 = vld [vmem:[#allocation6 + $0x1d0] sm:$0xff]  ;;  %v588_v51 = vld [vmem:[#allocation6 + $0x148] sm:$0xff]  ;;  %v587_v53 = vld [vmem:[#allocation6 + $0x140] sm:$0xff] }
  0x86   : > { %5554 = vmatprep.subr.mxu1 %v398_v20  ;;  %5520 = vmatpush3.msra.mxu0 %v417_v19  ;;  %v684_v52 = vld [vmem:[#allocation6 + $0x1c8] sm:$0xff]  ;;  %v683_v54 = vld [vmem:[#allocation6 + $0x1c0] sm:$0xff]  ;;  %v682_v56 = vld [vmem:[#allocation6 + $0x1b8] sm:$0xff] }
  0x87   : > { %5555 = vmatpush3.msra.mxu1 %v398_v20  ;;  %5521 = vmatprep.subr.mxu0 %v416_v21  ;;  %v585_v57 = vld [vmem:[#allocation6 + $0x130] sm:$0xff]  ;;  %v584_v59 = vld [vmem:[#allocation6 + $0x128] sm:$0xff]  ;;  %v583_v61 = vld [vmem:[#allocation6 + $0x120] sm:$0xff] }
  0x88   : > { %5556 = vmatprep.subr.mxu1 %v397_v22  ;;  %5522 = vmatpush3.msra.mxu0 %v416_v21  ;;  %v681_v58 = vld [vmem:[#allocation6 + $0x1b0] sm:$0xff]  ;;  %v680_v60 = vld [vmem:[#allocation6 + $0x1a8] sm:$0xff]  ;;  %v679_v62 = vld [vmem:[#allocation6 + $0x1a0] sm:$0xff] }
  0x89   : > { %5557 = vmatpush3.msra.mxu1 %v397_v22  ;;  %5523 = vmatprep.subr.mxu0 %v415_v23  ;;  %v582_v63 = vld [vmem:[#allocation6 + $0x118] sm:$0xff]  ;;  %v581_v1 = vld [vmem:[#allocation6 + $0x110] sm:$0xff]  ;;  %v580_v3 = vld [vmem:[#allocation6 + $0x108] sm:$0xff] }
  0x8a   : > { %5558 = vmatprep.subr.mxu1 %v396_v24  ;;  %5524 = vmatpush3.msra.mxu0 %v415_v23  ;;  %v678_v0 = vld [vmem:[#allocation6 + $0x198] sm:$0xff]  ;;  %v677_v2 = vld [vmem:[#allocation6 + $0x190] sm:$0xff]  ;;  %v676_v4 = vld [vmem:[#allocation6 + $0x188] sm:$0xff] }
  0x8b   : > { %5559 = vmatpush3.msra.mxu1 %v396_v24  ;;  %5525 = vmatprep.subr.mxu0 %v414_v25  ;;  %v576_v5 = vld [vmem:[#allocation2 + $0x7] sm:$0xff]  ;;  %v577_v8 = vld [vmem:[#allocation2 + $0xf] sm:$0xff]  ;;  %v786_v9 = vld [vmem:[#allocation6 + $0x278] sm:$0xff] }
  0x8c   : > { %5560 = vmatprep.subr.mxu1 %v395_v26  ;;  %5526 = vmatpush3.msra.mxu0 %v414_v25  ;;  %v579_v6 = vld [vmem:[#allocation6 + $0x100] sm:$0xff]  ;;  %v785_v10 = vld [vmem:[#allocation6 + $0x270] sm:$0xff]  ;;  %v882_v11 = vld [vmem:[#allocation6 + $0x2f8] sm:$0xff] }
  0x8d   : > { %5561 = vmatpush3.msra.mxu1 %v395_v26  ;;  %5527 = vmatprep.subr.mxu0 %v413_v27  ;;  %v675_v7 = vld [vmem:[#allocation6 + $0x180] sm:$0xff]  ;;  %v784_v12 = vld [vmem:[#allocation6 + $0x268] sm:$0xff]  ;;  %v881_v13 = vld [vmem:[#allocation6 + $0x2f0] sm:$0xff] }
  0x8e   : > { %5562 = vmatprep.subr.mxu1 %v394_v28  ;;  %5528 = vmatpush3.msra.mxu0 %v413_v27  ;;  %v783_v14 = vld [vmem:[#allocation6 + $0x260] sm:$0xff]  ;;  %v880_v17 = vld [vmem:[#allocation6 + $0x2e8] sm:$0xff]  ;;  %v782_v18 = vld [vmem:[#allocation6 + $0x258] sm:$0xff] }
  0x8f   : > { %5563 = vmatpush3.msra.mxu1 %v394_v28  ;;  %5529 = vmatprep.subr.mxu0 %v412_v29  ;;  %v879_v19 = vld [vmem:[#allocation6 + $0x2e0] sm:$0xff]  ;;  %v781_v20 = vld [vmem:[#allocation6 + $0x250] sm:$0xff]  ;;  %v878_v21 = vld [vmem:[#allocation6 + $0x2d8] sm:$0xff] }
  0x90   : > { %5564 = vmatprep.subr.mxu1 %v393_v30  ;;  %5530 = vmatpush3.msra.mxu0 %v412_v29  ;;  %v779_v22 = vld [vmem:[#allocation6 + $0x240] sm:$0xff]  ;;  %v7454_v23 = vld [vmem:[#allocation6 + $0x2c8] sm:$0xff]  ;;  %v7456_v24 = vld [vmem:[#allocation6 + $0x238] sm:$0xff] }
  0x91   : > { %5565 = vmatpush3.msra.mxu1 %v393_v30  ;;  %5531 = vmatprep.subr.mxu0 %v411_v31  ;;  %v7458_v25 = vld [vmem:[#allocation6 + $0x2c0] sm:$0xff]  ;;  %v7460_v26 = vld [vmem:[#allocation6 + $0x230] sm:$0xff]  ;;  %v7462_v27 = vld [vmem:[#allocation6 + $0x2b8] sm:$0xff] }
  0x92   : > { %5566 = vmatprep.subr.mxu1 %v392_v32  ;;  %5532 = vmatpush3.msra.mxu0 %v411_v31  ;;  %v7466_v28 = vld [vmem:[#allocation6 + $0x228] sm:$0xff]  ;;  %v7468_v29 = vld [vmem:[#allocation6 + $0x2b0] sm:$0xff]  ;;  %v7474_v30 = vld [vmem:[#allocation6 + $0x220] sm:$0xff] }
  0x93   : > { %5567 = vmatpush3.msra.mxu1 %v392_v32  ;;  %5533 = vmatprep.subr.mxu0 %v410_v33  ;;  %v7476_v31 = vld [vmem:[#allocation6 + $0x2a8] sm:$0xff]  ;;  %v7482_v32 = vld [vmem:[#allocation6 + $0x218] sm:$0xff] }
  0x94   : > { %5568 = vmatprep.subr.mxu1 %v391_v34  ;;  %5534 = vmatpush3.msra.mxu0 %v410_v33  ;;  %v7484_v33 = vld [vmem:[#allocation6 + $0x2a0] sm:$0xff] }
  0x95   : > { %5535 = vmatprep.mubr.f32.mxu0 %v407_v35  ;;  %5569 = vmatpush3.msra.mxu1 %v391_v34  ;;  %v7490_v34 = vld [vmem:[#allocation6 + $0x210] sm:$0xff]  ;;  %v7492_v35 = vld [vmem:[#allocation6 + $0x298] sm:$0xff] }
  0x96   : > { %5570 = vmatprep.mubr.f32.mxu1 %v389_v36  ;;  %5536 = vmatmul.mubr.f32.vlgmr.msra.gmra.mxu0 %v408_v37  ;;  %v7498_v36 = vld [vmem:[#allocation6 + $0x208] sm:$0xff]  ;;  %v7500_v37 = vld [vmem:[#allocation6 + $0x290] sm:$0xff] }
  0x97   : > { %5571 = vmatmul.mubr.f32.vlgmr.msra.gmra.mxu1 %v390_v38  ;;  %5573 = vmatprep.subr.mxu0 %v594_v39  ;;  %v7506_v38 = vld [vmem:[#allocation6 + $0x200] sm:$0xff] }
  0x98   : > { %5608 = vmatprep.subr.mxu1 %v690_v40  ;;  %5574 = vmatpush3.msra.mxu0 %v594_v39  ;;  %v7508_v39 = vld [vmem:[#allocation6 + $0x288] sm:$0xff] }
  0x99   : > { %5609 = vmatpush3.msra.mxu1 %v690_v40  ;;  %5575 = vmatprep.subr.mxu0 %v593_v41  ;;  %v768_v40 = vld [vmem:[#allocation2 + $0x9] sm:$0xff] }
  0x9a   : > { %5610 = vmatprep.subr.mxu1 %v689_v42  ;;  %5576 = vmatpush3.msra.mxu0 %v593_v41  ;;  %v769_v41 = vld [vmem:[#allocation2 + $0x11] sm:$0xff] }
  0x9b   : > { %5611 = vmatpush3.msra.mxu1 %v689_v42  ;;  %5577 = vmatprep.subr.mxu0 %v592_v43  ;;  %v7516_v42 = vld [vmem:[#allocation6 + $0x280] sm:$0xff] }
  0x9c   : > { %5612 = vmatprep.subr.mxu1 %v688_v44  ;;  %5578 = vmatpush3.msra.mxu0 %v592_v43  ;;  %v7518_v43 = vld [vmem:[#allocation6 + $0x378] sm:$0xff] }
  0x9d   : > { %5613 = vmatpush3.msra.mxu1 %v688_v44  ;;  %5579 = vmatprep.subr.mxu0 %v591_v45  ;;  %v864_v44 = vld [vmem:[#allocation2 + $0xa] sm:$0xff] }
  0x9e   : > { %5614 = vmatprep.subr.mxu1 %v687_v46  ;;  %5580 = vmatpush3.msra.mxu0 %v591_v45  ;;  %v865_v45 = vld [vmem:[#allocation2 + $0x12] sm:$0xff] }
  0x9f   : > { %5615 = vmatpush3.msra.mxu1 %v687_v46  ;;  %5581 = vmatprep.subr.mxu0 %v590_v47  ;;  %v7525_v46 = vld [vmem:[#allocation6 + $0x370] sm:$0xff] }
  0xa0   : > { %5616 = vmatprep.subr.mxu1 %v686_v48  ;;  %5582 = vmatpush3.msra.mxu0 %v590_v47  ;;  %v960_v47 = vld [vmem:[#allocation2 + $0xb] sm:$0xff] }
  0xa1   : > { %5617 = vmatpush3.msra.mxu1 %v686_v48  ;;  %5583 = vmatprep.subr.mxu0 %v589_v49  ;;  %v7530_v48 = vld [vmem:[#allocation6 + $0x368] sm:$0xff] }
  0xa2   : > { %5618 = vmatprep.subr.mxu1 %v685_v50  ;;  %5584 = vmatpush3.msra.mxu0 %v589_v49  ;;  %v7534_v49 = vld [vmem:[#allocation6 + $0x360] sm:$0xff] }
  0xa3   : > { %5619 = vmatpush3.msra.mxu1 %v685_v50  ;;  %5585 = vmatprep.subr.mxu0 %v588_v51  ;;  %v7538_v50 = vld [vmem:[#allocation6 + $0x358] sm:$0xff] }
  0xa4   : > { %5620 = vmatprep.subr.mxu1 %v684_v52  ;;  %5586 = vmatpush3.msra.mxu0 %v588_v51  ;;  %v6919_v51 = vld [vmem:[#allocation6 + $0xf8] sm:$0xff] }
  0xa5   : > { %5621 = vmatpush3.msra.mxu1 %v684_v52  ;;  %5587 = vmatprep.subr.mxu0 %v587_v53  ;;  %v7542_v52 = vld [vmem:[#allocation6 + $0x350] sm:$0xff] }
  0xa6   : > { %5622 = vmatprep.subr.mxu1 %v683_v54  ;;  %5588 = vmatpush3.msra.mxu0 %v587_v53  ;;  %v6920_v53 = vld [vmem:[#allocation6 + $0xf0] sm:$0xff] }
  0xa7   : > { %5623 = vmatpush3.msra.mxu1 %v683_v54  ;;  %5589 = vmatprep.subr.mxu0 %v586_v55  ;;  %v7546_v54 = vld [vmem:[#allocation6 + $0x348] sm:$0xff] }
  0xa8   : > { %5624 = vmatprep.subr.mxu1 %v682_v56  ;;  %5590 = vmatpush3.msra.mxu0 %v586_v55  ;;  %v6921_v55 = vld [vmem:[#allocation6 + $0xe8] sm:$0xff] }
  0xa9   : > { %5625 = vmatpush3.msra.mxu1 %v682_v56  ;;  %5591 = vmatprep.subr.mxu0 %v585_v57  ;;  %v7550_v56 = vld [vmem:[#allocation6 + $0x340] sm:$0xff] }
  0xaa   : > { %5626 = vmatprep.subr.mxu1 %v681_v58  ;;  %5592 = vmatpush3.msra.mxu0 %v585_v57  ;;  %v6922_v57 = vld [vmem:[#allocation6 + $0xe0] sm:$0xff] }
  0xab   : > { %5627 = vmatpush3.msra.mxu1 %v681_v58  ;;  %5593 = vmatprep.subr.mxu0 %v584_v59  ;;  %v7554_v58 = vld [vmem:[#allocation6 + $0x338] sm:$0xff] }
  0xac   : > { %5628 = vmatprep.subr.mxu1 %v680_v60  ;;  %5594 = vmatpush3.msra.mxu0 %v584_v59  ;;  %v6923_v59 = vld [vmem:[#allocation6 + $0xd8] sm:$0xff] }
  0xad   : > { %5629 = vmatpush3.msra.mxu1 %v680_v60  ;;  %5595 = vmatprep.subr.mxu0 %v583_v61  ;;  %v7558_v60 = vld [vmem:[#allocation6 + $0x330] sm:$0xff] }
  0xae   : > { %5630 = vmatprep.subr.mxu1 %v679_v62  ;;  %5596 = vmatpush3.msra.mxu0 %v583_v61  ;;  %v6924_v61 = vld [vmem:[#allocation6 + $0xd0] sm:$0xff] }
  0xaf   : > { %5631 = vmatpush3.msra.mxu1 %v679_v62  ;;  %5597 = vmatprep.subr.mxu0 %v582_v63  ;;  %v7562_v62 = vld [vmem:[#allocation6 + $0x328] sm:$0xff] }
  0xb0   : > { %5632 = vmatprep.subr.mxu1 %v678_v0  ;;  %5598 = vmatpush3.msra.mxu0 %v582_v63  ;;  %v6925_v63 = vld [vmem:[#allocation6 + $0xc8] sm:$0xff] }
  0xb1   : > { %5633 = vmatpush3.msra.mxu1 %v678_v0  ;;  %5599 = vmatprep.subr.mxu0 %v581_v1  ;;  %v7566_v0 = vld [vmem:[#allocation6 + $0x320] sm:$0xff] }
  0xb2   : > { %5634 = vmatprep.subr.mxu1 %v677_v2  ;;  %5600 = vmatpush3.msra.mxu0 %v581_v1  ;;  %v6926_v1 = vld [vmem:[#allocation6 + $0xc0] sm:$0xff] }
  0xb3   : > { %5635 = vmatpush3.msra.mxu1 %v677_v2  ;;  %5601 = vmatprep.subr.mxu0 %v580_v3  ;;  %v7570_v2 = vld [vmem:[#allocation6 + $0x318] sm:$0xff] }
  0xb4   : > { %5636 = vmatprep.subr.mxu1 %v676_v4  ;;  %5602 = vmatpush3.msra.mxu0 %v580_v3  ;;  %v6927_v3 = vld [vmem:[#allocation6 + $0xb8] sm:$0xff] }
  0xb5   : > { %5605 = vmatprep.mubr.f32.mxu0 %v576_v5  ;;  %5603 = vmatprep.subr.mxu0 %v579_v6  ;;  %v6928_v5 = vld [vmem:[#allocation6 + $0xb0] sm:$0xff] }
  0xb6   : > { %5637 = vmatpush3.msra.mxu1 %v676_v4  ;;  %5604 = vmatpush3.msra.mxu0 %v579_v6  ;;  %v7574_v4 = vld [vmem:[#allocation6 + $0x310] sm:$0xff]  ;;  %v7578_v6 = vld [vmem:[#allocation6 + $0x308] sm:$0xff] }
  0xb7   : > { %5638 = vmatprep.subr.mxu1 %v675_v7  ;;  %5606 = vmatmul.mubr.f32.vlgmr.msra.gmra.mxu0 %v577_v8  ;;  %v7582_v8 = vld [vmem:[#allocation6 + $0x300] sm:$0xff] }
  0xb8   : > { %5643 = vmatprep.subr.mxu0 %v786_v9  ;;  %5639 = vmatpush3.msra.mxu1 %v675_v7  ;;  %v6929_v7 = vld [vmem:[#allocation6 + $0xa8] sm:$0xff] }
  0xb9   : > { %5640 = vmatprep.mubr.f32.mxu1 %v7445_v15  ;;  %5644 = vmatpush3.msra.mxu0 %v786_v9  ;;  %v780_v15 = vld [vmem:[#allocation6 + $0x248] sm:$0xff]  ;;  %v6930_v9 = vld [vmem:[#allocation6 + $0xa0] sm:$0xff] }
  0xba   : > { %5641 = vmatmul.mubr.f32.vlgmr.msra.gmra.mxu1 %v7449_v16  ;;  %5645 = vmatprep.subr.mxu0 %v785_v10  ;;  %v877_v16 = vld [vmem:[#allocation6 + $0x2d0] sm:$0xff] }
  0xbb   : > { %5678 = vmatprep.subr.mxu1 %v882_v11  ;;  %5646 = vmatpush3.msra.mxu0 %v785_v10  ;;  %v961_v10 = vld [vmem:[#allocation2 + $0x13] sm:$0xff] }
  0xbc   : > { %5679 = vmatpush3.msra.mxu1 %v882_v11  ;;  %5647 = vmatprep.subr.mxu0 %v784_v12  ;;  %v6931_v11 = vld [vmem:[#allocation6 + $0x98] sm:$0xff] }
  0xbd   : > { %5680 = vmatprep.subr.mxu1 %v881_v13  ;;  %5648 = vmatpush3.msra.mxu0 %v784_v12  ;;  %v6932_v12 = vld [vmem:[#allocation6 + $0x90] sm:$0xff] }
  0xbe   : > { %5681 = vmatpush3.msra.mxu1 %v881_v13  ;;  %5649 = vmatprep.subr.mxu0 %v783_v14  ;;  %v6933_v13 = vld [vmem:[#allocation6 + $0x88] sm:$0xff] }
  0xbf   : > { %5682 = vmatprep.subr.mxu1 %v880_v17  ;;  %5650 = vmatpush3.msra.mxu0 %v783_v14  ;;  %v6934_v14 = vld [vmem:[#allocation6 + $0x78] sm:$0xff] }
  0xc0   : > { %5683 = vmatpush3.msra.mxu1 %v880_v17  ;;  %5651 = vmatprep.subr.mxu0 %v782_v18  ;;  %v6935_v17 = vld [vmem:[#allocation6 + $0x70] sm:$0xff] }
  0xc1   : > { %5684 = vmatprep.subr.mxu1 %v879_v19  ;;  %5652 = vmatpush3.msra.mxu0 %v782_v18  ;;  %v6936_v18 = vld [vmem:[#allocation6 + $0x80] sm:$0xff] }
  0xc2   : > { %5685 = vmatpush3.msra.mxu1 %v879_v19  ;;  %5653 = vmatprep.subr.mxu0 %v781_v20  ;;  %v6937_v19 = vld [vmem:[#allocation6 + $0x68] sm:$0xff] }
  0xc3   : > { %5686 = vmatprep.subr.mxu1 %v878_v21  ;;  %5654 = vmatpush3.msra.mxu0 %v781_v20  ;;  %v7590_v20 = vld [vmem:[#allocation6 + $0x178] sm:$0xff] }
  0xc4   : > { %5687 = vmatpush3.msra.mxu1 %v878_v21  ;;  %5655 = vmatprep.subr.mxu0 %v780_v15  ;;  %v6939_v21 = vld [vmem:[#allocation6 + $0x60] sm:$0xff] }
  0xc5   : > { %5688 = vmatprep.subr.mxu1 %v877_v16  ;;  %5656 = vmatpush3.msra.mxu0 %v780_v15  ;;  %v6940_v15 = vld [vmem:[#allocation6 + $0x58] sm:$0xff] }
  0xc6   : > { %5689 = vmatpush3.msra.mxu1 %v877_v16  ;;  %5657 = vmatprep.subr.mxu0 %v779_v22  ;;  %v6941_v16 = vld [vmem:[#allocation6 + $0x50] sm:$0xff] }
  0xc7   : > { %5690 = vmatprep.subr.mxu1 %v7454_v23  ;;  %5658 = vmatpush3.msra.mxu0 %v779_v22  ;;  %v6942_v22 = vld [vmem:[#allocation6 + $0x48] sm:$0xff] }
  0xc8   : > { %5691 = vmatpush3.msra.mxu1 %v7454_v23  ;;  %5659 = vmatprep.subr.mxu0 %v7456_v24 }
  0xc9   : > { %5692 = vmatprep.subr.mxu1 %v7458_v25  ;;  %5660 = vmatpush3.msra.mxu0 %v7456_v24 }
  0xca   : > { %5693 = vmatpush3.msra.mxu1 %v7458_v25  ;;  %5661 = vmatprep.subr.mxu0 %v7460_v26 }
  0xcb   : > { %5694 = vmatprep.subr.mxu1 %v7462_v27  ;;  %5662 = vmatpush3.msra.mxu0 %v7460_v26 }
  0xcc   : > { %5695 = vmatpush3.msra.mxu1 %v7462_v27  ;;  %5663 = vmatprep.subr.mxu0 %v7466_v28 }
  0xcd   : > { %5696 = vmatprep.subr.mxu1 %v7468_v29  ;;  %5664 = vmatpush3.msra.mxu0 %v7466_v28 }
  0xce   : > { %5697 = vmatpush3.msra.mxu1 %v7468_v29  ;;  %5665 = vmatprep.subr.mxu0 %v7474_v30 }
  0xcf   : > { %5698 = vmatprep.subr.mxu1 %v7476_v31  ;;  %5666 = vmatpush3.msra.mxu0 %v7474_v30 }
  0xd0   : > { %5699 = vmatpush3.msra.mxu1 %v7476_v31  ;;  %5667 = vmatprep.subr.mxu0 %v7482_v32 }
  0xd1   : > { %5700 = vmatprep.subr.mxu1 %v7484_v33  ;;  %5668 = vmatpush3.msra.mxu0 %v7482_v32 }
  0xd2   : > { %5701 = vmatpush3.msra.mxu1 %v7484_v33  ;;  %5669 = vmatprep.subr.mxu0 %v7490_v34 }
  0xd3   : > { %5702 = vmatprep.subr.mxu1 %v7492_v35  ;;  %5670 = vmatpush3.msra.mxu0 %v7490_v34 }
  0xd4   : > { %5703 = vmatpush3.msra.mxu1 %v7492_v35  ;;  %5671 = vmatprep.subr.mxu0 %v7498_v36 }
  0xd5   : > { %5704 = vmatprep.subr.mxu1 %v7500_v37  ;;  %5672 = vmatpush3.msra.mxu0 %v7498_v36 }
  0xd6   : > { %5705 = vmatpush3.msra.mxu1 %v7500_v37  ;;  %5673 = vmatprep.subr.mxu0 %v7506_v38 }
  0xd7   : > { %5706 = vmatprep.subr.mxu1 %v7508_v39  ;;  %5674 = vmatpush3.msra.mxu0 %v7506_v38 }
  0xd8   : > { %5675 = vmatprep.mubr.f32.mxu0 %v768_v40  ;;  %5707 = vmatpush3.msra.mxu1 %v7508_v39  ;;  %v6943_v40 = vld [vmem:[#allocation6 + $0x40] sm:$0xff] }
  0xd9   : > { %5676 = vmatmul.mubr.f32.vlgmr.msra.gmra.mxu0 %v769_v41  ;;  %5708 = vmatprep.subr.mxu1 %v7516_v42  ;;  %v6944_v41 = vld [vmem:[#allocation6 + $0x38] sm:$0xff] }
  0xda   : > { %5713 = vmatprep.subr.mxu0 %v7518_v43  ;;  %5709 = vmatpush3.msra.mxu1 %v7516_v42 }
  0xdb   : > { %5710 = vmatprep.mubr.f32.mxu1 %v864_v44  ;;  %5714 = vmatpush3.msra.mxu0 %v7518_v43  ;;  %v6945_v44 = vld [vmem:[#allocation6 + $0x30] sm:$0xff] }
  0xdc   : > { %5711 = vmatmul.mubr.f32.vlgmr.msra.gmra.mxu1 %v865_v45  ;;  %5715 = vmatprep.subr.mxu0 %v7525_v46  ;;  %v6946_v45 = vld [vmem:[#allocation6 + $0x28] sm:$0xff] }
  0xdd   : > { %5745 = vmatprep.mubr.f32.mxu0 %v960_v47  ;;  %5716 = vmatpush3.msra.mxu0 %v7525_v46  ;;  %v6947_v47 = vld [vmem:[#allocation6 + $0x20] sm:$0xff] }
  0xde   : > { %5748 = vmatprep.subr.mxu1 %v6919_v51  ;;  %5717 = vmatprep.subr.mxu0 %v7530_v48 }
  0xdf   : > { %5749 = vmatpush3.msra.mxu1 %v6919_v51  ;;  %5718 = vmatpush3.msra.mxu0 %v7530_v48  ;;  %v6948_v51 = vld [vmem:[#allocation6 + $0x18] sm:$0xff] }
  0xe0   : > { %5750 = vmatprep.subr.mxu1 %v6920_v53  ;;  %5719 = vmatprep.subr.mxu0 %v7534_v49 }
  0xe1   : > { %5751 = vmatpush3.msra.mxu1 %v6920_v53  ;;  %5720 = vmatpush3.msra.mxu0 %v7534_v49  ;;  %v6949_v53 = vld [vmem:[#allocation6 + $0x10] sm:$0xff] }
  0xe2   : > { %5752 = vmatprep.subr.mxu1 %v6921_v55  ;;  %5721 = vmatprep.subr.mxu0 %v7538_v50 }
  0xe3   : > { %5753 = vmatpush3.msra.mxu1 %v6921_v55  ;;  %5722 = vmatpush3.msra.mxu0 %v7538_v50  ;;  %v6950_v55 = vld [vmem:[#allocation6 + $0x8] sm:$0xff] }
  0xe4   : > { %5754 = vmatprep.subr.mxu1 %v6922_v57  ;;  %5723 = vmatprep.subr.mxu0 %v7542_v52 }
  0xe5   : > { %5755 = vmatpush3.msra.mxu1 %v6922_v57  ;;  %5724 = vmatpush3.msra.mxu0 %v7542_v52  ;;  %v6951_v57 = vld [vmem:[#allocation6] sm:$0xff] }
  0xe6   : > { %5756 = vmatprep.subr.mxu1 %v6923_v59  ;;  %5725 = vmatprep.subr.mxu0 %v7546_v54 }
  0xe7   : > { %5757 = vmatpush3.msra.mxu1 %v6923_v59  ;;  %5726 = vmatpush3.msra.mxu0 %v7546_v54  ;;  %v6952_v59 = vld [vmem:[#allocation6 + $0x1f8] sm:$0xff] }
  0xe8   : > { %5758 = vmatprep.subr.mxu1 %v6924_v61  ;;  %5727 = vmatprep.subr.mxu0 %v7550_v56 }
  0xe9   : > { %5759 = vmatpush3.msra.mxu1 %v6924_v61  ;;  %5728 = vmatpush3.msra.mxu0 %v7550_v56 }
  0xea   : > { %5760 = vmatprep.subr.mxu1 %v6925_v63  ;;  %5729 = vmatprep.subr.mxu0 %v7554_v58 }
  0xeb   : > { %5761 = vmatpush3.msra.mxu1 %v6925_v63  ;;  %5730 = vmatpush3.msra.mxu0 %v7554_v58 }
  0xec   : > { %5762 = vmatprep.subr.mxu1 %v6926_v1  ;;  %5731 = vmatprep.subr.mxu0 %v7558_v60 }
  0xed   : > { %5763 = vmatpush3.msra.mxu1 %v6926_v1  ;;  %5732 = vmatpush3.msra.mxu0 %v7558_v60 }
  0xee   : > { %5764 = vmatprep.subr.mxu1 %v6927_v3  ;;  %5733 = vmatprep.subr.mxu0 %v7562_v62 }
  0xef   : > { %5765 = vmatpush3.msra.mxu1 %v6927_v3  ;;  %5734 = vmatpush3.msra.mxu0 %v7562_v62 }
  0xf0   : > { %5766 = vmatprep.subr.mxu1 %v6928_v5  ;;  %5735 = vmatprep.subr.mxu0 %v7566_v0 }
  0xf1   : > { %5767 = vmatpush3.msra.mxu1 %v6928_v5  ;;  %5736 = vmatpush3.msra.mxu0 %v7566_v0 }
  0xf2   : > { %5768 = vmatprep.subr.mxu1 %v6929_v7  ;;  %5737 = vmatprep.subr.mxu0 %v7570_v2 }
  0xf3   : > { %5769 = vmatpush3.msra.mxu1 %v6929_v7  ;;  %5738 = vmatpush3.msra.mxu0 %v7570_v2 }
  0xf4   : > { %5770 = vmatprep.subr.mxu1 %v6930_v9  ;;  %5739 = vmatprep.subr.mxu0 %v7574_v4 }
  0xf5   : > { %5771 = vmatpush3.msra.mxu1 %v6930_v9  ;;  %5740 = vmatpush3.msra.mxu0 %v7574_v4 }
  0xf6   : > { %5772 = vmatprep.subr.mxu1 %v6931_v11  ;;  %5741 = vmatprep.subr.mxu0 %v7578_v6 }
  0xf7   : > { %5773 = vmatpush3.msra.mxu1 %v6931_v11  ;;  %5742 = vmatpush3.msra.mxu0 %v7578_v6 }
  0xf8   : > { %5774 = vmatprep.subr.mxu1 %v6932_v12  ;;  %5743 = vmatprep.subr.mxu0 %v7582_v8 }
  0xf9   : > { %5775 = vmatpush3.msra.mxu1 %v6932_v12  ;;  %5744 = vmatpush3.msra.mxu0 %v7582_v8 }
  0xfa   : > { %5776 = vmatprep.subr.mxu1 %v6933_v13  ;;  %5746 = vmatmul.mubr.f32.vlgmr.msra.gmra.mxu0 %v961_v10 }
  0xfb   : > { %5783 = vmatprep.subr.mxu0 %v6934_v14  ;;  %5777 = vmatpush3.msra.mxu1 %v6933_v13 }
  0xfc   : > { %5784 = vmatpush3.msra.mxu0 %v6934_v14  ;;  %5778 = vmatprep.subr.mxu1 %v6936_v18 }
  0xfd   : > { %5785 = vmatprep.subr.mxu0 %v6935_v17  ;;  %5779 = vmatpush3.msra.mxu1 %v6936_v18 }
  0xfe   : > { %5786 = vmatpush3.msra.mxu0 %v6935_v17  ;;  %5818 = vmatprep.subr.mxu1 %v7590_v20 }
  0xff   : > { %5787 = vmatprep.subr.mxu0 %v6937_v19 }
 0x100   : > { %5788 = vmatpush3.msra.mxu0 %v6937_v19 }
 0x101   : > { %5789 = vmatprep.subr.mxu0 %v6939_v21 }
 0x102   : > { %5790 = vmatpush3.msra.mxu0 %v6939_v21 }
 0x103   : > { %5791 = vmatprep.subr.mxu0 %v6940_v15 }
 0x104   : > { %5792 = vmatpush3.msra.mxu0 %v6940_v15 }
 0x105   : > { %5793 = vmatprep.subr.mxu0 %v6941_v16 }
 0x106   : > { %5794 = vmatpush3.msra.mxu0 %v6941_v16 }
 0x107   : > { %5795 = vmatprep.subr.mxu0 %v6942_v22 }
 0x108   : > { %5796 = vmatpush3.msra.mxu0 %v6942_v22 }
 0x109   : > { %5797 = vmatprep.subr.mxu0 %v6943_v40 }
 0x10a   : > { %5798 = vmatpush3.msra.mxu0 %v6943_v40 }
 0x10b   : > { %5799 = vmatprep.subr.mxu0 %v6944_v41 }
 0x10c   : > { %5800 = vmatpush3.msra.mxu0 %v6944_v41 }
 0x10d   : > { %5801 = vmatprep.subr.mxu0 %v6945_v44 }
 0x10e   : > { %5802 = vmatpush3.msra.mxu0 %v6945_v44 }
 0x10f   : > { %5803 = vmatprep.subr.mxu0 %v6946_v45 }
 0x110   : > { %5804 = vmatpush3.msra.mxu0 %v6946_v45 }
 0x111   : > { %5805 = vmatprep.subr.mxu0 %v6947_v47 }
 0x112   : > { %5806 = vmatpush3.msra.mxu0 %v6947_v47 }
 0x113   : > { %5807 = vmatprep.subr.mxu0 %v6948_v51 }
 0x114   : > { %5808 = vmatpush3.msra.mxu0 %v6948_v51 }
 0x115   : > { %5809 = vmatprep.subr.mxu0 %v6949_v53 }
 0x116   : > { %5810 = vmatpush3.msra.mxu0 %v6949_v53  ;;  %v7593_v53 = vld [vmem:[#allocation2 + $0x10] sm:$0xff] }
 0x117   : > { %5811 = vmatprep.subr.mxu0 %v6950_v55 }
 0x118   : > { %5812 = vmatpush3.msra.mxu0 %v6950_v55 }
 0x119   : > { %5813 = vmatprep.subr.mxu0 %v6951_v57 }
 0x11a   : > { %5814 = vmatpush3.msra.mxu0 %v6951_v57 }
 0x11b   : > { %5853 = vmatprep.subr.mxu0 %v6952_v59 }
 0x156   : > { %v5537_v61 = vpop.f32.mrf.mxu0 }
 0x157   : > { %v5572_v63 = vpop.f32.mrf.mxu1 }
 0x158   : > { %v492_v1 = vpop.f32.mrf.mxu0  ;;  %v573_v7 = vadd.f32 %v5572_v63, %v5537_v61  ;;  %v7599_v61 = vld [vmem:[#allocation2 + $0x8] sm:$0xff] }
 0x159   : > { %v567_v5 = vpop.f32.mrf.mxu1 }
 0x15a   : > { %v568_v11 = vadd.f32 %v567_v5, %v492_v1 }
 0x177   : > { %v5607_v3 = vpop.f32.mrf.mxu0 }
 0x178   : > { %v671_v12 = vadd.f32 %v5607_v3, %v573_v7 }
 0x179   : > { %v661_v9 = vpop.f32.mrf.mxu0 }
 0x17a   : > { %v5642_v10 = vpop.f32.mrf.mxu1  ;;  %v670_v14 = vadd.f32 %v661_v9, %v568_v11  ;;  %v6956_v11 = vld [vmem:[#allocation6 + $0x1f0] sm:$0xff] }
 0x17b   : > { %v767_v18 = vadd.f32 %v5642_v10, %v671_v12  ;;  %v6955_v10 = vld [vmem:[#allocation6 + $0x170] sm:$0xff]  ;;  %v6957_v12 = vld [vmem:[#allocation6 + $0x168] sm:$0xff] }
 0x17c   : > { %v757_v17 = vpop.f32.mrf.mxu1 }
 0x17d   : > { %v766_v15 = vadd.f32 %v757_v17, %v670_v14  ;;  %v6959_v14 = vld [vmem:[#allocation6 + $0x160] sm:$0xff] }
 0x17e   : > { %v6960_v17 = vld [vmem:[#allocation6 + $0x1e0] sm:$0xff] }
 0x199   : > { %v5677_v13 = vpop.f32.mrf.mxu0 }
 0x19a   : > { %v863_v16 = vadd.f32 %v5677_v13, %v767_v18  ;;  %v6958_v13 = vld [vmem:[#allocation6 + $0x1e8] sm:$0xff]  ;;  %v6963_v18 = vld [vmem:[#allocation6 + $0x150] sm:$0xff] }
 0x19b   : > { %v853_v19 = vpop.f32.mrf.mxu0 }
 0x19c   : > { %v5712_v21 = vpop.f32.mrf.mxu1  ;;  %v862_v22 = vadd.f32 %v853_v19, %v766_v15  ;;  %v6964_v19 = vld [vmem:[#allocation6 + $0x1d0] sm:$0xff]  ;;  %v6966_v15 = vld [vmem:[#allocation6 + $0x1c8] sm:$0xff] }
 0x19d   : > { %v959_v41 = vadd.f32 %v5712_v21, %v863_v16  ;;  %v6965_v21 = vld [vmem:[#allocation6 + $0x148] sm:$0xff]  ;;  %v6967_v16 = vld [vmem:[#allocation6 + $0x140] sm:$0xff] }
 0x19e   : > { %v949_v40 = vpop.f32.mrf.mxu1 }
 0x19f   : > { %v958_v45 = vadd.f32 %v949_v40, %v862_v22  ;;  %v6968_v22 = vld [vmem:[#allocation6 + $0x1c0] sm:$0xff]  ;;  %v6969_v40 = vld [vmem:[#allocation6 + $0x138] sm:$0xff] }
 0x1ba   : > { %v5747_v44 = vpop.f32.mrf.mxu0 }
 0x1bb   : > { %v1055_v47 = vadd.f32 %v5747_v44, %v959_v41  ;;  %v6970_v41 = vld [vmem:[#allocation6 + $0x1b8] sm:$0xff]  ;;  %v6971_v44 = vld [vmem:[#allocation6 + $0x130] sm:$0xff] }
 0x1bc   : > { %v1045_v51 = vpop.f32.mrf.mxu0 }
 0x1bd   : > { %v7596_v55 = vadd.f32 %v7593_v53, %v1055_v47  ;;  %v1054_v57 = vadd.f32 %v1045_v51, %v958_v45  ;;  %v6972_v45 = vld [vmem:[#allocation6 + $0x1b0] sm:$0xff]  ;;  %v6973_v47 = vld [vmem:[#allocation6 + $0x128] sm:$0xff] }
 0x1be   : > { %v6974_v51 = vld [vmem:[#allocation6 + $0x1a8] sm:$0xff] }
 0x1bf   : > { %1059 = vst [vmem:[#allocation2 + $0x10] sm:$0xff] %v7596_v55  ;;  %v1056_v63 = vadd.f32 %v7599_v61, %v1054_v57  ;;  %v6975_v57 = vld [vmem:[#allocation6 + $0x120] sm:$0xff] }
 0x1c1   : > { %1058 = vst [vmem:[#allocation2 + $0x8] sm:$0xff] %v1056_v63 }
 0x1c8   : > { %v1078_v1 = vld [vmem:[#allocation2 + $0x6] sm:$0xff]  ;;  %v1079_v5 = vld [vmem:[#allocation2 + $0xe] sm:$0xff] }
 0x1c9   : > { %v1060_v3 = vld [vmem:[#allocation2 + $0x5] sm:$0xff]  ;;  %5780 = vmatprep.mubr.f32.mxu1 %v1078_v1  ;;  %v1061_v7 = vld [vmem:[#allocation2 + $0xd] sm:$0xff]  ;;  %v6977_v1 = vld [vmem:[#allocation6 + $0x118] sm:$0xff] }
 0x1ca   : > { %5815 = vmatprep.mubr.f32.mxu0 %v1060_v3  ;;  %5781 = vmatmul.mubr.f32.vlgmr.msra.gmra.mxu1 %v1079_v5  ;;  %v1246_v9 = vld [vmem:[#allocation2 + $0x7] sm:$0xff]  ;;  %v6978_v3 = vld [vmem:[#allocation6 + $0x198] sm:$0xff]  ;;  %v6979_v5 = vld [vmem:[#allocation6 + $0x110] sm:$0xff] }
 0x1cb   : > { %5816 = vmatmul.mubr.f32.vlgmr.msra.gmra.mxu0 %v1061_v7  ;;  %5819 = vmatpush3.msra.mxu1 %v7590_v20  ;;  %v6961_v20 = vld [vmem:[#allocation6 + $0x158] sm:$0xff]  ;;  %v6980_v7 = vld [vmem:[#allocation6 + $0x190] sm:$0xff] }
 0x1cc   : > { %5854 = vmatpush3.msra.mxu0 %v6952_v59  ;;  %5820 = vmatprep.subr.mxu1 %v6955_v10  ;;  %v6962_v59 = vld [vmem:[#allocation6 + $0x1d8] sm:$0xff] }
 0x1cd   : > { %5850 = vmatprep.mubr.f32.mxu1 %v1246_v9  ;;  %5855 = vmatprep.subr.mxu0 %v6956_v11  ;;  %v6981_v9 = vld [vmem:[#allocation6 + $0x108] sm:$0xff] }
 0x1ce   : > { %5885 = vmatprep.mubr.f32.mxu0 %v1056_v63  ;;  %5821 = vmatpush3.msra.mxu1 %v6955_v10  ;;  %v6976_v63 = vld [vmem:[#allocation6 + $0x1a0] sm:$0xff]  ;;  %v6982_v10 = vld [vmem:[#allocation6 + $0x188] sm:$0xff] }
 0x1cf   : > { %5856 = vmatpush3.msra.mxu0 %v6956_v11  ;;  %5822 = vmatprep.subr.mxu1 %v6957_v12  ;;  %v6983_v11 = vld [vmem:[#allocation6 + $0x100] sm:$0xff] }
 0x1d0   : > { %5857 = vmatprep.subr.mxu0 %v6958_v13  ;;  %5823 = vmatpush3.msra.mxu1 %v6957_v12  ;;  %v6984_v12 = vld [vmem:[#allocation6 + $0x180] sm:$0xff] }
 0x1d1   : > { %5858 = vmatpush3.msra.mxu0 %v6958_v13  ;;  %5824 = vmatprep.subr.mxu1 %v6959_v14  ;;  %v1247_v13 = vld [vmem:[#allocation2 + $0xf] sm:$0xff] }
 0x1d2   : > { %5859 = vmatprep.subr.mxu0 %v6960_v17  ;;  %5825 = vmatpush3.msra.mxu1 %v6959_v14  ;;  %v6985_v14 = vld [vmem:[#allocation6 + $0x278] sm:$0xff] }
 0x1d3   : > { %5860 = vmatpush3.msra.mxu0 %v6960_v17  ;;  %5826 = vmatprep.subr.mxu1 %v6961_v20  ;;  %v6986_v17 = vld [vmem:[#allocation6 + $0x2f8] sm:$0xff] }
 0x1d4   : > { %5861 = vmatprep.subr.mxu0 %v6962_v59  ;;  %5827 = vmatpush3.msra.mxu1 %v6961_v20  ;;  %v1436_v20 = vld [vmem:[#allocation2 + $0x9] sm:$0xff] }
 0x1d5   : > { %5862 = vmatpush3.msra.mxu0 %v6962_v59  ;;  %5828 = vmatprep.subr.mxu1 %v6963_v18  ;;  %v1531_v59 = vld [vmem:[#allocation2 + $0xa] sm:$0xff] }
 0x1d6   : > { %5863 = vmatprep.subr.mxu0 %v6964_v19  ;;  %5829 = vmatpush3.msra.mxu1 %v6963_v18  ;;  %v6987_v18 = vld [vmem:[#allocation6 + $0x270] sm:$0xff] }
 0x1d7   : > { %5864 = vmatpush3.msra.mxu0 %v6964_v19  ;;  %5830 = vmatprep.subr.mxu1 %v6965_v21  ;;  %v6988_v19 = vld [vmem:[#allocation6 + $0x2f0] sm:$0xff] }
 0x1d8   : > { %5865 = vmatprep.subr.mxu0 %v6966_v15  ;;  %5831 = vmatpush3.msra.mxu1 %v6965_v21  ;;  %v6989_v21 = vld [vmem:[#allocation6 + $0x268] sm:$0xff] }
 0x1d9   : > { %5866 = vmatpush3.msra.mxu0 %v6966_v15  ;;  %5832 = vmatprep.subr.mxu1 %v6967_v16  ;;  %v6990_v15 = vld [vmem:[#allocation6 + $0x2e8] sm:$0xff] }
 0x1da   : > { %5867 = vmatprep.subr.mxu0 %v6968_v22  ;;  %5833 = vmatpush3.msra.mxu1 %v6967_v16  ;;  %v6992_v16 = vld [vmem:[#allocation6 + $0x2e0] sm:$0xff] }
 0x1db   : > { %5868 = vmatpush3.msra.mxu0 %v6968_v22  ;;  %5834 = vmatprep.subr.mxu1 %v6969_v40  ;;  %v6993_v22 = vld [vmem:[#allocation6 + $0x258] sm:$0xff] }
 0x1dc   : > { %5869 = vmatprep.subr.mxu0 %v6970_v41  ;;  %5835 = vmatpush3.msra.mxu1 %v6969_v40  ;;  %v6994_v40 = vld [vmem:[#allocation6 + $0x2d8] sm:$0xff] }
 0x1dd   : > { %5870 = vmatpush3.msra.mxu0 %v6970_v41  ;;  %5836 = vmatprep.subr.mxu1 %v6971_v44  ;;  %v6995_v41 = vld [vmem:[#allocation6 + $0x250] sm:$0xff] }
 0x1de   : > { %5871 = vmatprep.subr.mxu0 %v6972_v45  ;;  %5837 = vmatpush3.msra.mxu1 %v6971_v44  ;;  %v6996_v44 = vld [vmem:[#allocation6 + $0x2d0] sm:$0xff] }
 0x1df   : > { %5872 = vmatpush3.msra.mxu0 %v6972_v45  ;;  %5838 = vmatprep.subr.mxu1 %v6973_v47  ;;  %v6997_v45 = vld [vmem:[#allocation6 + $0x248] sm:$0xff] }
 0x1e0   : > { %5873 = vmatprep.subr.mxu0 %v6974_v51  ;;  %5839 = vmatpush3.msra.mxu1 %v6973_v47  ;;  %v6998_v47 = vld [vmem:[#allocation6 + $0x240] sm:$0xff] }
 0x1e1   : > { %5874 = vmatpush3.msra.mxu0 %v6974_v51  ;;  %5840 = vmatprep.subr.mxu1 %v6975_v57  ;;  %v1745_v51 = vld [vmem:[#allocation6 + $0x80] sm:$0xff] }
 0x1e2   : > { %5875 = vmatprep.subr.mxu0 %v6976_v63  ;;  %5841 = vmatpush3.msra.mxu1 %v6975_v57  ;;  %v1727_v57 = vld [vmem:[#allocation6] sm:$0xff] }
 0x1e3   : > { %5876 = vmatpush3.msra.mxu0 %v6976_v63  ;;  %5842 = vmatprep.subr.mxu1 %v6977_v1  ;;  %v1928_v63 = vld [vmem:[#allocation6 + $0x178] sm:$0xff] }
 0x1e4   : > { %5877 = vmatprep.subr.mxu0 %v6978_v3  ;;  %5843 = vmatpush3.msra.mxu1 %v6977_v1  ;;  %v2023_v1 = vld [vmem:[#allocation6 + $0x1f8] sm:$0xff] }
 0x1e5   : > { %5878 = vmatpush3.msra.mxu0 %v6978_v3  ;;  %5844 = vmatprep.subr.mxu1 %v6979_v5 }
 0x1e6   : > { %5879 = vmatprep.subr.mxu0 %v6980_v7  ;;  %5845 = vmatpush3.msra.mxu1 %v6979_v5 }
 0x1e7   : > { %5880 = vmatpush3.msra.mxu0 %v6980_v7  ;;  %5846 = vmatprep.subr.mxu1 %v6981_v9 }
 0x1e8   : > { %5881 = vmatprep.subr.mxu0 %v6982_v10  ;;  %5847 = vmatpush3.msra.mxu1 %v6981_v9 }
 0x1e9   : > { %5882 = vmatpush3.msra.mxu0 %v6982_v10  ;;  %5848 = vmatprep.subr.mxu1 %v6983_v11 }
 0x1ea   : > { %5883 = vmatprep.subr.mxu0 %v6984_v12  ;;  %5849 = vmatpush3.msra.mxu1 %v6983_v11 }
 0x1eb   : > { %5884 = vmatpush3.msra.mxu0 %v6984_v12  ;;  %5851 = vmatmul.mubr.f32.vlgmr.msra.gmra.mxu1 %v1247_v13 }
 0x1ec   : > { %5886 = vmatmul.mubr.f32.vlgmr.msra.gmra.mxu0 %v7596_v55  ;;  %5888 = vmatprep.subr.mxu1 %v6985_v14  ;;  %v6991_v55 = vld [vmem:[#allocation6 + $0x260] sm:$0xff] }
 0x1ed   : > { %5923 = vmatprep.subr.mxu0 %v6986_v17  ;;  %5889 = vmatpush3.msra.mxu1 %v6985_v14 }
 0x1ee   : > { %5920 = vmatprep.mubr.f32.mxu1 %v1436_v20  ;;  %5924 = vmatpush3.msra.mxu0 %v6986_v17 }
 0x1ef   : > { %5955 = vmatprep.mubr.f32.mxu0 %v1531_v59  ;;  %5890 = vmatprep.subr.mxu1 %v6987_v18 }
 0x1f0   : > { %5925 = vmatprep.subr.mxu0 %v6988_v19  ;;  %5891 = vmatpush3.msra.mxu1 %v6987_v18 }
 0x1f1   : > { %5926 = vmatpush3.msra.mxu0 %v6988_v19  ;;  %5892 = vmatprep.subr.mxu1 %v6989_v21 }
 0x1f2   : > { %5927 = vmatprep.subr.mxu0 %v6990_v15  ;;  %5893 = vmatpush3.msra.mxu1 %v6989_v21 }
 0x1f3   : > { %5928 = vmatpush3.msra.mxu0 %v6990_v15  ;;  %5894 = vmatprep.subr.mxu1 %v6991_v55 }
 0x1f4   : > { %5929 = vmatprep.subr.mxu0 %v6992_v16  ;;  %5895 = vmatpush3.msra.mxu1 %v6991_v55 }
 0x1f5   : > { %5930 = vmatpush3.msra.mxu0 %v6992_v16  ;;  %5896 = vmatprep.subr.mxu1 %v6993_v22 }
 0x1f6   : > { %5931 = vmatprep.subr.mxu0 %v6994_v40  ;;  %5897 = vmatpush3.msra.mxu1 %v6993_v22 }
 0x1f7   : > { %5932 = vmatpush3.msra.mxu0 %v6994_v40  ;;  %5898 = vmatprep.subr.mxu1 %v6995_v41 }
 0x1f8   : > { %5933 = vmatprep.subr.mxu0 %v6996_v44  ;;  %5899 = vmatpush3.msra.mxu1 %v6995_v41 }
 0x1f9   : > { %5934 = vmatpush3.msra.mxu0 %v6996_v44  ;;  %5900 = vmatprep.subr.mxu1 %v6997_v45 }
 0x1fa   : > { %5935 = vmatprep.subr.mxu0 %v7454_v23  ;;  %5901 = vmatpush3.msra.mxu1 %v6997_v45 }
 0x1fb   : > { %5936 = vmatpush3.msra.mxu0 %v7454_v23  ;;  %5902 = vmatprep.subr.mxu1 %v6998_v47  ;;  %v1437_v23 = vld [vmem:[#allocation2 + $0x11] sm:$0xff] }
 0x1fc   : > { %5937 = vmatprep.subr.mxu0 %v7458_v25  ;;  %5903 = vmatpush3.msra.mxu1 %v6998_v47 }
 0x1fd   : > { %5938 = vmatpush3.msra.mxu0 %v7458_v25  ;;  %5904 = vmatprep.subr.mxu1 %v7456_v24  ;;  %v1626_v25 = vld [vmem:[#allocation2 + $0xb] sm:$0xff] }
 0x1fe   : > { %5939 = vmatprep.subr.mxu0 %v7462_v27  ;;  %5905 = vmatpush3.msra.mxu1 %v7456_v24  ;;  %v1532_v24 = vld [vmem:[#allocation2 + $0x12] sm:$0xff] }
 0x1ff   : > { %5940 = vmatpush3.msra.mxu0 %v7462_v27  ;;  %5906 = vmatprep.subr.mxu1 %v7460_v26  ;;  %v1760_v27 = vld [vmem:[#allocation6 + $0xf8] sm:$0xff] }
 0x200   : > { %5941 = vmatprep.subr.mxu0 %v7468_v29  ;;  %5907 = vmatpush3.msra.mxu1 %v7460_v26  ;;  %v1627_v26 = vld [vmem:[#allocation2 + $0x13] sm:$0xff] }
 0x201   : > { %5942 = vmatpush3.msra.mxu0 %v7468_v29  ;;  %5908 = vmatprep.subr.mxu1 %v7466_v28  ;;  %v1759_v29 = vld [vmem:[#allocation6 + $0xf0] sm:$0xff] }
 0x202   : > { %5943 = vmatprep.subr.mxu0 %v7476_v31  ;;  %5909 = vmatpush3.msra.mxu1 %v7466_v28  ;;  %v1742_v28 = vld [vmem:[#allocation6 + $0x78] sm:$0xff] }
 0x203   : > { %5944 = vmatpush3.msra.mxu0 %v7476_v31  ;;  %5910 = vmatprep.subr.mxu1 %v7474_v30  ;;  %v1758_v31 = vld [vmem:[#allocation6 + $0xe8] sm:$0xff] }
 0x204   : > { %5945 = vmatprep.subr.mxu0 %v7484_v33  ;;  %5911 = vmatpush3.msra.mxu1 %v7474_v30  ;;  %v1741_v30 = vld [vmem:[#allocation6 + $0x70] sm:$0xff] }
 0x205   : > { %5946 = vmatpush3.msra.mxu0 %v7484_v33  ;;  %5912 = vmatprep.subr.mxu1 %v7482_v32  ;;  %v1757_v33 = vld [vmem:[#allocation6 + $0xe0] sm:$0xff] }
 0x206   : > { %5947 = vmatprep.subr.mxu0 %v7492_v35  ;;  %5913 = vmatpush3.msra.mxu1 %v7482_v32  ;;  %v1740_v32 = vld [vmem:[#allocation6 + $0x68] sm:$0xff] }
 0x207   : > { %5948 = vmatpush3.msra.mxu0 %v7492_v35  ;;  %5914 = vmatprep.subr.mxu1 %v7490_v34  ;;  %v1756_v35 = vld [vmem:[#allocation6 + $0xd8] sm:$0xff] }
 0x208   : > { %5949 = vmatprep.subr.mxu0 %v7500_v37  ;;  %5915 = vmatpush3.msra.mxu1 %v7490_v34  ;;  %v1739_v34 = vld [vmem:[#allocation6 + $0x60] sm:$0xff] }
 0x209   : > { %5950 = vmatpush3.msra.mxu0 %v7500_v37  ;;  %5916 = vmatprep.subr.mxu1 %v7498_v36  ;;  %v1755_v37 = vld [vmem:[#allocation6 + $0xd0] sm:$0xff] }
 0x20a   : > { %5951 = vmatprep.subr.mxu0 %v7508_v39  ;;  %5917 = vmatpush3.msra.mxu1 %v7498_v36  ;;  %v1738_v36 = vld [vmem:[#allocation6 + $0x58] sm:$0xff] }
 0x20b   : > { %5952 = vmatpush3.msra.mxu0 %v7508_v39  ;;  %5918 = vmatprep.subr.mxu1 %v7506_v38  ;;  %v1754_v39 = vld [vmem:[#allocation6 + $0xc8] sm:$0xff] }
 0x20c   : > { %5953 = vmatprep.subr.mxu0 %v7516_v42  ;;  %5919 = vmatpush3.msra.mxu1 %v7506_v38  ;;  %v1737_v38 = vld [vmem:[#allocation6 + $0x50] sm:$0xff] }
 0x20d   : > { %5954 = vmatpush3.msra.mxu0 %v7516_v42  ;;  %5921 = vmatmul.mubr.f32.vlgmr.msra.gmra.mxu1 %v1437_v23  ;;  %v1736_v42 = vld [vmem:[#allocation6 + $0x48] sm:$0xff] }
 0x20e   : > { %5956 = vmatmul.mubr.f32.vlgmr.msra.gmra.mxu0 %v1532_v24  ;;  %5958 = vmatprep.subr.mxu1 %v7518_v43 }
 0x20f   : > { %5990 = vmatprep.mubr.f32.mxu1 %v1626_v25  ;;  %5959 = vmatpush3.msra.mxu1 %v7518_v43  ;;  %v1753_v43 = vld [vmem:[#allocation6 + $0xc0] sm:$0xff] }
 0x210   : > { %5960 = vmatprep.subr.mxu1 %v7525_v46  ;;  %5993 = vmatprep.subr.mxu0 %v1760_v27 }
 0x211   : > { %5961 = vmatpush3.msra.mxu1 %v7525_v46  ;;  %5994 = vmatpush3.msra.mxu0 %v1760_v27  ;;  %v1735_v46 = vld [vmem:[#allocation6 + $0x40] sm:$0xff] }
 0x212   : > { %5962 = vmatprep.subr.mxu1 %v7530_v48  ;;  %5995 = vmatprep.subr.mxu0 %v1759_v29 }
 0x213   : > { %5963 = vmatpush3.msra.mxu1 %v7530_v48  ;;  %5996 = vmatpush3.msra.mxu0 %v1759_v29  ;;  %v1752_v48 = vld [vmem:[#allocation6 + $0xb8] sm:$0xff] }
 0x214   : > { %5964 = vmatprep.subr.mxu1 %v7534_v49  ;;  %5997 = vmatprep.subr.mxu0 %v1758_v31 }
 0x215   : > { %5965 = vmatpush3.msra.mxu1 %v7534_v49  ;;  %5998 = vmatpush3.msra.mxu0 %v1758_v31  ;;  %v1734_v49 = vld [vmem:[#allocation6 + $0x38] sm:$0xff]  ;;  %v1927_v31 = vld [vmem:[#allocation6 + $0x170] sm:$0xff] }
 0x216   : > { %5966 = vmatprep.subr.mxu1 %v7538_v50  ;;  %5999 = vmatprep.subr.mxu0 %v1757_v33 }
 0x217   : > { %5967 = vmatpush3.msra.mxu1 %v7538_v50  ;;  %6000 = vmatpush3.msra.mxu0 %v1757_v33  ;;  %v1751_v50 = vld [vmem:[#allocation6 + $0xb0] sm:$0xff] }
 0x218   : > { %5968 = vmatprep.subr.mxu1 %v7542_v52  ;;  %6001 = vmatprep.subr.mxu0 %v1756_v35 }
 0x219   : > { %5969 = vmatpush3.msra.mxu1 %v7542_v52  ;;  %6002 = vmatpush3.msra.mxu0 %v1756_v35  ;;  %v1733_v52 = vld [vmem:[#allocation6 + $0x30] sm:$0xff]  ;;  %v2021_v35 = vld [vmem:[#allocation6 + $0x1e8] sm:$0xff] }
 0x21a   : > { %5970 = vmatprep.subr.mxu1 %v7546_v54  ;;  %6003 = vmatprep.subr.mxu0 %v1755_v37 }
 0x21b   : > { %5971 = vmatpush3.msra.mxu1 %v7546_v54  ;;  %6004 = vmatpush3.msra.mxu0 %v1755_v37  ;;  %v1750_v54 = vld [vmem:[#allocation6 + $0xa8] sm:$0xff]  ;;  %v2020_v37 = vld [vmem:[#allocation6 + $0x1e0] sm:$0xff] }
 0x21c   : > { %5972 = vmatprep.subr.mxu1 %v7550_v56  ;;  %6005 = vmatprep.subr.mxu0 %v1754_v39 }
 0x21d   : > { %5973 = vmatpush3.msra.mxu1 %v7550_v56  ;;  %6006 = vmatpush3.msra.mxu0 %v1754_v39  ;;  %v1732_v56 = vld [vmem:[#allocation6 + $0x28] sm:$0xff]  ;;  %v2019_v39 = vld [vmem:[#allocation6 + $0x1d8] sm:$0xff] }
 0x21e   : > { %5974 = vmatprep.subr.mxu1 %v7554_v58  ;;  %6007 = vmatprep.subr.mxu0 %v1753_v43 }
 0x21f   : > { %5975 = vmatpush3.msra.mxu1 %v7554_v58  ;;  %6008 = vmatpush3.msra.mxu0 %v1753_v43  ;;  %v1749_v58 = vld [vmem:[#allocation6 + $0xa0] sm:$0xff]  ;;  %v2018_v43 = vld [vmem:[#allocation6 + $0x1d0] sm:$0xff] }
 0x220   : > { %5976 = vmatprep.subr.mxu1 %v7558_v60  ;;  %6009 = vmatprep.subr.mxu0 %v1752_v48 }
 0x221   : > { %5977 = vmatpush3.msra.mxu1 %v7558_v60  ;;  %6010 = vmatpush3.msra.mxu0 %v1752_v48  ;;  %v1731_v60 = vld [vmem:[#allocation6 + $0x20] sm:$0xff]  ;;  %v2017_v48 = vld [vmem:[#allocation6 + $0x1c8] sm:$0xff] }
 0x222   : > { %5978 = vmatprep.subr.mxu1 %v7562_v62  ;;  %6011 = vmatprep.subr.mxu0 %v1751_v50 }
 0x223   : > { %5979 = vmatpush3.msra.mxu1 %v7562_v62  ;;  %6012 = vmatpush3.msra.mxu0 %v1751_v50  ;;  %v1748_v62 = vld [vmem:[#allocation6 + $0x98] sm:$0xff]  ;;  %v2016_v50 = vld [vmem:[#allocation6 + $0x1c0] sm:$0xff] }
 0x224   : > { %5980 = vmatprep.subr.mxu1 %v7566_v0  ;;  %6013 = vmatprep.subr.mxu0 %v1750_v54 }
 0x225   : > { %5981 = vmatpush3.msra.mxu1 %v7566_v0  ;;  %6014 = vmatpush3.msra.mxu0 %v1750_v54  ;;  %v1730_v0 = vld [vmem:[#allocation6 + $0x18] sm:$0xff] }
 0x226   : > { %5982 = vmatprep.subr.mxu1 %v7570_v2  ;;  %6015 = vmatprep.subr.mxu0 %v1749_v58  ;;  %v2015_v54 = vld [vmem:[#allocation6 + $0x1b8] sm:$0xff] }
 0x227   : > { %5983 = vmatpush3.msra.mxu1 %v7570_v2  ;;  %6016 = vmatpush3.msra.mxu0 %v1749_v58  ;;  %v1747_v2 = vld [vmem:[#allocation6 + $0x90] sm:$0xff] }
 0x228   : > { %5984 = vmatprep.subr.mxu1 %v7574_v4  ;;  %6017 = vmatprep.subr.mxu0 %v1748_v62  ;;  %v2014_v58 = vld [vmem:[#allocation6 + $0x1b0] sm:$0xff] }
 0x229   : > { %5985 = vmatpush3.msra.mxu1 %v7574_v4  ;;  %v1729_v4 = vld [vmem:[#allocation6 + $0x10] sm:$0xff]  ;;  %6018 = vmatpush3.msra.mxu0 %v1748_v62  ;;  %v2013_v62 = vld [vmem:[#allocation6 + $0x1a8] sm:$0xff] }
 0x22a   : > { %5986 = vmatprep.subr.mxu1 %v7578_v6  ;;  %6019 = vmatprep.subr.mxu0 %v1747_v2 }
 0x22b   : > { %5987 = vmatpush3.msra.mxu1 %v7578_v6  ;;  %v1746_v6 = vld [vmem:[#allocation6 + $0x88] sm:$0xff]  ;;  %6020 = vmatpush3.msra.mxu0 %v1747_v2  ;;  %v2012_v2 = vld [vmem:[#allocation6 + $0x1a0] sm:$0xff] }
 0x22c   : > { %5988 = vmatprep.subr.mxu1 %v7582_v8  ;;  %6021 = vmatprep.subr.mxu0 %v1746_v6 }
 0x22d   : > { %5989 = vmatpush3.msra.mxu1 %v7582_v8  ;;  %v1728_v8 = vld [vmem:[#allocation6 + $0x8] sm:$0xff]  ;;  %6022 = vmatpush3.msra.mxu0 %v1746_v6  ;;  %v2011_v6 = vld [vmem:[#allocation6 + $0x198] sm:$0xff] }
 0x22e   : > { %5991 = vmatmul.mubr.f32.vlgmr.msra.gmra.mxu1 %v1627_v26  ;;  %6028 = vmatprep.subr.mxu1 %v1742_v28 }
 0x22f   : > { %6029 = vmatpush3.msra.mxu1 %v1742_v28  ;;  %6023 = vmatprep.subr.mxu0 %v1745_v51 }
 0x230   : > { %6030 = vmatprep.subr.mxu1 %v1741_v30  ;;  %6024 = vmatpush3.msra.mxu0 %v1745_v51  ;;  %v2010_v51 = vld [vmem:[#allocation6 + $0x190] sm:$0xff] }
 0x231   : > { %6031 = vmatpush3.msra.mxu1 %v1741_v30  ;;  %6063 = vmatprep.subr.mxu0 %v1928_v63 }
 0x232   : > { %6032 = vmatprep.subr.mxu1 %v1740_v32 }
 0x233   : > { %6033 = vmatpush3.msra.mxu1 %v1740_v32  ;;  %v2022_v32 = vld [vmem:[#allocation6 + $0x1f0] sm:$0xff] }
 0x234   : > { %6034 = vmatprep.subr.mxu1 %v1739_v34 }
 0x235   : > { %6035 = vmatpush3.msra.mxu1 %v1739_v34  ;;  %v1926_v34 = vld [vmem:[#allocation6 + $0x168] sm:$0xff] }
 0x236   : > { %6036 = vmatprep.subr.mxu1 %v1738_v36 }
 0x237   : > { %6037 = vmatpush3.msra.mxu1 %v1738_v36  ;;  %v1925_v36 = vld [vmem:[#allocation6 + $0x160] sm:$0xff] }
 0x238   : > { %6038 = vmatprep.subr.mxu1 %v1737_v38 }
 0x239   : > { %6039 = vmatpush3.msra.mxu1 %v1737_v38  ;;  %v1924_v38 = vld [vmem:[#allocation6 + $0x158] sm:$0xff] }
 0x23a   : > { %6040 = vmatprep.subr.mxu1 %v1736_v42 }
 0x23b   : > { %6041 = vmatpush3.msra.mxu1 %v1736_v42  ;;  %v1923_v42 = vld [vmem:[#allocation6 + $0x150] sm:$0xff] }
 0x23c   : > { %6042 = vmatprep.subr.mxu1 %v1735_v46 }
 0x23d   : > { %6043 = vmatpush3.msra.mxu1 %v1735_v46  ;;  %v1922_v46 = vld [vmem:[#allocation6 + $0x148] sm:$0xff] }
 0x23e   : > { %6044 = vmatprep.subr.mxu1 %v1734_v49 }
 0x23f   : > { %6045 = vmatpush3.msra.mxu1 %v1734_v49  ;;  %v1921_v49 = vld [vmem:[#allocation6 + $0x140] sm:$0xff] }
 0x240   : > { %6046 = vmatprep.subr.mxu1 %v1733_v52 }
 0x241   : > { %6047 = vmatpush3.msra.mxu1 %v1733_v52  ;;  %v1920_v52 = vld [vmem:[#allocation6 + $0x138] sm:$0xff] }
 0x242   : > { %6048 = vmatprep.subr.mxu1 %v1732_v56 }
 0x243   : > { %6049 = vmatpush3.msra.mxu1 %v1732_v56  ;;  %v1919_v56 = vld [vmem:[#allocation6 + $0x130] sm:$0xff] }
 0x244   : > { %6050 = vmatprep.subr.mxu1 %v1731_v60 }
 0x245   : > { %6051 = vmatpush3.msra.mxu1 %v1731_v60  ;;  %v1918_v60 = vld [vmem:[#allocation6 + $0x128] sm:$0xff] }
 0x246   : > { %6052 = vmatprep.subr.mxu1 %v1730_v0 }
 0x247   : > { %6053 = vmatpush3.msra.mxu1 %v1730_v0  ;;  %v1917_v0 = vld [vmem:[#allocation6 + $0x120] sm:$0xff] }
 0x248   : > { %6054 = vmatprep.subr.mxu1 %v1729_v4 }
 0x249   : > { %6055 = vmatpush3.msra.mxu1 %v1729_v4  ;;  %v1916_v4 = vld [vmem:[#allocation6 + $0x118] sm:$0xff] }
 0x24a   : > { %6056 = vmatprep.subr.mxu1 %v1728_v8 }
 0x24b   : > { %6057 = vmatpush3.msra.mxu1 %v1728_v8  ;;  %v1915_v8 = vld [vmem:[#allocation6 + $0x110] sm:$0xff] }
 0x24c   : > { %6058 = vmatprep.subr.mxu1 %v1727_v57 }
 0x24d   : > { %6059 = vmatpush3.msra.mxu1 %v1727_v57  ;;  %v1914_v57 = vld [vmem:[#allocation6 + $0x108] sm:$0xff] }
 0x24e   : > { %6098 = vmatprep.subr.mxu1 %v2023_v1 }
 0x28a   : > { %v5782_v3 = vpop.f32.mrf.mxu1 }
 0x28b   : > { %v5817_v5 = vpop.f32.mrf.mxu0 }
 0x28c   : > { %v1162_v7 = vpop.f32.mrf.mxu1  ;;  %v1243_v11 = vadd.f32 %v5817_v5, %v5782_v3  ;;  %v2008_v3 = vld [vmem:[#allocation6 + $0x180] sm:$0xff]  ;;  %v2118_v5 = vld [vmem:[#allocation6 + $0x278] sm:$0xff] }
 0x28d   : > { %v1237_v10 = vpop.f32.mrf.mxu0 }
 0x28e   : > { %v1238_v13 = vadd.f32 %v1237_v10, %v1162_v7  ;;  %v2213_v7 = vld [vmem:[#allocation6 + $0x2f8] sm:$0xff] }
 0x2ab   : > { %v5852_v9 = vpop.f32.mrf.mxu1 }
 0x2ac   : > { %v1340_v14 = vadd.f32 %v5852_v9, %v1243_v11  ;;  %v5887_v17 = vpop.f32.mrf.mxu0  ;;  %v2117_v11 = vld [vmem:[#allocation6 + $0x270] sm:$0xff] }
 0x2ad   : > { %v1330_v12 = vpop.f32.mrf.mxu1 }
 0x2ae   : > { %v1339_v59 = vadd.f32 %v1330_v12, %v1238_v13  ;;  %v1435_v18 = vadd.f32 %v5887_v17, %v1340_v14  ;;  %v1425_v19 = vpop.f32.mrf.mxu0  ;;  %v2212_v12 = vld [vmem:[#allocation6 + $0x2f0] sm:$0xff]  ;;  %v2116_v14 = vld [vmem:[#allocation6 + $0x268] sm:$0xff] }
 0x2af   : > { %v2211_v17 = vld [vmem:[#allocation6 + $0x2e8] sm:$0xff] }
 0x2b0   : > { %v1434_v15 = vadd.f32 %v1425_v19, %v1339_v59  ;;  %v2210_v59 = vld [vmem:[#allocation6 + $0x2e0] sm:$0xff]  ;;  %v2209_v19 = vld [vmem:[#allocation6 + $0x2d8] sm:$0xff] }
 0x2cd   : > { %v5922_v20 = vpop.f32.mrf.mxu1 }
 0x2ce   : > { %v1530_v55 = vadd.f32 %v5922_v20, %v1435_v18  ;;  %v5957_v16 = vpop.f32.mrf.mxu0  ;;  %v2115_v20 = vld [vmem:[#allocation6 + $0x260] sm:$0xff]  ;;  %v2114_v18 = vld [vmem:[#allocation6 + $0x258] sm:$0xff] }
 0x2cf   : > { %v1520_v21 = vpop.f32.mrf.mxu1 }
 0x2d0   : > { %v1529_v22 = vadd.f32 %v1520_v21, %v1434_v15  ;;  %v1625_v40 = vadd.f32 %v5957_v16, %v1530_v55  ;;  %v1615_v41 = vpop.f32.mrf.mxu0  ;;  %v2113_v21 = vld [vmem:[#allocation6 + $0x250] sm:$0xff]  ;;  %v2112_v55 = vld [vmem:[#allocation6 + $0x248] sm:$0xff] }
 0x2d1   : > { %v2208_v15 = vld [vmem:[#allocation6 + $0x2d0] sm:$0xff]  ;;  %v2207_v16 = vld [vmem:[#allocation6 + $0x2c8] sm:$0xff] }
 0x2d2   : > { %v1624_v45 = vadd.f32 %v1615_v41, %v1529_v22  ;;  %v2111_v22 = vld [vmem:[#allocation6 + $0x240] sm:$0xff]  ;;  %v2110_v41 = vld [vmem:[#allocation6 + $0x238] sm:$0xff] }
 0x2ee   : > { %v5992_v44 = vpop.f32.mrf.mxu1 }
 0x2ef   : > { %v1720_v47 = vadd.f32 %v5992_v44, %v1625_v40  ;;  %v2206_v40 = vld [vmem:[#allocation6 + $0x2c0] sm:$0xff]  ;;  %v2205_v44 = vld [vmem:[#allocation6 + $0x2b8] sm:$0xff] }
 0x2f0   : > { %v1710_v23 = vpop.f32.mrf.mxu1 }
 0x2f1   : > { %v7673_v24 = vadd.f32 %v7593_v53, %v1720_v47  ;;  %v1719_v25 = vadd.f32 %v1710_v23, %v1624_v45  ;;  %v2109_v45 = vld [vmem:[#allocation6 + $0x230] sm:$0xff]  ;;  %v2108_v23 = vld [vmem:[#allocation6 + $0x228] sm:$0xff] }
 0x2f2   : > { %v2204_v47 = vld [vmem:[#allocation6 + $0x2b0] sm:$0xff] }
 0x2f3   : > { %1724 = vst [vmem:[#allocation2 + $0x10] sm:$0xff] %v7673_v24  ;;  %v1721_v26 = vadd.f32 %v7599_v61, %v1719_v25  ;;  %v2107_v25 = vld [vmem:[#allocation6 + $0x220] sm:$0xff] }
 0x2f5   : > { %1723 = vst [vmem:[#allocation2 + $0x8] sm:$0xff] %v1721_v26 }
 0x2fc   : > { %v1743_v27 = vld [vmem:[#allocation2 + $0x6] sm:$0xff]  ;;  %v1744_v29 = vld [vmem:[#allocation2 + $0xe] sm:$0xff] }
 0x2fd   : > { %v1725_v28 = vld [vmem:[#allocation2 + $0x5] sm:$0xff]  ;;  %6025 = vmatprep.mubr.f32.mxu0 %v1743_v27  ;;  %v1726_v30 = vld [vmem:[#allocation2 + $0xd] sm:$0xff]  ;;  %v2106_v27 = vld [vmem:[#allocation6 + $0x218] sm:$0xff] }
 0x2fe   : > { %6060 = vmatprep.mubr.f32.mxu1 %v1725_v28  ;;  %6026 = vmatmul.mubr.f32.vlgmr.msra.gmra.mxu0 %v1744_v29  ;;  %v1911_v33 = vld [vmem:[#allocation2 + $0x7] sm:$0xff]  ;;  %v1912_v9 = vld [vmem:[#allocation2 + $0xf] sm:$0xff]  ;;  %v2201_v28 = vld [vmem:[#allocation6 + $0x298] sm:$0xff] }
 0x2ff   : > { %6061 = vmatmul.mubr.f32.vlgmr.msra.gmra.mxu1 %v1726_v30  ;;  %6064 = vmatpush3.msra.mxu0 %v1928_v63  ;;  %v2009_v63 = vld [vmem:[#allocation6 + $0x188] sm:$0xff]  ;;  %v2105_v29 = vld [vmem:[#allocation6 + $0x210] sm:$0xff] }
 0x300   : > { %6099 = vmatpush3.msra.mxu1 %v2023_v1  ;;  %6065 = vmatprep.subr.mxu0 %v1927_v31  ;;  %v1913_v1 = vld [vmem:[#allocation6 + $0x100] sm:$0xff]  ;;  %v2101_v10 = vld [vmem:[#allocation2 + $0x9] sm:$0xff] }
 0x301   : > { %6095 = vmatprep.mubr.f32.mxu0 %v1911_v33  ;;  %6100 = vmatprep.subr.mxu1 %v2022_v32  ;;  %v2196_v13 = vld [vmem:[#allocation2 + $0xa] sm:$0xff]  ;;  %v2103_v33 = vld [vmem:[#allocation6 + $0x200] sm:$0xff] }
 0x302   : > { %6130 = vmatprep.mubr.f32.mxu1 %v1721_v26  ;;  %6066 = vmatpush3.msra.mxu0 %v1927_v31  ;;  %v2202_v26 = vld [vmem:[#allocation6 + $0x2a0] sm:$0xff]  ;;  %v2200_v30 = vld [vmem:[#allocation6 + $0x290] sm:$0xff]  ;;  %v2104_v31 = vld [vmem:[#allocation6 + $0x208] sm:$0xff] }
 0x303   : > { %6101 = vmatpush3.msra.mxu1 %v2022_v32  ;;  %6067 = vmatprep.subr.mxu0 %v1926_v34  ;;  %v2199_v32 = vld [vmem:[#allocation6 + $0x288] sm:$0xff] }
 0x304   : > { %6102 = vmatprep.subr.mxu1 %v2021_v35  ;;  %6068 = vmatpush3.msra.mxu0 %v1926_v34  ;;  %v2198_v34 = vld [vmem:[#allocation6 + $0x280] sm:$0xff] }
 0x305   : > { %6103 = vmatpush3.msra.mxu1 %v2021_v35  ;;  %6069 = vmatprep.subr.mxu0 %v1925_v36  ;;  %v2308_v35 = vld [vmem:[#allocation6 + $0x378] sm:$0xff] }
 0x306   : > { %6104 = vmatprep.subr.mxu1 %v2020_v37  ;;  %6070 = vmatpush3.msra.mxu0 %v1925_v36  ;;  %v2102_v36 = vld [vmem:[#allocation2 + $0x11] sm:$0xff] }
 0x307   : > { %6105 = vmatpush3.msra.mxu1 %v2020_v37  ;;  %6071 = vmatprep.subr.mxu0 %v1924_v38  ;;  %v2197_v37 = vld [vmem:[#allocation2 + $0x12] sm:$0xff] }
 0x308   : > { %6106 = vmatprep.subr.mxu1 %v2019_v39  ;;  %6072 = vmatpush3.msra.mxu0 %v1924_v38  ;;  %v2291_v38 = vld [vmem:[#allocation2 + $0xb] sm:$0xff] }
 0x309   : > { %6107 = vmatpush3.msra.mxu1 %v2019_v39  ;;  %6073 = vmatprep.subr.mxu0 %v1923_v42  ;;  %v2307_v39 = vld [vmem:[#allocation6 + $0x370] sm:$0xff] }
 0x30a   : > { %6108 = vmatprep.subr.mxu1 %v2018_v43  ;;  %6074 = vmatpush3.msra.mxu0 %v1923_v42  ;;  %v2306_v42 = vld [vmem:[#allocation6 + $0x368] sm:$0xff] }
 0x30b   : > { %6109 = vmatpush3.msra.mxu1 %v2018_v43  ;;  %6075 = vmatprep.subr.mxu0 %v1922_v46  ;;  %v2305_v43 = vld [vmem:[#allocation6 + $0x360] sm:$0xff] }
 0x30c   : > { %6110 = vmatprep.subr.mxu1 %v2017_v48  ;;  %6076 = vmatpush3.msra.mxu0 %v1922_v46  ;;  %v2304_v46 = vld [vmem:[#allocation6 + $0x358] sm:$0xff] }
 0x30d   : > { %6111 = vmatpush3.msra.mxu1 %v2017_v48  ;;  %6077 = vmatprep.subr.mxu0 %v1921_v49  ;;  %v2303_v48 = vld [vmem:[#allocation6 + $0x350] sm:$0xff] }
 0x30e   : > { %6112 = vmatprep.subr.mxu1 %v2016_v50  ;;  %6078 = vmatpush3.msra.mxu0 %v1921_v49  ;;  %v2302_v49 = vld [vmem:[#allocation6 + $0x348] sm:$0xff] }
 0x30f   : > { %6113 = vmatpush3.msra.mxu1 %v2016_v50  ;;  %6079 = vmatprep.subr.mxu0 %v1920_v52  ;;  %v2301_v50 = vld [vmem:[#allocation6 + $0x340] sm:$0xff] }
 0x310   : > { %6114 = vmatprep.subr.mxu1 %v2015_v54  ;;  %6080 = vmatpush3.msra.mxu0 %v1920_v52  ;;  %v2300_v52 = vld [vmem:[#allocation6 + $0x338] sm:$0xff] }
 0x311   : > { %6115 = vmatpush3.msra.mxu1 %v2015_v54  ;;  %6081 = vmatprep.subr.mxu0 %v1919_v56  ;;  %v2299_v54 = vld [vmem:[#allocation6 + $0x330] sm:$0xff] }
 0x312   : > { %6116 = vmatprep.subr.mxu1 %v2014_v58  ;;  %6082 = vmatpush3.msra.mxu0 %v1919_v56  ;;  %v2298_v56 = vld [vmem:[#allocation6 + $0x328] sm:$0xff] }
 0x313   : > { %6117 = vmatpush3.msra.mxu1 %v2014_v58  ;;  %6083 = vmatprep.subr.mxu0 %v1918_v60  ;;  %v2297_v58 = vld [vmem:[#allocation6 + $0x320] sm:$0xff] }
 0x314   : > { %6118 = vmatprep.subr.mxu1 %v2013_v62  ;;  %6084 = vmatpush3.msra.mxu0 %v1918_v60  ;;  %v2296_v60 = vld [vmem:[#allocation6 + $0x318] sm:$0xff] }
 0x315   : > { %6119 = vmatpush3.msra.mxu1 %v2013_v62  ;;  %6085 = vmatprep.subr.mxu0 %v1917_v0  ;;  %v2295_v62 = vld [vmem:[#allocation6 + $0x310] sm:$0xff] }
 0x316   : > { %6120 = vmatprep.subr.mxu1 %v2012_v2  ;;  %6086 = vmatpush3.msra.mxu0 %v1917_v0  ;;  %v2294_v0 = vld [vmem:[#allocation6 + $0x308] sm:$0xff] }
 0x317   : > { %6121 = vmatpush3.msra.mxu1 %v2012_v2  ;;  %6087 = vmatprep.subr.mxu0 %v1916_v4  ;;  %v2293_v2 = vld [vmem:[#allocation6 + $0x300] sm:$0xff] }
 0x318   : > { %6122 = vmatprep.subr.mxu1 %v2011_v6  ;;  %6088 = vmatpush3.msra.mxu0 %v1916_v4  ;;  %v2292_v4 = vld [vmem:[#allocation2 + $0x13] sm:$0xff] }
 0x319   : > { %6123 = vmatpush3.msra.mxu1 %v2011_v6  ;;  %6089 = vmatprep.subr.mxu0 %v1915_v8  ;;  %v2401_v6 = vld [vmem:[#allocation8 + $0x78] sm:$0xff] }
 0x31a   : > { %6124 = vmatprep.subr.mxu1 %v2010_v51  ;;  %6090 = vmatpush3.msra.mxu0 %v1915_v8  ;;  %v2400_v8 = vld [vmem:[#allocation8 + $0x70] sm:$0xff] }
 0x31b   : > { %6125 = vmatpush3.msra.mxu1 %v2010_v51  ;;  %6091 = vmatprep.subr.mxu0 %v1914_v57  ;;  %v2399_v51 = vld [vmem:[#allocation8 + $0x68] sm:$0xff] }
 0x31c   : > { %6126 = vmatprep.subr.mxu1 %v2009_v63  ;;  %6092 = vmatpush3.msra.mxu0 %v1914_v57  ;;  %v2398_v57 = vld [vmem:[#allocation8 + $0x60] sm:$0xff] }
 0x31d   : > { %6127 = vmatpush3.msra.mxu1 %v2009_v63  ;;  %6093 = vmatprep.subr.mxu0 %v1913_v1  ;;  %v2397_v63 = vld [vmem:[#allocation8 + $0x58] sm:$0xff] }
 0x31e   : > { %6128 = vmatprep.subr.mxu1 %v2008_v3  ;;  %6094 = vmatpush3.msra.mxu0 %v1913_v1  ;;  %v2396_v1 = vld [vmem:[#allocation8 + $0x50] sm:$0xff] }
 0x31f   : > { %6129 = vmatpush3.msra.mxu1 %v2008_v3  ;;  %6096 = vmatmul.mubr.f32.vlgmr.msra.gmra.mxu0 %v1912_v9  ;;  %v2395_v3 = vld [vmem:[#allocation8 + $0x48] sm:$0xff]  ;;  %v2392_v9 = vld [vmem:[#allocation8 + $0x30] sm:$0xff] }
 0x320   : > { %6131 = vmatmul.mubr.f32.vlgmr.msra.gmra.mxu1 %v7673_v24  ;;  %6133 = vmatprep.subr.mxu0 %v2118_v5  ;;  %v2203_v24 = vld [vmem:[#allocation6 + $0x2a8] sm:$0xff] }
 0x321   : > { %6168 = vmatprep.subr.mxu1 %v2213_v7  ;;  %6134 = vmatpush3.msra.mxu0 %v2118_v5  ;;  %v2394_v5 = vld [vmem:[#allocation8 + $0x40] sm:$0xff] }
 0x322   : > { %6165 = vmatprep.mubr.f32.mxu0 %v2101_v10  ;;  %6169 = vmatpush3.msra.mxu1 %v2213_v7  ;;  %v2393_v7 = vld [vmem:[#allocation8 + $0x38] sm:$0xff]  ;;  %v2391_v10 = vld [vmem:[#allocation8 + $0x28] sm:$0xff] }
 0x323   : > { %6200 = vmatprep.mubr.f32.mxu1 %v2196_v13  ;;  %6135 = vmatprep.subr.mxu0 %v2117_v11  ;;  %v2388_v13 = vld [vmem:[#allocation8 + $0x10] sm:$0xff] }
 0x324   : > { %6170 = vmatprep.subr.mxu1 %v2212_v12  ;;  %6136 = vmatpush3.msra.mxu0 %v2117_v11  ;;  %v2390_v11 = vld [vmem:[#allocation8 + $0x20] sm:$0xff] }
 0x325   : > { %6171 = vmatpush3.msra.mxu1 %v2212_v12  ;;  %6137 = vmatprep.subr.mxu0 %v2116_v14  ;;  %v2389_v12 = vld [vmem:[#allocation8 + $0x18] sm:$0xff] }
 0x326   : > { %6172 = vmatprep.subr.mxu1 %v2211_v17  ;;  %6138 = vmatpush3.msra.mxu0 %v2116_v14  ;;  %v2387_v14 = vld [vmem:[#allocation8 + $0x8] sm:$0xff] }
 0x327   : > { %6173 = vmatpush3.msra.mxu1 %v2211_v17  ;;  %6139 = vmatprep.subr.mxu0 %v2115_v20  ;;  %v2386_v17 = vld [vmem:[#allocation8] sm:$0xff] }
 0x328   : > { %6174 = vmatprep.subr.mxu1 %v2210_v59  ;;  %6140 = vmatpush3.msra.mxu0 %v2115_v20  ;;  %v7678_v20 = vld [vmem:[#allocation2] sm:$0xff] }
 0x329   : > { %6175 = vmatpush3.msra.mxu1 %v2210_v59  ;;  %6141 = vmatprep.subr.mxu0 %v2114_v18 }
 0x32a   : > { %6176 = vmatprep.subr.mxu1 %v2209_v19  ;;  %6142 = vmatpush3.msra.mxu0 %v2114_v18 }
 0x32b   : > { %6177 = vmatpush3.msra.mxu1 %v2209_v19  ;;  %6143 = vmatprep.subr.mxu0 %v2113_v21 }
 0x32c   : > { %6178 = vmatprep.subr.mxu1 %v2208_v15  ;;  %6144 = vmatpush3.msra.mxu0 %v2113_v21 }
 0x32d   : > { %6179 = vmatpush3.msra.mxu1 %v2208_v15  ;;  %6145 = vmatprep.subr.mxu0 %v2112_v55 }
 0x32e   : > { %6180 = vmatprep.subr.mxu1 %v2207_v16  ;;  %6146 = vmatpush3.msra.mxu0 %v2112_v55 }
 0x32f   : > { %6181 = vmatpush3.msra.mxu1 %v2207_v16  ;;  %6147 = vmatprep.subr.mxu0 %v2111_v22 }
 0x330   : > { %6182 = vmatprep.subr.mxu1 %v2206_v40  ;;  %6148 = vmatpush3.msra.mxu0 %v2111_v22 }
 0x331   : > { %6183 = vmatpush3.msra.mxu1 %v2206_v40  ;;  %6149 = vmatprep.subr.mxu0 %v2110_v41 }
 0x332   : > { %6184 = vmatprep.subr.mxu1 %v2205_v44  ;;  %6150 = vmatpush3.msra.mxu0 %v2110_v41 }
 0x333   : > { %6185 = vmatpush3.msra.mxu1 %v2205_v44  ;;  %6151 = vmatprep.subr.mxu0 %v2109_v45 }
 0x334   : > { %6186 = vmatprep.subr.mxu1 %v2204_v47  ;;  %6152 = vmatpush3.msra.mxu0 %v2109_v45 }
 0x335   : > { %6187 = vmatpush3.msra.mxu1 %v2204_v47  ;;  %6153 = vmatprep.subr.mxu0 %v2108_v23 }
 0x336   : > { %6188 = vmatprep.subr.mxu1 %v2203_v24  ;;  %6154 = vmatpush3.msra.mxu0 %v2108_v23 }
 0x337   : > { %6189 = vmatpush3.msra.mxu1 %v2203_v24  ;;  %6155 = vmatprep.subr.mxu0 %v2107_v25 }
 0x338   : > { %6190 = vmatprep.subr.mxu1 %v2202_v26  ;;  %6156 = vmatpush3.msra.mxu0 %v2107_v25 }
 0x339   : > { %6191 = vmatpush3.msra.mxu1 %v2202_v26  ;;  %6157 = vmatprep.subr.mxu0 %v2106_v27 }
 0x33a   : > { %6192 = vmatprep.subr.mxu1 %v2201_v28  ;;  %6158 = vmatpush3.msra.mxu0 %v2106_v27 }
 0x33b   : > { %6193 = vmatpush3.msra.mxu1 %v2201_v28  ;;  %6159 = vmatprep.subr.mxu0 %v2105_v29 }
 0x33c   : > { %6194 = vmatprep.subr.mxu1 %v2200_v30  ;;  %6160 = vmatpush3.msra.mxu0 %v2105_v29 }
 0x33d   : > { %6195 = vmatpush3.msra.mxu1 %v2200_v30  ;;  %6161 = vmatprep.subr.mxu0 %v2104_v31 }
 0x33e   : > { %6196 = vmatprep.subr.mxu1 %v2199_v32  ;;  %6162 = vmatpush3.msra.mxu0 %v2104_v31 }
 0x33f   : > { %6197 = vmatpush3.msra.mxu1 %v2199_v32  ;;  %6163 = vmatprep.subr.mxu0 %v2103_v33 }
 0x340   : > { %6198 = vmatprep.subr.mxu1 %v2198_v34  ;;  %6164 = vmatpush3.msra.mxu0 %v2103_v33 }
 0x341   : > { %6199 = vmatpush3.msra.mxu1 %v2198_v34  ;;  %6166 = vmatmul.mubr.f32.vlgmr.msra.gmra.mxu0 %v2102_v36 }
 0x342   : > { %6201 = vmatmul.mubr.f32.vlgmr.msra.gmra.mxu1 %v2197_v37  ;;  %6203 = vmatprep.subr.mxu0 %v2308_v35 }
 0x343   : > { %6235 = vmatprep.mubr.f32.mxu0 %v2291_v38  ;;  %6204 = vmatpush3.msra.mxu0 %v2308_v35 }
 0x344   : > { %6205 = vmatprep.subr.mxu0 %v2307_v39  ;;  %6238 = vmatprep.subr.mxu1 %v2401_v6 }
 0x345   : > { %6206 = vmatpush3.msra.mxu0 %v2307_v39  ;;  %6239 = vmatpush3.msra.mxu1 %v2401_v6 }
 0x346   : > { %6207 = vmatprep.subr.mxu0 %v2306_v42  ;;  %6240 = vmatprep.subr.mxu1 %v2400_v8 }
 0x347   : > { %6208 = vmatpush3.msra.mxu0 %v2306_v42  ;;  %6241 = vmatpush3.msra.mxu1 %v2400_v8 }
 0x348   : > { %6209 = vmatprep.subr.mxu0 %v2305_v43  ;;  %6242 = vmatprep.subr.mxu1 %v2399_v51 }
 0x349   : > { %6210 = vmatpush3.msra.mxu0 %v2305_v43  ;;  %6243 = vmatpush3.msra.mxu1 %v2399_v51 }
 0x34a   : > { %6211 = vmatprep.subr.mxu0 %v2304_v46  ;;  %6244 = vmatprep.subr.mxu1 %v2398_v57 }
 0x34b   : > { %6212 = vmatpush3.msra.mxu0 %v2304_v46  ;;  %6245 = vmatpush3.msra.mxu1 %v2398_v57 }
 0x34c   : > { %6213 = vmatprep.subr.mxu0 %v2303_v48  ;;  %6246 = vmatprep.subr.mxu1 %v2397_v63 }
 0x34d   : > { %6214 = vmatpush3.msra.mxu0 %v2303_v48  ;;  %6247 = vmatpush3.msra.mxu1 %v2397_v63 }
 0x34e   : > { %6215 = vmatprep.subr.mxu0 %v2302_v49  ;;  %6248 = vmatprep.subr.mxu1 %v2396_v1 }
 0x34f   : > { %6216 = vmatpush3.msra.mxu0 %v2302_v49  ;;  %6249 = vmatpush3.msra.mxu1 %v2396_v1  ;;  %v6763_v49 = vld [vmem:[#allocation9 + $0x78] sm:$0xff]  }
 0x350   : > { %6217 = vmatprep.subr.mxu0 %v2301_v50  ;;  %6250 = vmatprep.subr.mxu1 %v2395_v3 }
 0x351   : > { %6218 = vmatpush3.msra.mxu0 %v2301_v50  ;;  %6251 = vmatpush3.msra.mxu1 %v2395_v3  ;;  %v6765_v50 = vld [vmem:[#allocation9 + $0x70] sm:$0xff]  }
 0x352   : > { %6219 = vmatprep.subr.mxu0 %v2300_v52  ;;  %6252 = vmatprep.subr.mxu1 %v2394_v5 }
 0x353   : > { %6220 = vmatpush3.msra.mxu0 %v2300_v52  ;;  %6253 = vmatpush3.msra.mxu1 %v2394_v5  ;;  %v6767_v52 = vld [vmem:[#allocation9 + $0x68] sm:$0xff]  }
 0x354   : > { %6221 = vmatprep.subr.mxu0 %v2299_v54  ;;  %6254 = vmatprep.subr.mxu1 %v2393_v7 }
 0x355   : > { %6222 = vmatpush3.msra.mxu0 %v2299_v54  ;;  %6255 = vmatpush3.msra.mxu1 %v2393_v7  ;;  %v6764_v54 = vld [vmem:[#allocation9 + $0x38] sm:$0xff]  }
 0x356   : > { %6223 = vmatprep.subr.mxu0 %v2298_v56  ;;  %6256 = vmatprep.subr.mxu1 %v2392_v9 }
 0x357   : > { %6224 = vmatpush3.msra.mxu0 %v2298_v56  ;;  %6257 = vmatpush3.msra.mxu1 %v2392_v9  ;;  %v6769_v56 = vld [vmem:[#allocation9 + $0x60] sm:$0xff]  }
 0x358   : > { %6225 = vmatprep.subr.mxu0 %v2297_v58  ;;  %6258 = vmatprep.subr.mxu1 %v2391_v10 }
 0x359   : > { %6226 = vmatpush3.msra.mxu0 %v2297_v58  ;;  %6259 = vmatpush3.msra.mxu1 %v2391_v10  ;;  %v6766_v58 = vld [vmem:[#allocation9 + $0x30] sm:$0xff]  }
 0x35a   : > { %6227 = vmatprep.subr.mxu0 %v2296_v60  ;;  %6260 = vmatprep.subr.mxu1 %v2390_v11 }
 0x35b   : > { %6228 = vmatpush3.msra.mxu0 %v2296_v60  ;;  %6261 = vmatpush3.msra.mxu1 %v2390_v11  ;;  %v6771_v60 = vld [vmem:[#allocation9 + $0x58] sm:$0xff]  }
 0x35c   : > { %6229 = vmatprep.subr.mxu0 %v2295_v62  ;;  %6262 = vmatprep.subr.mxu1 %v2389_v12 }
 0x35d   : > { %6230 = vmatpush3.msra.mxu0 %v2295_v62  ;;  %6263 = vmatpush3.msra.mxu1 %v2389_v12  ;;  %v6768_v62 = vld [vmem:[#allocation9 + $0x28] sm:$0xff]  }
 0x35e   : > { %6231 = vmatprep.subr.mxu0 %v2294_v0  ;;  %6264 = vmatprep.subr.mxu1 %v2388_v13 }
 0x35f   : > { %6232 = vmatpush3.msra.mxu0 %v2294_v0  ;;  %6265 = vmatpush3.msra.mxu1 %v2388_v13  ;;  %v6773_v0 = vld [vmem:[#allocation9 + $0x50] sm:$0xff]  }
 0x360   : > { %6233 = vmatprep.subr.mxu0 %v2293_v2  ;;  %6266 = vmatprep.subr.mxu1 %v2387_v14 }
 0x361   : > { %6234 = vmatpush3.msra.mxu0 %v2293_v2  ;;  %6267 = vmatpush3.msra.mxu1 %v2387_v14  ;;  %v6770_v2 = vld [vmem:[#allocation9 + $0x20] sm:$0xff]  }
 0x362   : > { %6236 = vmatmul.mubr.f32.vlgmr.msra.gmra.mxu0 %v2292_v4  ;;  %6273 = vmatprep.subr.mxu0 %v2401_v6  ;;  %v6775_v4 = vld [vmem:[#allocation9 + $0x48] sm:$0xff]  }
 0x363   : > { %6274 = vmatpush3.msra.mxu0 %v2401_v6  ;;  %6268 = vmatprep.subr.mxu1 %v2386_v17  ;;  %v6772_v6 = vld [vmem:[#allocation9 + $0x18] sm:$0xff]  }
 0x364   : > { %6275 = vmatprep.subr.mxu0 %v2400_v8  ;;  %6269 = vmatpush3.msra.mxu1 %v2386_v17 }
 0x365   : > { %6276 = vmatpush3.msra.mxu0 %v2400_v8  ;;  %6308 = vmatprep.subr.bf16.mxu1 %v7678_v20  ;;  %v6777_v8 = vld [vmem:[#allocation9 + $0x40] sm:$0xff]  }
 0x366   : > { %6277 = vmatprep.subr.mxu0 %v2399_v51 }
 0x367   : > { %6278 = vmatpush3.msra.mxu0 %v2399_v51  ;;  %v6774_v51 = vld [vmem:[#allocation9 + $0x10] sm:$0xff]  }
 0x368   : > { %6279 = vmatprep.subr.mxu0 %v2398_v57 }
 0x369   : > { %6280 = vmatpush3.msra.mxu0 %v2398_v57  ;;  %v6776_v57 = vld [vmem:[#allocation9 + $0x8] sm:$0xff]  }
 0x36a   : > { %6281 = vmatprep.subr.mxu0 %v2397_v63 }
 0x36b   : > { %6282 = vmatpush3.msra.mxu0 %v2397_v63  ;;  %v6778_v63 = vld [vmem:[#allocation9] sm:$0xff]  }
 0x36c   : > { %6283 = vmatprep.subr.mxu0 %v2396_v1 }
 0x36d   : > { %6284 = vmatpush3.msra.mxu0 %v2396_v1 }
 0x36e   : > { %6285 = vmatprep.subr.mxu0 %v2395_v3 }
 0x36f   : > { %6286 = vmatpush3.msra.mxu0 %v2395_v3 }
 0x370   : > { %6287 = vmatprep.subr.mxu0 %v2394_v5 }
 0x371   : > { %6288 = vmatpush3.msra.mxu0 %v2394_v5 }
 0x372   : > { %6289 = vmatprep.subr.mxu0 %v2393_v7 }
 0x373   : > { %6290 = vmatpush3.msra.mxu0 %v2393_v7 }
 0x374   : > { %6291 = vmatprep.subr.mxu0 %v2392_v9 }
 0x375   : > { %6292 = vmatpush3.msra.mxu0 %v2392_v9 }
 0x376   : > { %6293 = vmatprep.subr.mxu0 %v2391_v10 }
 0x377   : > { %6294 = vmatpush3.msra.mxu0 %v2391_v10 }
 0x378   : > { %6295 = vmatprep.subr.mxu0 %v2390_v11 }
 0x379   : > { %6296 = vmatpush3.msra.mxu0 %v2390_v11 }
 0x37a   : > { %6297 = vmatprep.subr.mxu0 %v2389_v12 }
 0x37b   : > { %6298 = vmatpush3.msra.mxu0 %v2389_v12  ;;  %v4773_v12 = vld [vmem:[%s7961_s3] ss:$0 sm:$0xff] }
 0x37c   : > { %6299 = vmatprep.subr.mxu0 %v2388_v13 }
 0x37d   : > { %6300 = vmatpush3.msra.mxu0 %v2388_v13 }
 0x37e   : > { %6301 = vmatprep.subr.mxu0 %v2387_v14 }
 0x37f   : > { %6302 = vmatpush3.msra.mxu0 %v2387_v14 }
 0x380   : > { %6303 = vmatprep.subr.mxu0 %v2386_v17 }
 0x381   : > { %6304 = vmatpush3.msra.mxu0 %v2386_v17  ;;  %v4774_v17 = vld [vmem:[%s7962_s4] ss:$0 sm:$0xff] }
 0x382   : > { %6328 = vmatprep.subr.bf16.mxu0 %v7678_v20 }
 0x3be   : > { %v6027_v59 = vpop.f32.mrf.mxu0 }
 0x3bf   : > { %v6062_v18 = vpop.f32.mrf.mxu1 }
 0x3c0   : > { %v1827_v19 = vpop.f32.mrf.mxu0  ;;  %v1908_v22 = vadd.f32 %v6062_v18, %v6027_v59 }
 0x3c1   : > { %v1902_v15 = vpop.f32.mrf.mxu1 }
 0x3c2   : > { %v1903_v16 = vadd.f32 %v1902_v15, %v1827_v19 }
 0x3df   : > { %v6097_v21 = vpop.f32.mrf.mxu0 }
 0x3e0   : > { %v6132_v40 = vpop.f32.mrf.mxu1  ;;  %v2005_v45 = vadd.f32 %v6097_v21, %v1908_v22  ;;  %v6780_v22 = vld [vmem:[#allocation9 + $0xb0] sm:$0xff]  }
 0x3e1   : > { %v1995_v55 = vpop.f32.mrf.mxu0 }
 0x3e2   : > { %v2004_v44 = vadd.f32 %v1995_v55, %v1903_v16  ;;  %v2090_v47 = vpop.f32.mrf.mxu1  ;;  %v2100_v25 = vadd.f32 %v6132_v40, %v2005_v45  ;;  %v6779_v55 = vld [vmem:[#allocation9 + $0xb8] sm:$0xff]  }
 0x3e4   : > { %v2099_v24 = vadd.f32 %v2090_v47, %v2004_v44  ;;  %v6781_v44 = vld [vmem:[#allocation9 + $0xa8] sm:$0xff]   ;;  %v6782_v47 = vld [vmem:[#allocation9 + $0xa0] sm:$0xff]  }
 0x401   : > { %v6167_v41 = vpop.f32.mrf.mxu0 }
 0x402   : > { %v6202_v26 = vpop.f32.mrf.mxu1  ;;  %v2195_v28 = vadd.f32 %v6167_v41, %v2100_v25  ;;  %v6785_v25 = vld [vmem:[#allocation9 + $0x88] sm:$0xff]  }
 0x403   : > { %v2185_v23 = vpop.f32.mrf.mxu0 }
 0x404   : > { %v2194_v27 = vadd.f32 %v2185_v23, %v2099_v24  ;;  %v2280_v29 = vpop.f32.mrf.mxu1  ;;  %v2290_v32 = vadd.f32 %v6202_v26, %v2195_v28  ;;  %v6783_v23 = vld [vmem:[#allocation9 + $0x98] sm:$0xff]   ;;  %v6784_v24 = vld [vmem:[#allocation9 + $0x90] sm:$0xff]   ;;  %v6786_v26 = vld [vmem:[#allocation9 + $0x80] sm:$0xff]  }
 0x406   : > { %v2289_v31 = vadd.f32 %v2280_v29, %v2194_v27 }
 0x422   : > { %v6237_v30 = vpop.f32.mrf.mxu0 }
 0x423   : > { %v2385_v35 = vadd.f32 %v6237_v30, %v2290_v32  ;;  %v6787_v30 = vld [vmem:[#allocation9 + $0x78] sm:$0xff]  }
 0x424   : > { %v2375_v33 = vpop.f32.mrf.mxu0  ;;  %v6788_v32 = vld [vmem:[#allocation9 + $0x38] sm:$0xff]  }
 0x425   : > { %v2384_v34 = vadd.f32 %v2375_v33, %v2289_v31  ;;  %v6789_v31 = vld [vmem:[#allocation9 + $0x70] sm:$0xff]   ;;  %v6791_v33 = vld [vmem:[#allocation9 + $0x68] sm:$0xff]  }
 0x427   : > { %6270 = vmatprep.mubr.f32.mxu1 %v2384_v34 }
 0x428   : > { %6271 = vmatmul.mubr.f32.vlgmr.msra.gmra.mxu1 %v2385_v35 }
 0x429   : > { %6309 = vmatpush3.bf16.msra.mxu1 %v6763_v49  ;;  %6324 = vmatprep.mubr.msk.bf16.mxu1 %vm7217_vm0, %v7678_v20  ;;  %v6800_v49 = vld [vmem:[#allocation9 + $0x8] sm:$0xff]  }
 0x42a   : > { %6310 = vmatprep.subr.bf16.mxu1 %v7678_v20 }
 0x42d   : > { %6311 = vmatpush3.bf16.msra.mxu1 %v6765_v50  ;;  %v6802_v50 = vld [vmem:[#allocation9] sm:$0xff]  }
 0x42e   : > { %6312 = vmatprep.subr.bf16.mxu1 %v7678_v20 }
 0x431   : > { %6313 = vmatpush3.bf16.msra.mxu1 %v6767_v52 }
 0x432   : > { %6314 = vmatprep.subr.bf16.mxu1 %v7678_v20 }
 0x435   : > { %6315 = vmatpush3.bf16.msra.mxu1 %v6769_v56 }
 0x436   : > { %6316 = vmatprep.subr.bf16.mxu1 %v7678_v20 }
 0x439   : > { %6317 = vmatpush3.bf16.msra.mxu1 %v6771_v60 }
 0x43a   : > { %6318 = vmatprep.subr.bf16.mxu1 %v7678_v20 }
 0x43d   : > { %6319 = vmatpush3.bf16.msra.mxu1 %v6773_v0 }
 0x43e   : > { %6320 = vmatprep.subr.bf16.mxu1 %v7678_v20 }
 0x441   : > { %6321 = vmatpush3.bf16.msra.mxu1 %v6775_v4 }
 0x442   : > { %6322 = vmatprep.subr.bf16.mxu1 %v7678_v20 }
 0x445   : > { %6323 = vmatpush3.bf16.msra.mxu1 %v6777_v8 }
 0x446   : > { %6348 = vmatprep.subr.bf16.mxu1 %v7678_v20 }
 0x4e8   : > { %v6272_v36 = vpop.f32.mrf.mxu1 }
 0x4e9   : > { %v2478_v37 = vmul.f32 0.125, %v6272_v36  ;;  %v6792_v36 = vld [vmem:[#allocation9 + $0x28] sm:$0xff]  }
 0x4ea   : > { %v2468_v38 = vpop.f32.mrf.mxu1 }
 0x4eb   : > { %v2477_v39 = vmul.f32 0.125, %v2468_v38  ;;  %v7682_v42 = vsub.f32 %v2385_v35, %v2478_v37  ;;  %v6793_v35 = vld [vmem:[#allocation9 + $0x60] sm:$0xff]   ;;  %v6795_v37 = vld [vmem:[#allocation9 + $0x58] sm:$0xff]   ;;  %v6797_v38 = vld [vmem:[#allocation9 + $0x50] sm:$0xff]  }
 0x4ed   : > { %v7684_v43 = vsub.f32 %v2384_v34, %v2477_v39  ;;  %v2482_v48 = vmul.f32 %v7682_v42, %v7682_v42  ;;  %v6790_v34 = vld [vmem:[#allocation9 + $0x30] sm:$0xff]   ;;  %v6794_v39 = vld [vmem:[#allocation9 + $0x20] sm:$0xff]  }
 0x4ef   : > { %v2481_v46 = vmul.f32 %v7684_v43, %v7684_v43 }
 0x4f1   : > { %6305 = vmatprep.mubr.f32.mxu0 %v2481_v46  ;;  %v6801_v46 = vld [vmem:[#allocation9 + $0x40] sm:$0xff]  }
 0x4f2   : > { %6306 = vmatmul.mubr.f32.vlgmr.msra.gmra.mxu0 %v2482_v48  ;;  %v6798_v48 = vld [vmem:[#allocation9 + $0x10] sm:$0xff]  }
 0x4f3   : > { %6329 = vmatpush3.bf16.msra.mxu0 %v6764_v54  ;;  %6344 = vmatprep.mubr.msk.bf16.mxu0 %vm7217_vm0, %v7678_v20 }
 0x4f4   : > { %6330 = vmatprep.subr.bf16.mxu0 %v7678_v20 }
 0x4f7   : > { %6331 = vmatpush3.bf16.msra.mxu0 %v6766_v58 }
 0x4f8   : > { %6332 = vmatprep.subr.bf16.mxu0 %v7678_v20 }
 0x4fb   : > { %6333 = vmatpush3.bf16.msra.mxu0 %v6768_v62 }
 0x4fc   : > { %6334 = vmatprep.subr.bf16.mxu0 %v7678_v20 }
 0x4ff   : > { %6335 = vmatpush3.bf16.msra.mxu0 %v6770_v2 }
 0x500   : > { %6336 = vmatprep.subr.bf16.mxu0 %v7678_v20 }
 0x503   : > { %6337 = vmatpush3.bf16.msra.mxu0 %v6772_v6 }
 0x504   : > { %6338 = vmatprep.subr.bf16.mxu0 %v7678_v20 }
 0x507   : > { %6339 = vmatpush3.bf16.msra.mxu0 %v6774_v51 }
 0x508   : > { %6340 = vmatprep.subr.bf16.mxu0 %v7678_v20 }
 0x50b   : > { %6341 = vmatpush3.bf16.msra.mxu0 %v6776_v57 }
 0x50c   : > { %6342 = vmatprep.subr.bf16.mxu0 %v7678_v20 }
 0x50f   : > { %6343 = vmatpush3.bf16.msra.mxu0 %v6778_v63 }
 0x510   : > { %6368 = vmatprep.subr.bf16.mxu0 %v7678_v20 }
 0x5b2   : > { %v6307_v1 = vpop.f32.mrf.mxu0 }
 0x5b3   : > { %v2559_v3 = vmul.f32 0.125, %v6307_v1 }
 0x5b4   : > { %v2549_v5 = vpop.f32.mrf.mxu0 }
 0x5b5   : > { %v2561_v7 = vadd.f32 1e-06, %v2559_v3  ;;  %v2558_v9 = vmul.f32 0.125, %v2549_v5 }
 0x5b7   : > { %6907 = vrsqrt.f32 %v2561_v7  ;;  %v2560_v10 = vadd.f32 1e-06, %v2558_v9  ;;  %v6803_v9 = vld [vmem:[#allocation9 + $0xb8] sm:$0xff]  }
 0x5b9   : > { %6909 = vrsqrt.f32 %v2560_v10 }
 0x5c4   : > { %v6908_v11 = vpop.eup %6907 }
 0x5c5   : > { %v2565_v13 = vmul.f32 %v6908_v11, %v7682_v42  ;;  %v6799_v42 = vld [vmem:[#allocation9 + $0x48] sm:$0xff]   ;;  %v6804_v11 = vld [vmem:[#allocation9 + $0xb0] sm:$0xff]  }
 0x5c6   : > { %v6910_v14 = vpop.eup %6909 }
 0x5c7   : > { %v2574_v59 = vmul.f32 %v4773_v12, %v2565_v13  ;;  %v2564_v18 = vmul.f32 %v6910_v14, %v7684_v43  ;;  %v6796_v43 = vld [vmem:[#allocation9 + $0x18] sm:$0xff]   ;;  %v6805_v14 = vld [vmem:[#allocation9 + $0xa8] sm:$0xff]  }
 0x5c9   : > { %v7718_v19 = vadd.f32 %v4774_v17, %v2574_v59  ;;  %v2573_v21 = vmul.f32 %v4773_v12, %v2564_v18  ;;  %v6806_v59 = vld [vmem:[#allocation9 + $0xa0] sm:$0xff]   ;;  %v6807_v18 = vld [vmem:[#allocation9 + $0x98] sm:$0xff]  }
 0x5cb   : > { %2585 = vst [vmem:[#allocation2 + $0x10] sm:$0xff] %v7718_v19  ;;  %v7721_v15 = vadd.f32 %v4774_v17, %v2573_v21  ;;  %v6808_v21 = vld [vmem:[#allocation9 + $0x90] sm:$0xff]  }
 0x5cd   : > { %2584 = vst [vmem:[#allocation2 + $0x8] sm:$0xff] %v7721_v15  ;;  %v2607_v16 = vpack.c.bf16 %v7718_v19, %v7721_v15 }
 0x5cf   : > { %6325 = vmatmul.mubr.bf16.vlgmr.msra.gmra.mxu1 %v2607_v16  ;;  %v6810_v16 = vld [vmem:[#allocation9 + $0x80] sm:$0xff]  }
 0x5d0   : > { %6349 = vmatpush3.bf16.msra.mxu1 %v6779_v55  ;;  %6364 = vmatprep.mubr.msk.bf16.mxu1 %vm7217_vm0, %v7678_v20  ;;  %v6809_v55 = vld [vmem:[#allocation9 + $0x88] sm:$0xff]  }
 0x5d1   : > { %6350 = vmatprep.subr.bf16.mxu1 %v7678_v20 }
 0x5d2   : > { %v2804_v28 = vld [vmem:[#allocation2 + $0x11] sm:$0xff] }
 0x5d4   : > { %v2586_v40 = vld [vmem:[#allocation2 + $0x7] sm:$0xff]  ;;  %v2587_v41 = vld [vmem:[#allocation2 + $0xf] sm:$0xff]  ;;  %6351 = vmatpush3.bf16.msra.mxu1 %v6780_v22 }
 0x5d5   : > { %v2588_v45 = vpack.c.bf16 %v2587_v41, %v2586_v40  ;;  %6352 = vmatprep.subr.bf16.mxu1 %v7678_v20  ;;  %v2803_v27 = vld [vmem:[#allocation2 + $0x9] sm:$0xff] }
 0x5d6   : > { %v2805_v29 = vpack.c.bf16 %v2804_v28, %v2803_v27  ;;  %v6819_v27 = vld [vmem:[#allocation9 + $0x58] sm:$0xff]   ;;  %v6821_v28 = vld [vmem:[#allocation9 + $0x50] sm:$0xff]  }
 0x5d7   : > { %6345 = vmatmul.mubr.bf16.vlgmr.msra.gmra.mxu0 %v2588_v45  ;;  %v6813_v45 = vld [vmem:[#allocation9 + $0x70] sm:$0xff]  }
 0x5d8   : > { %6353 = vmatpush3.bf16.msra.mxu1 %v6781_v44  ;;  %6384 = vmatprep.mubr.msk.bf16.mxu0 %vm7217_vm0, %v7678_v20  ;;  %v6811_v44 = vld [vmem:[#allocation9 + $0x78] sm:$0xff]  }
 0x5d9   : > { %6354 = vmatprep.subr.bf16.mxu1 %v7678_v20  ;;  %6369 = vmatpush3.bf16.msra.mxu0 %v6787_v30  ;;  %v6823_v30 = vld [vmem:[#allocation9 + $0x48] sm:$0xff]  }
 0x5da   : > { %6370 = vmatprep.subr.bf16.mxu0 %v7678_v20 }
 0x5dc   : > { %6355 = vmatpush3.bf16.msra.mxu1 %v6782_v47  ;;  %v6812_v47 = vld [vmem:[#allocation9 + $0x38] sm:$0xff]  }
 0x5dd   : > { %6356 = vmatprep.subr.bf16.mxu1 %v7678_v20  ;;  %6371 = vmatpush3.bf16.msra.mxu0 %v6789_v31  ;;  %v6820_v31 = vld [vmem:[#allocation9 + $0x18] sm:$0xff]  }
 0x5de   : > { %6372 = vmatprep.subr.bf16.mxu0 %v7678_v20 }
 0x5e0   : > { %6357 = vmatpush3.bf16.msra.mxu1 %v6783_v23  ;;  %v6815_v23 = vld [vmem:[#allocation9 + $0x68] sm:$0xff]  }
 0x5e1   : > { %6358 = vmatprep.subr.bf16.mxu1 %v7678_v20  ;;  %6373 = vmatpush3.bf16.msra.mxu0 %v6791_v33  ;;  %v6822_v33 = vld [vmem:[#allocation9 + $0x10] sm:$0xff]  }
 0x5e2   : > { %6374 = vmatprep.subr.bf16.mxu0 %v7678_v20 }
 0x5e4   : > { %6359 = vmatpush3.bf16.msra.mxu1 %v6784_v24  ;;  %v6814_v24 = vld [vmem:[#allocation9 + $0x30] sm:$0xff]  }
 0x5e5   : > { %6360 = vmatprep.subr.bf16.mxu1 %v7678_v20  ;;  %6375 = vmatpush3.bf16.msra.mxu0 %v6793_v35  ;;  %v6826_v35 = vld [vmem:[#allocation9] sm:$0xff]  }
 0x5e6   : > { %6376 = vmatprep.subr.bf16.mxu0 %v7678_v20 }
 0x5e8   : > { %6361 = vmatpush3.bf16.msra.mxu1 %v6785_v25  ;;  %v6817_v25 = vld [vmem:[#allocation9 + $0x60] sm:$0xff]  }
 0x5e9   : > { %6362 = vmatprep.subr.bf16.mxu1 %v7678_v20  ;;  %6377 = vmatpush3.bf16.msra.mxu0 %v6795_v37 }
 0x5ea   : > { %6378 = vmatprep.subr.bf16.mxu0 %v7678_v20 }
 0x5ec   : > { %6363 = vmatpush3.bf16.msra.mxu1 %v6786_v26  ;;  %v6816_v26 = vld [vmem:[#allocation9 + $0x28] sm:$0xff]  }
 0x5ed   : > { %6388 = vmatprep.subr.bf16.mxu1 %v7678_v20  ;;  %6379 = vmatpush3.bf16.msra.mxu0 %v6797_v38 }
 0x5ee   : > { %6380 = vmatprep.subr.bf16.mxu0 %v7678_v20 }
 0x5ef   : > { %6365 = vmatmul.mubr.bf16.vlgmr.msra.gmra.mxu1 %v2805_v29  ;;  %v6818_v29 = vld [vmem:[#allocation9 + $0x20] sm:$0xff]  }
 0x5f0   : > { %6404 = vmatprep.mubr.msk.bf16.mxu1 %vm7217_vm0, %v7678_v20  ;;  %6389 = vmatpush3.bf16.msra.mxu1 %v6788_v32  ;;  %v6825_v32 = vld [vmem:[#allocation9 + $0x40] sm:$0xff]  }
 0x5f1   : > { %6390 = vmatprep.subr.bf16.mxu1 %v7678_v20  ;;  %6381 = vmatpush3.bf16.msra.mxu0 %v6799_v42 }
 0x5f2   : > { %6382 = vmatprep.subr.bf16.mxu0 %v7678_v20 }
 0x5f4   : > { %6391 = vmatpush3.bf16.msra.mxu1 %v6790_v34  ;;  %v6824_v34 = vld [vmem:[#allocation9 + $0x8] sm:$0xff]  }
 0x5f5   : > { %6392 = vmatprep.subr.bf16.mxu1 %v7678_v20  ;;  %6383 = vmatpush3.bf16.msra.mxu0 %v6801_v46 }
 0x5f6   : > { %6408 = vmatprep.subr.bf16.mxu0 %v7678_v20 }
 0x5f8   : > { %6393 = vmatpush3.bf16.msra.mxu1 %v6792_v36 }
 0x5f9   : > { %6394 = vmatprep.subr.bf16.mxu1 %v7678_v20 }
 0x5fc   : > { %6395 = vmatpush3.bf16.msra.mxu1 %v6794_v39 }
 0x5fd   : > { %6396 = vmatprep.subr.bf16.mxu1 %v7678_v20 }
 0x600   : > { %6397 = vmatpush3.bf16.msra.mxu1 %v6796_v43 }
 0x601   : > { %6398 = vmatprep.subr.bf16.mxu1 %v7678_v20 }
 0x604   : > { %6399 = vmatpush3.bf16.msra.mxu1 %v6798_v48 }
 0x605   : > { %6400 = vmatprep.subr.bf16.mxu1 %v7678_v20 }
 0x608   : > { %6401 = vmatpush3.bf16.msra.mxu1 %v6800_v49 }
 0x609   : > { %6402 = vmatprep.subr.bf16.mxu1 %v7678_v20 }
 0x60c   : > { %6403 = vmatpush3.bf16.msra.mxu1 %v6802_v50 }
 0x60d   : > { %6428 = vmatprep.subr.bf16.mxu1 %v7678_v20 }
 0x68f   : > { %v2707_v52 = vpop.f32.mrf.mxu1 }
 0x691   : > { %v6326_v54 = vpop.f32.mrf.mxu1 }
 0x693   : > { %v2710_v56 = vpop.f32.mrf.mxu1 }
 0x695   : > { %v6327_v58 = vpop.f32.mrf.mxu1 }
 0x697   : > { %v2796_v60 = vpop.f32.mrf.mxu0 }
 0x698   : > { %v2797_v4 = vadd.f32 %v2796_v60, %v2707_v52 }
 0x699   : > { %v6346_v62 = vpop.f32.mrf.mxu0 }
 0x69b   : > { %v2799_v0 = vpop.f32.mrf.mxu0 }
 0x69c   : > { %v2800_v57 = vadd.f32 %v2799_v0, %v2710_v56 }
 0x69d   : > { %v6347_v2 = vpop.f32.mrf.mxu0 }
 0x6af   : > { %v2905_v6 = vpop.f32.mrf.mxu1 }
 0x6b0   : > { %v2912_v8 = vadd.f32 %v2905_v6, %v2797_v4  ;;  %v6827_v4 = vld [vmem:[#allocation9 + $0xb8] sm:$0xff]  }
 0x6b1   : > { %v6366_v51 = vpop.f32.mrf.mxu1 }
 0x6b2   : > { %v2914_v63 = vadd.f32 %v2912_v8, %v7721_v15  ;;  %v6828_v8 = vld [vmem:[#allocation9 + $0xb0] sm:$0xff]  }
 0x6b3   : > { %v2908_v1 = vpop.f32.mrf.mxu1 }
 0x6b4   : > { %2916 = vst [vmem:[#allocation2 + $0x8] sm:$0xff] %v2914_v63  ;;  %v2913_v3 = vadd.f32 %v2908_v1, %v2800_v57  ;;  %v6831_v1 = vld [vmem:[#allocation9 + $0x98] sm:$0xff]  }
 0x6b5   : > { %v6367_v5 = vpop.f32.mrf.mxu1 }
 0x6b6   : > { %v2915_v7 = vadd.f32 %v2913_v3, %v7718_v19  ;;  %v6832_v3 = vld [vmem:[#allocation9 + $0x90] sm:$0xff]   ;;  %v6833_v5 = vld [vmem:[#allocation9 + $0x88] sm:$0xff]  }
 0x6b8   : > { %2917 = vst [vmem:[#allocation2 + $0x10] sm:$0xff] %v2915_v7  ;;  %v2939_v10 = vpack.c.bf16 %v2915_v7, %v2914_v63  ;;  %v6834_v7 = vld [vmem:[#allocation9 + $0x80] sm:$0xff]  }
 0x6ba   : > { %6385 = vmatmul.mubr.bf16.vlgmr.msra.gmra.mxu0 %v2939_v10 }
 0x6bb   : > { %6409 = vmatpush3.bf16.msra.mxu0 %v6803_v9  ;;  %6424 = vmatprep.mubr.msk.bf16.mxu0 %vm7217_vm0, %v7678_v20  ;;  %v2918_v12 = vld [vmem:[#allocation2 + $0x7] sm:$0xff] }
 0x6bc   : > { %6410 = vmatprep.subr.bf16.mxu0 %v7678_v20 }
 0x6bf   : > { %v2919_v13 = vld [vmem:[#allocation2 + $0xf] sm:$0xff]  ;;  %6411 = vmatpush3.bf16.msra.mxu0 %v6804_v11 }
 0x6c0   : > { %v2920_v17 = vpack.c.bf16 %v2919_v13, %v2918_v12  ;;  %6412 = vmatprep.subr.bf16.mxu0 %v7678_v20  ;;  %v3134_v22 = vld [vmem:[#allocation2 + $0x9] sm:$0xff]  ;;  %v3135_v40 = vld [vmem:[#allocation2 + $0x11] sm:$0xff] }
 0x6c1   : > { %v3136_v41 = vpack.c.bf16 %v3135_v40, %v3134_v22  ;;  %v6835_v12 = vld [vmem:[#allocation11 + $0x78] sm:$0xff]   ;;  %v6837_v13 = vld [vmem:[#allocation11 + $0x70] sm:$0xff]   ;;  %v6842_v22 = vld [vmem:[#allocation11 + $0x20] sm:$0xff]  }
 0x6c2   : > { %6405 = vmatmul.mubr.bf16.vlgmr.msra.gmra.mxu1 %v2920_v17  ;;  %v6836_v17 = vld [vmem:[#allocation11 + $0x38] sm:$0xff]   ;;  %v6847_v40 = vld [vmem:[#allocation11 + $0x48] sm:$0xff]  }
 0x6c3   : > { %6413 = vmatpush3.bf16.msra.mxu0 %v6805_v14  ;;  %6444 = vmatprep.mubr.msk.bf16.mxu1 %vm7217_vm0, %v7678_v20  ;;  %v6839_v14 = vld [vmem:[#allocation11 + $0x68] sm:$0xff]  }
 0x6c4   : > { %6414 = vmatprep.subr.bf16.mxu0 %v7678_v20  ;;  %6429 = vmatpush3.bf16.msra.mxu1 %v6811_v44  ;;  %v6849_v44 = vld [vmem:[#allocation11 + $0x40] sm:$0xff]  }
 0x6c5   : > { %6430 = vmatprep.subr.bf16.mxu1 %v7678_v20 }
 0x6c7   : > { %6415 = vmatpush3.bf16.msra.mxu0 %v6806_v59  ;;  %v6841_v59 = vld [vmem:[#allocation11 + $0x60] sm:$0xff]  }
 0x6c8   : > { %6416 = vmatprep.subr.bf16.mxu0 %v7678_v20  ;;  %6431 = vmatpush3.bf16.msra.mxu1 %v6813_v45  ;;  %v6846_v45 = vld [vmem:[#allocation11 + $0x10] sm:$0xff]  }
 0x6c9   : > { %6432 = vmatprep.subr.bf16.mxu1 %v7678_v20 }
 0x6cb   : > { %6417 = vmatpush3.bf16.msra.mxu0 %v6807_v18  ;;  %v6838_v18 = vld [vmem:[#allocation11 + $0x30] sm:$0xff]  }
 0x6cc   : > { %6418 = vmatprep.subr.bf16.mxu0 %v7678_v20  ;;  %6433 = vmatpush3.bf16.msra.mxu1 %v6815_v23  ;;  %v6850_v23 = vld [vmem:[#allocation11] sm:$0xff]  }
 0x6cd   : > { %6434 = vmatprep.subr.bf16.mxu1 %v7678_v20 }
 0x6cf   : > { %6419 = vmatpush3.bf16.msra.mxu0 %v6808_v21  ;;  %v6843_v21 = vld [vmem:[#allocation11 + $0x58] sm:$0xff]  }
 0x6d0   : > { %6420 = vmatprep.subr.bf16.mxu0 %v7678_v20  ;;  %6435 = vmatpush3.bf16.msra.mxu1 %v6817_v25 }
 0x6d1   : > { %6436 = vmatprep.subr.bf16.mxu1 %v7678_v20 }
 0x6d3   : > { %6421 = vmatpush3.bf16.msra.mxu0 %v6809_v55  ;;  %v6840_v55 = vld [vmem:[#allocation11 + $0x28] sm:$0xff]  }
 0x6d4   : > { %6422 = vmatprep.subr.bf16.mxu0 %v7678_v20  ;;  %6437 = vmatpush3.bf16.msra.mxu1 %v6819_v27 }
 0x6d5   : > { %6438 = vmatprep.subr.bf16.mxu1 %v7678_v20 }
 0x6d7   : > { %6423 = vmatpush3.bf16.msra.mxu0 %v6810_v16  ;;  %v6845_v16 = vld [vmem:[#allocation11 + $0x50] sm:$0xff]  }
 0x6d8   : > { %6448 = vmatprep.subr.bf16.mxu0 %v7678_v20  ;;  %6439 = vmatpush3.bf16.msra.mxu1 %v6821_v28 }
 0x6d9   : > { %6440 = vmatprep.subr.bf16.mxu1 %v7678_v20 }
 0x6da   : > { %6425 = vmatmul.mubr.bf16.vlgmr.msra.gmra.mxu0 %v3136_v41  ;;  %v6844_v41 = vld [vmem:[#allocation11 + $0x18] sm:$0xff]  }
 0x6db   : > { %6464 = vmatprep.mubr.msk.bf16.mxu0 %vm7217_vm0, %v7678_v20  ;;  %6449 = vmatpush3.bf16.msra.mxu0 %v6812_v47  ;;  %v6848_v47 = vld [vmem:[#allocation11 + $0x8] sm:$0xff]  }
 0x6dc   : > { %6450 = vmatprep.subr.bf16.mxu0 %v7678_v20  ;;  %6441 = vmatpush3.bf16.msra.mxu1 %v6823_v30 }
 0x6dd   : > { %6442 = vmatprep.subr.bf16.mxu1 %v7678_v20 }
 0x6df   : > { %6451 = vmatpush3.bf16.msra.mxu0 %v6814_v24 }
 0x6e0   : > { %6452 = vmatprep.subr.bf16.mxu0 %v7678_v20  ;;  %6443 = vmatpush3.bf16.msra.mxu1 %v6825_v32 }
 0x6e1   : > { %6468 = vmatprep.subr.bf16.mxu1 %v7678_v20 }
 0x6e3   : > { %6453 = vmatpush3.bf16.msra.mxu0 %v6816_v26 }
 0x6e4   : > { %6454 = vmatprep.subr.bf16.mxu0 %v7678_v20 }
 0x6e7   : > { %6455 = vmatpush3.bf16.msra.mxu0 %v6818_v29 }
 0x6e8   : > { %6456 = vmatprep.subr.bf16.mxu0 %v7678_v20 }
 0x6eb   : > { %6457 = vmatpush3.bf16.msra.mxu0 %v6820_v31 }
 0x6ec   : > { %6458 = vmatprep.subr.bf16.mxu0 %v7678_v20 }
 0x6ef   : > { %6459 = vmatpush3.bf16.msra.mxu0 %v6822_v33 }
 0x6f0   : > { %6460 = vmatprep.subr.bf16.mxu0 %v7678_v20 }
 0x6f3   : > { %6461 = vmatpush3.bf16.msra.mxu0 %v6824_v34 }
 0x6f4   : > { %6462 = vmatprep.subr.bf16.mxu0 %v7678_v20 }
 0x6f7   : > { %6463 = vmatpush3.bf16.msra.mxu0 %v6826_v35 }
 0x6f8   : > { %6488 = vmatprep.subr.bf16.mxu0 %v7678_v20 }
 0x77a   : > { %v3038_v36 = vpop.f32.mrf.mxu0 }
 0x77c   : > { %v6386_v37 = vpop.f32.mrf.mxu0 }
 0x77e   : > { %v3041_v38 = vpop.f32.mrf.mxu0 }
 0x780   : > { %v6387_v39 = vpop.f32.mrf.mxu0 }
 0x782   : > { %v3127_v42 = vpop.f32.mrf.mxu1 }
 0x783   : > { %v3128_v49 = vadd.f32 %v3127_v42, %v3038_v36 }
 0x784   : > { %v6406_v43 = vpop.f32.mrf.mxu1 }
 0x786   : > { %v3130_v46 = vpop.f32.mrf.mxu1 }
 0x787   : > { %v3131_v56 = vadd.f32 %v3130_v46, %v3041_v38 }
 0x788   : > { %v6407_v48 = vpop.f32.mrf.mxu1 }
 0x79a   : > { %v3235_v50 = vpop.f32.mrf.mxu0 }
 0x79b   : > { %v3242_v52 = vadd.f32 %v3235_v50, %v3128_v49 }
 0x79c   : > { %v6426_v54 = vpop.f32.mrf.mxu0 }
 0x79d   : > { %v3244_v58 = vadd.f32 %v3242_v52, %v7721_v15  ;;  %v6829_v15 = vld [vmem:[#allocation9 + $0xa8] sm:$0xff]  }
 0x79e   : > { %v3238_v60 = vpop.f32.mrf.mxu0 }
 0x79f   : > { %3246 = vst [vmem:[#allocation2 + $0x8] sm:$0xff] %v3244_v58  ;;  %v3243_v62 = vadd.f32 %v3238_v60, %v3131_v56 }
 0x7a0   : > { %v6427_v0 = vpop.f32.mrf.mxu0 }
 0x7a1   : > { %v3245_v2 = vadd.f32 %v3243_v62, %v7718_v19  ;;  %v6830_v19 = vld [vmem:[#allocation9 + $0xa0] sm:$0xff]  }
 0x7a3   : > { %3247 = vst [vmem:[#allocation2 + $0x10] sm:$0xff] %v3245_v2  ;;  %v3269_v6 = vpack.c.bf16 %v3245_v2, %v3244_v58 }
 0x7a5   : > { %6445 = vmatmul.mubr.bf16.vlgmr.msra.gmra.mxu1 %v3269_v6 }
 0x7a6   : > { %6469 = vmatpush3.bf16.msra.mxu1 %v6827_v4  ;;  %6484 = vmatprep.mubr.msk.bf16.mxu1 %vm7217_vm0, %v7678_v20  ;;  %v3248_v51 = vld [vmem:[#allocation2 + $0x7] sm:$0xff] }
 0x7a7   : > { %6470 = vmatprep.subr.bf16.mxu1 %v7678_v20 }
 0x7aa   : > { %v3249_v57 = vld [vmem:[#allocation2 + $0xf] sm:$0xff]  ;;  %6471 = vmatpush3.bf16.msra.mxu1 %v6828_v8 }
 0x7ab   : > { %v3250_v63 = vpack.c.bf16 %v3249_v57, %v3248_v51  ;;  %6472 = vmatprep.subr.bf16.mxu1 %v7678_v20  ;;  %v3464_v9 = vld [vmem:[#allocation2 + $0x9] sm:$0xff]  ;;  %v3465_v10 = vld [vmem:[#allocation2 + $0x11] sm:$0xff] }
 0x7ac   : > { %v3466_v11 = vpack.c.bf16 %v3465_v10, %v3464_v9 }
 0x7ad   : > { %6465 = vmatmul.mubr.bf16.vlgmr.msra.gmra.mxu0 %v3250_v63 }
 0x7ae   : > { %6473 = vmatpush3.bf16.msra.mxu1 %v6829_v15  ;;  %6504 = vmatprep.mubr.msk.bf16.mxu0 %vm7217_vm0, %v7678_v20 }
 0x7af   : > { %6474 = vmatprep.subr.bf16.mxu1 %v7678_v20  ;;  %6489 = vmatpush3.bf16.msra.mxu0 %v6835_v12 }
 0x7b0   : > { %6490 = vmatprep.subr.bf16.mxu0 %v7678_v20 }
 0x7b2   : > { %6475 = vmatpush3.bf16.msra.mxu1 %v6830_v19 }
 0x7b3   : > { %6476 = vmatprep.subr.bf16.mxu1 %v7678_v20  ;;  %6491 = vmatpush3.bf16.msra.mxu0 %v6837_v13 }
 0x7b4   : > { %6492 = vmatprep.subr.bf16.mxu0 %v7678_v20 }
 0x7b6   : > { %6477 = vmatpush3.bf16.msra.mxu1 %v6831_v1 }
 0x7b7   : > { %6478 = vmatprep.subr.bf16.mxu1 %v7678_v20  ;;  %6493 = vmatpush3.bf16.msra.mxu0 %v6839_v14 }
 0x7b8   : > { %6494 = vmatprep.subr.bf16.mxu0 %v7678_v20 }
 0x7ba   : > { %6479 = vmatpush3.bf16.msra.mxu1 %v6832_v3 }
 0x7bb   : > { %6480 = vmatprep.subr.bf16.mxu1 %v7678_v20  ;;  %6495 = vmatpush3.bf16.msra.mxu0 %v6841_v59 }
 0x7bc   : > { %6496 = vmatprep.subr.bf16.mxu0 %v7678_v20 }
 0x7be   : > { %6481 = vmatpush3.bf16.msra.mxu1 %v6833_v5 }
 0x7bf   : > { %6482 = vmatprep.subr.bf16.mxu1 %v7678_v20  ;;  %6497 = vmatpush3.bf16.msra.mxu0 %v6843_v21 }
 0x7c0   : > { %6498 = vmatprep.subr.bf16.mxu0 %v7678_v20 }
 0x7c2   : > { %6483 = vmatpush3.bf16.msra.mxu1 %v6834_v7 }
 0x7c3   : > { %6508 = vmatprep.subr.bf16.mxu1 %v7678_v20  ;;  %6499 = vmatpush3.bf16.msra.mxu0 %v6845_v16 }
 0x7c4   : > { %6500 = vmatprep.subr.bf16.mxu0 %v7678_v20 }
 0x7c5   : > { %6485 = vmatmul.mubr.bf16.vlgmr.msra.gmra.mxu1 %v3466_v11 }
 0x7c6   : > { %6524 = vmatprep.mubr.msk.bf16.mxu1 %vm7217_vm0, %v7678_v20  ;;  %6509 = vmatpush3.bf16.msra.mxu1 %v6836_v17 }
 0x7c7   : > { %6510 = vmatprep.subr.bf16.mxu1 %v7678_v20  ;;  %6501 = vmatpush3.bf16.msra.mxu0 %v6847_v40 }
 0x7c8   : > { %6502 = vmatprep.subr.bf16.mxu0 %v7678_v20 }
 0x7ca   : > { %6511 = vmatpush3.bf16.msra.mxu1 %v6838_v18 }
 0x7cb   : > { %6512 = vmatprep.subr.bf16.mxu1 %v7678_v20  ;;  %6503 = vmatpush3.bf16.msra.mxu0 %v6849_v44 }
 0x7cc   : > { %6528 = vmatprep.subr.bf16.mxu0 %v7678_v20 }
 0x7ce   : > { %6513 = vmatpush3.bf16.msra.mxu1 %v6840_v55 }
 0x7cf   : > { %6514 = vmatprep.subr.bf16.mxu1 %v7678_v20 }
 0x7d2   : > { %6515 = vmatpush3.bf16.msra.mxu1 %v6842_v22 }
 0x7d3   : > { %6516 = vmatprep.subr.bf16.mxu1 %v7678_v20 }
 0x7d6   : > { %6517 = vmatpush3.bf16.msra.mxu1 %v6844_v41 }
 0x7d7   : > { %6518 = vmatprep.subr.bf16.mxu1 %v7678_v20 }
 0x7da   : > { %6519 = vmatpush3.bf16.msra.mxu1 %v6846_v45 }
 0x7db   : > { %6520 = vmatprep.subr.bf16.mxu1 %v7678_v20 }
 0x7de   : > { %6521 = vmatpush3.bf16.msra.mxu1 %v6848_v47 }
 0x7df   : > { %6522 = vmatprep.subr.bf16.mxu1 %v7678_v20 }
 0x7e2   : > { %6523 = vmatpush3.bf16.msra.mxu1 %v6850_v23 }
 0x7e3   : > { %6548 = vmatprep.subr.bf16.mxu1 %v7678_v20 }
 0x865   : > { %v3368_v24 = vpop.f32.mrf.mxu1 }
 0x867   : > { %v6446_v25 = vpop.f32.mrf.mxu1 }
 0x869   : > { %v3371_v26 = vpop.f32.mrf.mxu1 }
 0x86b   : > { %v6447_v27 = vpop.f32.mrf.mxu1 }
 0x86d   : > { %v3457_v28 = vpop.f32.mrf.mxu0 }
 0x86e   : > { %v3458_v32 = vadd.f32 %v3457_v28, %v3368_v24 }
 0x86f   : > { %v6466_v29 = vpop.f32.mrf.mxu0 }
 0x870   : > { %v6851_v29 = vld [vmem:[#allocation11 + $0xb8] sm:$0xff]  }
 0x871   : > { %v3460_v30 = vpop.f32.mrf.mxu0 }
 0x872   : > { %v3461_v36 = vadd.f32 %v3460_v30, %v3371_v26 }
 0x873   : > { %v6467_v31 = vpop.f32.mrf.mxu0 }
 0x874   : > { %v6852_v31 = vld [vmem:[#allocation11 + $0xb0] sm:$0xff]  }
 0x885   : > { %v3565_v33 = vpop.f32.mrf.mxu1 }
 0x886   : > { %v3572_v34 = vadd.f32 %v3565_v33, %v3458_v32 }
 0x887   : > { %v6486_v35 = vpop.f32.mrf.mxu1 }
 0x888   : > { %v3576_v37 = vmul.f32 0.70710677, %v3572_v34  ;;  %v3574_v45 = vmul.f32 0.5, %v3572_v34  ;;  %v6853_v34 = vld [vmem:[#allocation11 + $0xa8] sm:$0xff]  }
 0x889   : > { %v3568_v38 = vpop.f32.mrf.mxu1 }
 0x88a   : > { %v3578_v39 = vand.u32 2147483647, %v3576_v37  ;;  %v3573_v42 = vadd.f32 %v3568_v38, %v3461_v36  ;;  %vm3618_vm1 = vcmp.ge.f32.partialorder %v3576_v37, 0.0  ;;  %v6854_v36 = vld [vmem:[#allocation11 + $0xa0] sm:$0xff]   ;;  %v6855_v37 = vld [vmem:[#allocation11 + $0x98] sm:$0xff]   ;;  %v6856_v38 = vld [vmem:[#allocation11 + $0x90] sm:$0xff]  }
 0x88b   : > { %v6487_v43 = vpop.f32.mrf.mxu1 }
 0x88c   : > { %v3580_v46 = vmul.f32 0.3275911, %v3578_v39  ;;  %v3577_v48 = vmul.f32 0.70710677, %v3573_v42  ;;  %v3606_v56 = vsub.f32 0.0, %v3578_v39  ;;  %v3575_v26 = vmul.f32 0.5, %v3573_v42 }
 0x88d   : > { %v6858_v42 = vld [vmem:[#allocation11 + $0x80] sm:$0xff]  }
 0x88e   : > { %v3582_v49 = vadd.f32 1.0, %v3580_v46  ;;  %v3579_v50 = vand.u32 2147483647, %v3577_v48  ;;  %v3608_v58 = vmul.f32 %v3606_v56, %v3578_v39  ;;  %vm3619_vm2 = vcmp.ge.f32.partialorder %v3577_v48, 0.0  ;;  %v6857_v39 = vld [vmem:[#allocation11 + $0x88] sm:$0xff]   ;;  %v6862_v56 = vld [vmem:[#allocation11 + $0x30] sm:$0xff]  }
 0x890   : > { %6911 = vrcp.f32 %v3582_v49  ;;  %v3581_v52 = vmul.f32 0.3275911, %v3579_v50  ;;  %v3607_v60 = vsub.f32 0.0, %v3579_v50  ;;  %v3610_v2 = vmul.f32 1.442695, %v3608_v58  ;;  %v7839_v49 = vld [vmem:[#allocation2] sm:$0xff] }
 0x891   : > { %v6865_v58 = vld [vmem:[#allocation11 + $0x60] sm:$0xff]  }
 0x892   : > { %v3583_v54 = vadd.f32 1.0, %v3581_v52  ;;  %v3609_v4 = vmul.f32 %v3607_v60, %v3579_v50  ;;  %v6859_v50 = vld [vmem:[#allocation11 + $0x78] sm:$0xff]   ;;  %v6861_v52 = vld [vmem:[#allocation11 + $0x70] sm:$0xff]   ;;  %v6864_v60 = vld [vmem:[#allocation11 + $0x28] sm:$0xff]  }
 0x894   : > { %6913 = vrcp.f32 %v3583_v54  ;;  %v3612_v15 = vmul.f32 1.442695, %v3609_v4  ;;  %v6860_v54 = vld [vmem:[#allocation11 + $0x38] sm:$0xff]   ;;  %v6871_v4 = vld [vmem:[#allocation11 + $0x48] sm:$0xff]  }
 0x895   : > { %6915 = vpow2.f32 %v3610_v2  ;;  %v6866_v2 = vld [vmem:[#allocation11 + $0x20] sm:$0xff]  }
 0x896   : > { %6917 = vpow2.f32 %v3612_v15  ;;  %v6874_v15 = vld [vmem:[#allocation11] sm:$0xff]  }
 0x89d   : > { %v6912_v62 = vpop.eup %6911 }
 0x89e   : > { %v3588_v0 = vmul.f32 1.0614054, %v6912_v62 }
 0x8a0   : > { %v3590_v6 = vadd.f32 -1.4531521, %v3588_v0  ;;  %v6869_v0 = vld [vmem:[#allocation11 + $0x50] sm:$0xff]  }
 0x8a1   : > { %v6914_v8 = vpop.eup %6913 }
 0x8a2   : > { %v3592_v51 = vmul.f32 %v6912_v62, %v3590_v6  ;;  %v3589_v57 = vmul.f32 1.0614054, %v6914_v8  ;;  %v6916_v17 = vpop.eup %6915  ;;  %v6868_v6 = vld [vmem:[#allocation11 + $0x18] sm:$0xff]  }
 0x8a3   : > { %v6918_v16 = vpop.eup %6917 }
 0x8a4   : > { %v3594_v63 = vadd.f32 1.4214138, %v3592_v51  ;;  %v3591_v19 = vadd.f32 -1.4531521, %v3589_v57  ;;  %v6870_v51 = vld [vmem:[#allocation11 + $0x10] sm:$0xff]   ;;  %v6872_v57 = vld [vmem:[#allocation11 + $0x8] sm:$0xff]  }
 0x8a6   : > { %v3596_v1 = vmul.f32 %v6912_v62, %v3594_v63  ;;  %v3593_v3 = vmul.f32 %v6914_v8, %v3591_v19 }
 0x8a8   : > { %v3598_v5 = vadd.f32 -0.28449672, %v3596_v1  ;;  %v3595_v7 = vadd.f32 1.4214138, %v3593_v3 }
 0x8aa   : > { %v3600_v9 = vmul.f32 %v6912_v62, %v3598_v5  ;;  %v3597_v10 = vmul.f32 %v6914_v8, %v3595_v7 }
 0x8ac   : > { %v3602_v11 = vadd.f32 0.2548296, %v3600_v9  ;;  %v3599_v12 = vadd.f32 -0.28449672, %v3597_v10 }
 0x8ae   : > { %v3604_v13 = vmul.f32 %v6912_v62, %v3602_v11  ;;  %v3601_v14 = vmul.f32 %v6914_v8, %v3599_v12  ;;  %v6867_v62 = vld [vmem:[#allocation11 + $0x58] sm:$0xff]  }
 0x8b0   : > { %v3614_v59 = vmul.f32 %v6916_v17, %v3604_v13  ;;  %v3603_v18 = vadd.f32 0.2548296, %v3601_v14 }
 0x8b2   : > { %v3616_v21 = vsub.f32 1.0, %v3614_v59  ;;  %v3605_v55 = vmul.f32 %v6914_v8, %v3603_v18  ;;  %v6873_v8 = vld [vmem:[#allocation11 + $0x40] sm:$0xff]  }
 0x8b4   : > { %v3620_v22 = vsub.f32 0.0, %v3616_v21  ;;  %v3615_v40 = vmul.f32 %v6918_v16, %v3605_v55 }
 0x8b6   : > { %v3622_v41 = vsel %vm3618_vm1, %v3616_v21, %v3620_v22  ;;  %v3617_v44 = vsub.f32 1.0, %v3615_v40  ;;  %v6875_v22 = vld [vmem:[#allocation11 + $0xb8] sm:$0xff]  }
 0x8b7   : > { %v3624_v47 = vadd.f32 1.0, %v3622_v41  ;;  %v6876_v41 = vld [vmem:[#allocation11 + $0xb0] sm:$0xff]  }
 0x8b8   : > { %v3621_v23 = vsub.f32 0.0, %v3617_v44 }
 0x8b9   : > { %v7820_v24 = vmul.f32 %v3624_v47, %v3574_v45  ;;  %v6877_v47 = vld [vmem:[#allocation11 + $0xa8] sm:$0xff]  }
 0x8ba   : > { %v3623_v25 = vsel %vm3619_vm2, %v3617_v44, %v3621_v23 }
 0x8bb   : > { %3628 = vst [vmem:[#allocation2 + $0x8] sm:$0xff] %v7820_v24  ;;  %v3625_v27 = vadd.f32 1.0, %v3623_v25  ;;  %v6878_v25 = vld [vmem:[#allocation11 + $0xa0] sm:$0xff]  }
 0x8bd   : > { %v7823_v28 = vmul.f32 %v3625_v27, %v3575_v26  ;;  %v6879_v26 = vld [vmem:[#allocation11 + $0x98] sm:$0xff]   ;;  %v6880_v27 = vld [vmem:[#allocation11 + $0x90] sm:$0xff]  }
 0x8bf   : > { %3629 = vst [vmem:[#allocation2 + $0x10] sm:$0xff] %v7823_v28  ;;  %v3651_v30 = vpack.c.bf16 %v7823_v28, %v7820_v24 }
 0x8c1   : > { %6505 = vmatmul.mubr.bf16.vlgmr.msra.gmra.mxu0 %v3651_v30  ;;  %v6882_v30 = vld [vmem:[#allocation11 + $0x80] sm:$0xff]  }
 0x8c2   : > { %6529 = vmatpush3.bf16.msra.mxu0 %v6851_v29  ;;  %6544 = vmatprep.mubr.msk.bf16.mxu0 %vm7217_vm0, %v7678_v20  ;;  %v3630_v32 = vld [vmem:[#allocation2 + $0x7] sm:$0xff] }
 0x8c3   : > { %6530 = vmatprep.subr.bf16.mxu0 %v7678_v20  ;;  %v6881_v29 = vld [vmem:[#allocation11 + $0x88] sm:$0xff]  }
 0x8c6   : > { %v3631_v33 = vld [vmem:[#allocation2 + $0xf] sm:$0xff]  ;;  %6531 = vmatpush3.bf16.msra.mxu0 %v6852_v31 }
 0x8c7   : > { %v3632_v35 = vpack.c.bf16 %v3631_v33, %v3630_v32  ;;  %6532 = vmatprep.subr.bf16.mxu0 %v7678_v20  ;;  %v3847_v43 = vld [vmem:[#allocation2 + $0x9] sm:$0xff]  ;;  %v3848_v46 = vld [vmem:[#allocation2 + $0x11] sm:$0xff] }
 0x8c8   : > { %v3849_v48 = vpack.c.bf16 %v3848_v46, %v3847_v43  ;;  %v6891_v43 = vld [vmem:[#allocation11 + $0x58] sm:$0xff]   ;;  %v6893_v46 = vld [vmem:[#allocation11 + $0x50] sm:$0xff]  }
 0x8c9   : > { %6525 = vmatmul.mubr.bf16.vlgmr.msra.gmra.mxu1 %v3632_v35  ;;  %v6885_v35 = vld [vmem:[#allocation11 + $0x70] sm:$0xff]  }
 0x8ca   : > { %6533 = vmatpush3.bf16.msra.mxu0 %v6853_v34  ;;  %6564 = vmatprep.mubr.msk.bf16.mxu1 %vm7217_vm0, %v7678_v20  ;;  %v6883_v34 = vld [vmem:[#allocation11 + $0x78] sm:$0xff]  }
 0x8cb   : > { %6534 = vmatprep.subr.bf16.mxu0 %v7678_v20  ;;  %6549 = vmatpush3.bf16.msra.mxu1 %v6859_v50  ;;  %v6895_v50 = vld [vmem:[#allocation11 + $0x48] sm:$0xff]  }
 0x8cc   : > { %6550 = vmatprep.subr.bf16.mxu1 %v7839_v49 }
 0x8ce   : > { %6535 = vmatpush3.bf16.msra.mxu0 %v6854_v36  ;;  %v6884_v36 = vld [vmem:[#allocation11 + $0x38] sm:$0xff]  }
 0x8cf   : > { %6536 = vmatprep.subr.bf16.mxu0 %v7678_v20  ;;  %6551 = vmatpush3.bf16.msra.mxu1 %v6861_v52  ;;  %v6892_v52 = vld [vmem:[#allocation11 + $0x18] sm:$0xff]  }
 0x8d0   : > { %6552 = vmatprep.subr.bf16.mxu1 %v7839_v49 }
 0x8d2   : > { %6537 = vmatpush3.bf16.msra.mxu0 %v6855_v37  ;;  %v6887_v37 = vld [vmem:[#allocation11 + $0x68] sm:$0xff]  }
 0x8d3   : > { %6538 = vmatprep.subr.bf16.mxu0 %v7678_v20 }
 0x8d6   : > { %6539 = vmatpush3.bf16.msra.mxu0 %v6856_v38  ;;  %v6886_v38 = vld [vmem:[#allocation11 + $0x30] sm:$0xff]  }
 0x8d7   : > { %6540 = vmatprep.subr.bf16.mxu0 %v7678_v20 }
 0x8da   : > { %6541 = vmatpush3.bf16.msra.mxu0 %v6857_v39  ;;  %v6889_v39 = vld [vmem:[#allocation11 + $0x60] sm:$0xff]  }
 0x8db   : > { %6542 = vmatprep.subr.bf16.mxu0 %v7678_v20  ;;  %v6863_v20 = vld [vmem:[#allocation11 + $0x68] sm:$0xff]  }
 0x8dc   : > { %6553 = vmatpush3.bf16.msra.mxu1 %v6863_v20  ;;  %v6894_v20 = vld [vmem:[#allocation11 + $0x10] sm:$0xff]  }
 0x8dd   : > { %6554 = vmatprep.subr.bf16.mxu1 %v7839_v49 }
 0x8de   : > { %6543 = vmatpush3.bf16.msra.mxu0 %v6858_v42  ;;  %v6888_v42 = vld [vmem:[#allocation11 + $0x28] sm:$0xff]  }
 0x8df   : > { %6568 = vmatprep.subr.bf16.mxu0 %v7839_v49 }
 0x8e0   : > { %6555 = vmatpush3.bf16.msra.mxu1 %v6865_v58  ;;  %v6898_v58 = vld [vmem:[#allocation11] sm:$0xff]  }
 0x8e1   : > { %6545 = vmatmul.mubr.bf16.vlgmr.msra.gmra.mxu0 %v3849_v48  ;;  %6556 = vmatprep.subr.bf16.mxu1 %v7839_v49  ;;  %v6890_v48 = vld [vmem:[#allocation11 + $0x20] sm:$0xff]  }
 0x8e2   : > { %6584 = vmatprep.mubr.msk.bf16.mxu0 %vm7217_vm0, %v7839_v49  ;;  %6569 = vmatpush3.bf16.msra.mxu0 %v6860_v54  ;;  %v6897_v54 = vld [vmem:[#allocation11 + $0x40] sm:$0xff]  }
 0x8e3   : > { %6570 = vmatprep.subr.bf16.mxu0 %v7839_v49 }
 0x8e4   : > { %6557 = vmatpush3.bf16.msra.mxu1 %v6867_v62 }
 0x8e5   : > { %6558 = vmatprep.subr.bf16.mxu1 %v7839_v49 }
 0x8e6   : > { %6571 = vmatpush3.bf16.msra.mxu0 %v6862_v56  ;;  %v6896_v56 = vld [vmem:[#allocation11 + $0x8] sm:$0xff]  }
 0x8e7   : > { %6572 = vmatprep.subr.bf16.mxu0 %v7839_v49 }
 0x8e8   : > { %6559 = vmatpush3.bf16.msra.mxu1 %v6869_v0 }
 0x8e9   : > { %6560 = vmatprep.subr.bf16.mxu1 %v7839_v49 }
 0x8ea   : > { %6573 = vmatpush3.bf16.msra.mxu0 %v6864_v60 }
 0x8eb   : > { %6574 = vmatprep.subr.bf16.mxu0 %v7839_v49 }
 0x8ec   : > { %6561 = vmatpush3.bf16.msra.mxu1 %v6871_v4 }
 0x8ed   : > { %6562 = vmatprep.subr.bf16.mxu1 %v7839_v49 }
 0x8ee   : > { %6575 = vmatpush3.bf16.msra.mxu0 %v6866_v2 }
 0x8ef   : > { %6576 = vmatprep.subr.bf16.mxu0 %v7839_v49 }
 0x8f0   : > { %6563 = vmatpush3.bf16.msra.mxu1 %v6873_v8 }
 0x8f1   : > { %6588 = vmatprep.subr.bf16.mxu1 %v7839_v49 }
 0x8f2   : > { %6577 = vmatpush3.bf16.msra.mxu0 %v6868_v6 }
 0x8f3   : > { %6578 = vmatprep.subr.bf16.mxu0 %v7839_v49 }
 0x8f6   : > { %6579 = vmatpush3.bf16.msra.mxu0 %v6870_v51 }
 0x8f7   : > { %6580 = vmatprep.subr.bf16.mxu0 %v7839_v49 }
 0x8fa   : > { %6581 = vmatpush3.bf16.msra.mxu0 %v6872_v57 }
 0x8fb   : > { %6582 = vmatprep.subr.bf16.mxu0 %v7839_v49 }
 0x8fe   : > { %6583 = vmatpush3.bf16.msra.mxu0 %v6874_v15 }
 0x8ff   : > { %6608 = vmatprep.subr.bf16.mxu0 %v7839_v49 }
 0x981   : > { %v3751_v63 = vpop.f32.mrf.mxu0 }
 0x983   : > { %v6506_v19 = vpop.f32.mrf.mxu0 }
 0x985   : > { %v3754_v1 = vpop.f32.mrf.mxu0 }
 0x987   : > { %v6507_v3 = vpop.f32.mrf.mxu0 }
 0x989   : > { %v3840_v5 = vpop.f32.mrf.mxu1 }
 0x98a   : > { %v3841_v11 = vadd.f32 %v3840_v5, %v3751_v63 }
 0x98b   : > { %v6526_v7 = vpop.f32.mrf.mxu1 }
 0x98d   : > { %v3843_v9 = vpop.f32.mrf.mxu1 }
 0x98e   : > { %v3844_v17 = vadd.f32 %v3843_v9, %v3754_v1 }
 0x98f   : > { %v6527_v10 = vpop.f32.mrf.mxu1 }
 0x9a1   : > { %v3949_v12 = vpop.f32.mrf.mxu0 }
 0x9a2   : > { %v3956_v13 = vadd.f32 %v3949_v12, %v3841_v11  ;;  %v6899_v11 = vld [vmem:[#allocation11 + $0xb8] sm:$0xff]  }
 0x9a3   : > { %v6546_v14 = vpop.f32.mrf.mxu0 }
 0x9a4   : > { %v3958_v59 = vadd.f32 %v3956_v13, %v7820_v24  ;;  %v6900_v13 = vld [vmem:[#allocation11 + $0xb0] sm:$0xff]  }
 0x9a5   : > { %v3952_v18 = vpop.f32.mrf.mxu0 }
 0x9a6   : > { %3960 = vst [vmem:[#allocation2 + $0x8] sm:$0xff] %v3958_v59  ;;  %v3957_v21 = vadd.f32 %v3952_v18, %v3844_v17  ;;  %v6903_v18 = vld [vmem:[#allocation11 + $0x98] sm:$0xff]  }
 0x9a7   : > { %v6547_v55 = vpop.f32.mrf.mxu0 }
 0x9a8   : > { %v3959_v16 = vadd.f32 %v3957_v21, %v7823_v28  ;;  %v6904_v21 = vld [vmem:[#allocation11 + $0x90] sm:$0xff]   ;;  %v6905_v55 = vld [vmem:[#allocation11 + $0x88] sm:$0xff]  }
 0x9aa   : > { %3961 = vst [vmem:[#allocation2 + $0x10] sm:$0xff] %v3959_v16  ;;  %v3983_v40 = vpack.c.bf16 %v3959_v16, %v3958_v59  ;;  %v6906_v16 = vld [vmem:[#allocation11 + $0x80] sm:$0xff]  }
 0x9ac   : > { %6565 = vmatmul.mubr.bf16.vlgmr.msra.gmra.mxu1 %v3983_v40 }
 0x9ad   : > { %6589 = vmatpush3.bf16.msra.mxu1 %v6875_v22  ;;  %6604 = vmatprep.mubr.msk.bf16.mxu1 %vm7217_vm0, %v7839_v49  ;;  %v3962_v44 = vld [vmem:[#allocation2 + $0x7] sm:$0xff] }
 0x9ae   : > { %6590 = vmatprep.subr.bf16.mxu1 %v7839_v49 }
 0x9b1   : > { %v3963_v45 = vld [vmem:[#allocation2 + $0xf] sm:$0xff]  ;;  %6591 = vmatpush3.bf16.msra.mxu1 %v6876_v41 }
 0x9b2   : > { %v3964_v23 = vpack.c.bf16 %v3963_v45, %v3962_v44  ;;  %6592 = vmatprep.subr.bf16.mxu1 %v7839_v49  ;;  %v4178_v31 = vld [vmem:[#allocation2 + $0x9] sm:$0xff]  ;;  %v4179_v32 = vld [vmem:[#allocation2 + $0x11] sm:$0xff] }
 0x9b3   : > { %v4180_v33 = vpack.c.bf16 %v4179_v32, %v4178_v31 }
 0x9b4   : > { %6585 = vmatmul.mubr.bf16.vlgmr.msra.gmra.mxu0 %v3964_v23 }
 0x9b5   : > { %6593 = vmatpush3.bf16.msra.mxu1 %v6877_v47  ;;  %6624 = vmatprep.mubr.msk.bf16.mxu0 %vm7217_vm0, %v7839_v49 }
 0x9b6   : > { %6594 = vmatprep.subr.bf16.mxu1 %v7839_v49  ;;  %6609 = vmatpush3.bf16.msra.mxu0 %v6883_v34 }
 0x9b7   : > { %6610 = vmatprep.subr.bf16.mxu0 %v7839_v49 }
 0x9b9   : > { %6595 = vmatpush3.bf16.msra.mxu1 %v6878_v25 }
 0x9ba   : > { %6596 = vmatprep.subr.bf16.mxu1 %v7839_v49  ;;  %6611 = vmatpush3.bf16.msra.mxu0 %v6885_v35 }
 0x9bb   : > { %6612 = vmatprep.subr.bf16.mxu0 %v7839_v49 }
 0x9bd   : > { %6597 = vmatpush3.bf16.msra.mxu1 %v6879_v26 }
 0x9be   : > { %6598 = vmatprep.subr.bf16.mxu1 %v7839_v49  ;;  %6613 = vmatpush3.bf16.msra.mxu0 %v6887_v37 }
 0x9bf   : > { %6614 = vmatprep.subr.bf16.mxu0 %v7839_v49 }
 0x9c1   : > { %6599 = vmatpush3.bf16.msra.mxu1 %v6880_v27 }
 0x9c2   : > { %6600 = vmatprep.subr.bf16.mxu1 %v7839_v49  ;;  %6615 = vmatpush3.bf16.msra.mxu0 %v6889_v39 }
 0x9c3   : > { %6616 = vmatprep.subr.bf16.mxu0 %v7839_v49 }
 0x9c5   : > { %6601 = vmatpush3.bf16.msra.mxu1 %v6881_v29 }
 0x9c6   : > { %6602 = vmatprep.subr.bf16.mxu1 %v7839_v49  ;;  %6617 = vmatpush3.bf16.msra.mxu0 %v6891_v43 }
 0x9c7   : > { %6618 = vmatprep.subr.bf16.mxu0 %v7839_v49 }
 0x9c9   : > { %6603 = vmatpush3.bf16.msra.mxu1 %v6882_v30 }
 0x9ca   : > { %6628 = vmatprep.subr.bf16.mxu1 %v7839_v49  ;;  %6619 = vmatpush3.bf16.msra.mxu0 %v6893_v46 }
 0x9cb   : > { %6620 = vmatprep.subr.bf16.mxu0 %v7839_v49 }
 0x9cc   : > { %6605 = vmatmul.mubr.bf16.vlgmr.msra.gmra.mxu1 %v4180_v33 }
 0x9cd   : > { %6644 = vmatprep.mubr.msk.bf16.mxu1 %vm7217_vm0, %v7839_v49  ;;  %6629 = vmatpush3.bf16.msra.mxu1 %v6884_v36 }
 0x9ce   : > { %6630 = vmatprep.subr.bf16.mxu1 %v7839_v49  ;;  %6621 = vmatpush3.bf16.msra.mxu0 %v6895_v50 }
 0x9cf   : > { %6622 = vmatprep.subr.bf16.mxu0 %v7839_v49 }
 0x9d1   : > { %6631 = vmatpush3.bf16.msra.mxu1 %v6886_v38 }
 0x9d2   : > { %6632 = vmatprep.subr.bf16.mxu1 %v7839_v49  ;;  %6623 = vmatpush3.bf16.msra.mxu0 %v6897_v54 }
 0x9d3   : > { %6648 = vmatprep.subr.bf16.mxu0 %v7839_v49 }
 0x9d5   : > { %6633 = vmatpush3.bf16.msra.mxu1 %v6888_v42 }
 0x9d6   : > { %6634 = vmatprep.subr.bf16.mxu1 %v7839_v49 }
 0x9d9   : > { %6635 = vmatpush3.bf16.msra.mxu1 %v6890_v48 }
 0x9da   : > { %6636 = vmatprep.subr.bf16.mxu1 %v7839_v49 }
 0x9dd   : > { %6637 = vmatpush3.bf16.msra.mxu1 %v6892_v52 }
 0x9de   : > { %6638 = vmatprep.subr.bf16.mxu1 %v7839_v49 }
 0x9e1   : > { %6639 = vmatpush3.bf16.msra.mxu1 %v6894_v20 }
 0x9e2   : > { %6640 = vmatprep.subr.bf16.mxu1 %v7839_v49 }
 0x9e5   : > { %6641 = vmatpush3.bf16.msra.mxu1 %v6896_v56 }
 0x9e6   : > { %6642 = vmatprep.subr.bf16.mxu1 %v7839_v49 }
 0x9e9   : > { %6643 = vmatpush3.bf16.msra.mxu1 %v6898_v58 }
 0xa6c   : > { %v4082_v60 = vpop.f32.mrf.mxu1 }
 0xa6e   : > { %v6566_v62 = vpop.f32.mrf.mxu1 }
 0xa70   : > { %v4085_v0 = vpop.f32.mrf.mxu1 }
 0xa72   : > { %v6567_v2 = vpop.f32.mrf.mxu1 }
 0xa74   : > { %v4171_v4 = vpop.f32.mrf.mxu0 }
 0xa75   : > { %v4172_v57 = vadd.f32 %v4171_v4, %v4082_v60 }
 0xa76   : > { %v6586_v6 = vpop.f32.mrf.mxu0 }
 0xa78   : > { %v4174_v8 = vpop.f32.mrf.mxu0 }
 0xa79   : > { %v4175_v1 = vadd.f32 %v4174_v8, %v4085_v0 }
 0xa7a   : > { %v6587_v51 = vpop.f32.mrf.mxu0 }
 0xa8c   : > { %v4279_v15 = vpop.f32.mrf.mxu1 }
 0xa8d   : > { %v4286_v63 = vadd.f32 %v4279_v15, %v4172_v57 }
 0xa8e   : > { %v6606_v19 = vpop.f32.mrf.mxu1 }
 0xa8f   : > { %v4288_v3 = vadd.f32 %v4286_v63, %v7820_v24  ;;  %v6901_v24 = vld [vmem:[#allocation11 + $0xa8] sm:$0xff]  }
 0xa90   : > { %v4282_v5 = vpop.f32.mrf.mxu1 }
 0xa91   : > { %4290 = vst [vmem:[#allocation2 + $0x8] sm:$0xff] %v4288_v3  ;;  %v4287_v7 = vadd.f32 %v4282_v5, %v4175_v1 }
 0xa92   : > { %v6607_v9 = vpop.f32.mrf.mxu1 }
 0xa93   : > { %v4289_v10 = vadd.f32 %v4287_v7, %v7823_v28  ;;  %v6902_v28 = vld [vmem:[#allocation11 + $0xa0] sm:$0xff]  }
 0xa95   : > { %4291 = vst [vmem:[#allocation2 + $0x10] sm:$0xff] %v4289_v10  ;;  %v4313_v12 = vpack.c.bf16 %v4289_v10, %v4288_v3 }
 0xa97   : > { %6625 = vmatmul.mubr.bf16.vlgmr.msra.gmra.mxu0 %v4313_v12 }
 0xa98   : > { %6649 = vmatpush3.bf16.msra.mxu0 %v6899_v11  ;;  %6664 = vmatprep.mubr.msk.bf16.mxu0 %vm7217_vm0, %v7839_v49  ;;  %v4292_v14 = vld [vmem:[#allocation2 + $0x7] sm:$0xff] }
 0xa99   : > { %6650 = vmatprep.subr.bf16.mxu0 %v7839_v49 }
 0xa9c   : > { %v4293_v17 = vld [vmem:[#allocation2 + $0xf] sm:$0xff]  ;;  %6651 = vmatpush3.bf16.msra.mxu0 %v6900_v13 }
 0xa9d   : > { %v4294_v59 = vpack.c.bf16 %v4293_v17, %v4292_v14  ;;  %6652 = vmatprep.subr.bf16.mxu0 %v7839_v49  ;;  %v4508_v22 = vld [vmem:[#allocation2 + $0x9] sm:$0xff]  ;;  %v4509_v40 = vld [vmem:[#allocation2 + $0x11] sm:$0xff] }
 0xa9e   : > { %v4510_v41 = vpack.c.bf16 %v4509_v40, %v4508_v22 }
 0xa9f   : > { %6645 = vmatmul.mubr.bf16.vlgmr.msra.gmra.mxu1 %v4294_v59 }
 0xaa0   : > { %6653 = vmatpush3.bf16.msra.mxu0 %v6901_v24 }
 0xaa1   : > { %6654 = vmatprep.subr.bf16.mxu0 %v7839_v49 }
 0xaa4   : > { %6655 = vmatpush3.bf16.msra.mxu0 %v6902_v28 }
 0xaa5   : > { %6656 = vmatprep.subr.bf16.mxu0 %v7839_v49 }
 0xaa8   : > { %6657 = vmatpush3.bf16.msra.mxu0 %v6903_v18 }
 0xaa9   : > { %6658 = vmatprep.subr.bf16.mxu0 %v7839_v49 }
 0xaac   : > { %6659 = vmatpush3.bf16.msra.mxu0 %v6904_v21 }
 0xaad   : > { %6660 = vmatprep.subr.bf16.mxu0 %v7839_v49 }
 0xab0   : > { %6661 = vmatpush3.bf16.msra.mxu0 %v6905_v55 }
 0xab1   : > { %6662 = vmatprep.subr.bf16.mxu0 %v7839_v49  ;;  %v4919_v49 = vld [vmem:[%s7965_s7] ss:$0 sm:$0xff] }
 0xab4   : > { %6663 = vmatpush3.bf16.msra.mxu0 %v6906_v16 }
 0xab7   : > { %6665 = vmatmul.mubr.bf16.vlgmr.msra.gmra.mxu0 %v4510_v41 }
 0xb57   : > { %v4412_v44 = vpop.f32.mrf.mxu0 }
 0xb59   : > { %v6626_v45 = vpop.f32.mrf.mxu0 }
 0xb5b   : > { %v4415_v47 = vpop.f32.mrf.mxu0 }
 0xb5d   : > { %v6627_v23 = vpop.f32.mrf.mxu0 }
 0xb5f   : > { %v4501_v25 = vpop.f32.mrf.mxu1 }
 0xb60   : > { %v4502_v30 = vadd.f32 %v4501_v25, %v4412_v44 }
 0xb61   : > { %v6646_v26 = vpop.f32.mrf.mxu1 }
 0xb63   : > { %v4504_v27 = vpop.f32.mrf.mxu1 }
 0xb64   : > { %v4505_v34 = vadd.f32 %v4504_v27, %v4415_v47 }
 0xb65   : > { %v6647_v29 = vpop.f32.mrf.mxu1 }
 0xb77   : > { %v4609_v31 = vpop.f32.mrf.mxu0 }
 0xb78   : > { %v4616_v32 = vadd.f32 %v4609_v31, %v4502_v30 }
 0xb79   : > { %v6666_v33 = vpop.f32.mrf.mxu0 }
 0xb7a   : > { %v4625_v35 = vmul.f32 %v4919_v49, %v4616_v32 }
 0xb7b   : > { %v4612_v36 = vpop.f32.mrf.mxu0 }
 0xb7c   : > { %v4627_v37 = vadd.f32 %v7599_v61, %v4625_v35  ;;  %v4617_v38 = vadd.f32 %v4612_v36, %v4505_v34 }
 0xb7d   : > { %v6667_v39 = vpop.f32.mrf.mxu0 }
 0xb7e   : > { %4629 = vst [vmem:[%s381_s15] sm:$0xff] %v4627_v37  ;;  %v4626_v42 = vmul.f32 %v4919_v49, %v4617_v38 }
 0xb80   : > { %v4628_v43 = vadd.f32 %v7593_v53, %v4626_v42 }
 0xb82   : > { %4630 = vst [vmem:[%s381_s15 + $0x8] sm:$0xff] %v4628_v43 }
 0xb83   : > { %7146 = shalt.err (!%p7143_p3)
}
 0xb84   : > { %s7147_s20 = scalar_lea.hbm %s7914_s10, 256  ;;  %s7151_s22 = scalar_lea.hbm %s7966_s8, 512 }
 0xb85   : > { %p7148_p6 = scmp.ne.s32.totalorder %s7914_s10, %s7147_s20  ;;  %p7152_p13 = scmp.lt.s32.totalorder %s7914_s10, %s7966_s8 }
 0xb86   : > { %p7153_p11 = scmp.lt.s32.totalorder %s7151_s22, %s7147_s20 }
 0xb87   : > { %p7149_p4 = pnand %p7148_p6, %p7992_p2 }
 0xb88   : > { %p7154_p5 = por %p7153_p11, %p7152_p13 }
 0xb89   : > { %p7150_p8 = pneg %p7149_p4 }
 0xb8b   : > { %p7155_p1 = pnand %p7154_p5, %p7150_p8 }
 0xb8d   : > { %7158 = shalt.err (!%p7155_p1)
}
 0xb8e   : > { %s7219_s21 = smov 128   ;;  %s7220_s26 = smov 8  }
 0xb8f   : > { %6686 = dma.vmem_to_hbm [thread:$0]  (%p7992_p2), %s7909_s24, 256, %s7914_s10, %s4632_s2, %s7219_s21, %s7219_s21, %s7220_s26  }
 0xb90 PF: > { %s4660_s19 = sand.u32 1, %s7193_s27   ;;  %p7993_p12 = scmp.ne.s32.totalorder %s7976_s12, 0 }
 0xb91   : > { %p7994_p7 = scmp.ge.s32.totalorder %s7205_s30, 2  ;;  %s4661_s9 = scalar_lea.sflag [#allocation5], %s4660_s19 }
 0xb93   : > { %p6706_p9 = pnand %p7994_p7, %p7993_p12 }
 0xb95   : > { %p6707_p0 = pneg %p6706_p9 }
 0xb97   : > { %7188 = dma.done.wait (%p6707_p0), %s4661_s9, 256  }
 0xb98   : > { %7190 = vsyncadd (%p6707_p0), %s4661_s9, 4294967040  ;;  %p23_p10 = scmp.ge.s32.totalorder %s7366_s17, 4   ;;  %s7995_s27 = smov %s7197_s28 }
 0xb99   : > { %s7996_s28 = smov %s7201_s29  ;;  %s7997_s29 = smov %s7375_s23 }
 0xb9a   : > { %s7998_s30 = smov %s7366_s17  ;;  %25 = sbr.rel (!%p23_p10) target bundleno = 10 (0xa), region = 123 }
 0xb9f   :  { %4666 = vsyncpa [#allocation4], 1 }
 0xba0   :  { %4668 = vsyncpa [#allocation4 + $0x1], 1 }
 0xba1   :  { %4669 = vsyncpa [#allocation7], 1 }
 0xba2   :  { %4670 = vsyncpa [#allocation10], 1 }
 0xba3   :  { %4671 = vsyncpa [#allocation5], 1 }
 0xba4   :  { %4673 = vsyncpa [#allocation5 + $0x1], 1 }

</bundles_post_ra>
